<compile_context>
chip_gen: v5e
topology: v5e:2x2
jax: 0.10.0
libtpu: 0.0.40
codegen_flags: <defaults>
</compile_context>

<pallas_src>
import jax
import jax.numpy as jnp
from jax.experimental import pallas as pl
from jax.experimental.pallas import tpu as pltpu


def _resblock_kernel(x_ref, w1_ref, b1_ref, w2_ref, b2_ref, o_ref, pad_scr):
    # x_ref        : (H, W, C)      single HBM read; also the residual branch
    # w1_ref/w2_ref: (9*C, C)       flattened 3x3 HWIO weights (im2col order)
    # b1_ref/b2_ref: (1, C)
    # o_ref        : (H, W, C)
    # pad_scr      : (H+2, W+2, C)  zero-bordered padded tile (input dtype)
    H, W, C = x_ref.shape
    dt = x_ref.dtype

    # Zero only the 1-pixel border; the interior is fully overwritten below.
    pad_scr[0:1, :, :] = jnp.zeros((1, W + 2, C), dt)
    pad_scr[H + 1:H + 2, :, :] = jnp.zeros((1, W + 2, C), dt)
    pad_scr[1:H + 1, 0:1, :] = jnp.zeros((H, 1, C), dt)
    pad_scr[1:H + 1, W + 1:W + 2, :] = jnp.zeros((H, 1, C), dt)

    def conv3x3(w_ref, b_ref):
        # im2col: fold the 9 shifted taps into one (H*W, 9C) x (9C, C) matmul.
        xp = pad_scr[...]
        taps = [xp[kh:kh + H, kw:kw + W, :].reshape(H * W, C)
                for kh in range(3) for kw in range(3)]
        slab = jnp.concatenate(taps, axis=1)                  # (H*W, 9C)
        acc = jnp.dot(slab, w_ref[...],
                      preferred_element_type=jnp.float32)     # (H*W, C) f32
        return acc + b_ref[...].astype(jnp.float32)           # bias broadcast

    x = x_ref[...]

    # ---- conv1 + ReLU ----
    pad_scr[1:H + 1, 1:W + 1, :] = x
    r1 = jnp.maximum(conv3x3(w1_ref, b1_ref), 0.0)

    # ---- conv2 (reuse the same padded scratch; border is still zero) ----
    pad_scr[1:H + 1, 1:W + 1, :] = r1.reshape(H, W, C).astype(dt)
    r2 = conv3x3(w2_ref, b2_ref)

    # ---- residual add ----
    o_ref[...] = (x.astype(jnp.float32)
                  + r2.reshape(H, W, C)).astype(o_ref.dtype)


def resblock_pallas(x_nhwc, w1, b1, w2, b2):
    """x_nhwc: (B,H,W,C); w1,w2: (3,3,Cin,Cout) HWIO; b1,b2: (C,)."""
    B, H, W, C = x_nhwc.shape
    # (kh, kw, i) flattened -> row (kh*3 + kw)*C + i  (matches tap order).
    w1r = w1.reshape(9 * C, C)
    w2r = w2.reshape(9 * C, C)
    b1r = b1.reshape(1, C)
    b2r = b2.reshape(1, C)

    return pl.pallas_call(
        _resblock_kernel,
        out_shape=jax.ShapeDtypeStruct((B, H, W, C), x_nhwc.dtype),
        grid_spec=pltpu.PrefetchScalarGridSpec(
            num_scalar_prefetch=0,
            grid=(B,),
            in_specs=[
                pl.BlockSpec((None, H, W, C), lambda b: (b, 0, 0, 0)),
                pl.BlockSpec((9 * C, C), lambda b: (0, 0)),
                pl.BlockSpec((1, C), lambda b: (0, 0)),
                pl.BlockSpec((9 * C, C), lambda b: (0, 0)),
                pl.BlockSpec((1, C), lambda b: (0, 0)),
            ],
            out_specs=pl.BlockSpec((None, H, W, C), lambda b: (b, 0, 0, 0)),
            scratch_shapes=[pltpu.VMEM((H + 2, W + 2, C), x_nhwc.dtype)],
        ),
        compiler_params=pltpu.CompilerParams(
            dimension_semantics=("parallel",)),
    )(x_nhwc, w1r, b1r, w2r, b2r)


def resblock_reference(x_nhwc, w1, b1, w2, b2):
    dn = ('NHWC', 'HWIO', 'NHWC')
    r = jax.lax.conv_general_dilated(x_nhwc, w1, (1, 1), 'SAME',
                                     dimension_numbers=dn) + b1
    r = jnp.maximum(r, 0.0)
    r = jax.lax.conv_general_dilated(r, w2, (1, 1), 'SAME',
                                     dimension_numbers=dn) + b2
    return x_nhwc + r


if __name__ == "__main__":
    key = jax.random.PRNGKey(0)
    B, C, H, W = 2, 4, 16, 16
    kx, k1, k2, kb1, kb2 = jax.random.split(key, 5)

    # Inputs in the PyTorch module's native layouts.
    x_nchw = jax.random.normal(kx, (B, C, H, W), dtype=jnp.float32)
    fan_in = C * 3 * 3
    bound = 1.0 / (fan_in ** 0.5)
    w1_oihw = jax.random.uniform(k1, (C, C, 3, 3), jnp.float32, -bound, bound)
    w2_oihw = jax.random.uniform(k2, (C, C, 3, 3), jnp.float32, -bound, bound)
    b1 = jax.random.uniform(kb1, (C,), jnp.float32, -bound, bound)
    b2 = jax.random.uniform(kb2, (C,), jnp.float32, -bound, bound)

    # NCHW -> NHWC, OIHW -> HWIO for the channels-in-lanes kernel layout.
    x = jnp.transpose(x_nchw, (0, 2, 3, 1))
    w1 = jnp.transpose(w1_oihw, (2, 3, 1, 0))
    w2 = jnp.transpose(w2_oihw, (2, 3, 1, 0))

    out = jax.block_until_ready(resblock_pallas(x, w1, b1, w2, b2))
    ref = resblock_reference(x, w1, b1, w2, b2)
    assert out.shape == (B, H, W, C)
    assert jnp.allclose(out, ref, atol=1e-4, rtol=1e-4), "mismatch vs reference"

    # Back to the PyTorch module's NCHW output layout.
    out_nchw = jnp.transpose(out, (0, 3, 1, 2))
    assert out_nchw.shape == (B, C, H, W)

    print("KERNEL_OK")
</pallas_src>

<mosaic_0001>
module attributes {stable_mosaic.version = 11 : i64} {
  func.func @_resblock_kernel(%arg0: i32, %arg1: memref<1x16x16x4xf32, #tpu.memory_space<vmem>>, %arg2: memref<36x4xf32, #tpu.memory_space<vmem>>, %arg3: memref<1x4xf32, #tpu.memory_space<vmem>>, %arg4: memref<36x4xf32, #tpu.memory_space<vmem>>, %arg5: memref<1x4xf32, #tpu.memory_space<vmem>>, %arg6: memref<1x16x16x4xf32, #tpu.memory_space<vmem>>, %arg7: memref<18x18x4xf32, #tpu.memory_space<vmem>>) attributes {dimension_semantics = [#tpu.dimension_semantics<parallel>], iteration_bounds = array<i64: 2>, scalar_prefetch = 0 : i64, scratch_operands = 1 : i64, tpu.core_type = #tpu.core_type<tc>, window_params = [{transform_indices = @transform_0, window_bounds = array<i64: 1, 16, 16, 4>}, {pipeline_mode = #tpu.pipeline_mode<synchronous>, transform_indices = @transform_1, window_bounds = array<i64: 36, 4>}, {pipeline_mode = #tpu.pipeline_mode<synchronous>, transform_indices = @transform_2, window_bounds = array<i64: 1, 4>}, {pipeline_mode = #tpu.pipeline_mode<synchronous>, transform_indices = @transform_3, window_bounds = array<i64: 36, 4>}, {pipeline_mode = #tpu.pipeline_mode<synchronous>, transform_indices = @transform_4, window_bounds = array<i64: 1, 4>}, {transform_indices = @transform_5, window_bounds = array<i64: 1, 16, 16, 4>}]} {
    %cst = arith.constant 0.000000e+00 : f32
    %0 = vector.broadcast %cst : f32 to vector<1x18x4xf32>
    %c0 = arith.constant 0 : index
    %c0_0 = arith.constant 0 : index
    %c0_1 = arith.constant 0 : index
    %1 = vector.load %arg7[%c0, %c0_0, %c0_1] : memref<18x18x4xf32, #tpu.memory_space<vmem>>, vector<1x18x4xf32>
    tpu.vector_store %arg7[%c0, %c0_0, %c0_1], %0 {strides = array<i32>} : memref<18x18x4xf32, #tpu.memory_space<vmem>>, vector<1x18x4xf32>,
    %cst_2 = arith.constant 0.000000e+00 : f32
    %2 = vector.broadcast %cst_2 : f32 to vector<1x18x4xf32>
    %c17 = arith.constant 17 : index
    %c0_3 = arith.constant 0 : index
    %c0_4 = arith.constant 0 : index
    %3 = vector.load %arg7[%c17, %c0_3, %c0_4] : memref<18x18x4xf32, #tpu.memory_space<vmem>>, vector<1x18x4xf32>
    tpu.vector_store %arg7[%c17, %c0_3, %c0_4], %2 {strides = array<i32>} : memref<18x18x4xf32, #tpu.memory_space<vmem>>, vector<1x18x4xf32>,
    %cst_5 = arith.constant 0.000000e+00 : f32
    %4 = vector.broadcast %cst_5 : f32 to vector<16x1x4xf32>
    %c1 = arith.constant 1 : index
    %c0_6 = arith.constant 0 : index
    %c0_7 = arith.constant 0 : index
    %5 = vector.load %arg7[%c1, %c0_6, %c0_7] : memref<18x18x4xf32, #tpu.memory_space<vmem>>, vector<16x1x4xf32>
    tpu.vector_store %arg7[%c1, %c0_6, %c0_7], %4 {strides = array<i32>} : memref<18x18x4xf32, #tpu.memory_space<vmem>>, vector<16x1x4xf32>,
    %cst_8 = arith.constant 0.000000e+00 : f32
    %6 = vector.broadcast %cst_8 : f32 to vector<16x1x4xf32>
    %c1_9 = arith.constant 1 : index
    %c17_10 = arith.constant 17 : index
    %c0_11 = arith.constant 0 : index
    %7 = vector.load %arg7[%c1_9, %c17_10, %c0_11] : memref<18x18x4xf32, #tpu.memory_space<vmem>>, vector<16x1x4xf32>
    tpu.vector_store %arg7[%c1_9, %c17_10, %c0_11], %6 {strides = array<i32>} : memref<18x18x4xf32, #tpu.memory_space<vmem>>, vector<16x1x4xf32>,
    %c0_12 = arith.constant 0 : index
    %c0_13 = arith.constant 0 : index
    %c0_14 = arith.constant 0 : index
    %c0_15 = arith.constant 0 : index
    %8 = vector.load %arg1[%c0_12, %c0_13, %c0_14, %c0_15] : memref<1x16x16x4xf32, #tpu.memory_space<vmem>>, vector<1x16x16x4xf32>
    %9 = vector.shape_cast %8 : vector<1x16x16x4xf32> to vector<16x16x4xf32>
    %c1_16 = arith.constant 1 : index
    %c1_17 = arith.constant 1 : index
    %c0_18 = arith.constant 0 : index
    %10 = vector.load %arg7[%c1_16, %c1_17, %c0_18] : memref<18x18x4xf32, #tpu.memory_space<vmem>>, vector<16x16x4xf32>
    tpu.vector_store %arg7[%c1_16, %c1_17, %c0_18], %9 {strides = array<i32>} : memref<18x18x4xf32, #tpu.memory_space<vmem>>, vector<16x16x4xf32>,
    %c0_19 = arith.constant 0 : index
    %c0_20 = arith.constant 0 : index
    %c0_21 = arith.constant 0 : index
    %11 = vector.load %arg7[%c0_19, %c0_20, %c0_21] : memref<18x18x4xf32, #tpu.memory_space<vmem>>, vector<18x18x4xf32>
    %12 = vector.extract_strided_slice %11 {offsets = [0, 0, 0], sizes = [16, 16, 4], strides = [1, 1, 1]} : vector<18x18x4xf32> to vector<16x16x4xf32>
    %13 = vector.shape_cast %12 : vector<16x16x4xf32> to vector<256x4xf32>
    %14 = vector.extract_strided_slice %11 {offsets = [0, 1, 0], sizes = [16, 16, 4], strides = [1, 1, 1]} : vector<18x18x4xf32> to vector<16x16x4xf32>
    %15 = vector.shape_cast %14 : vector<16x16x4xf32> to vector<256x4xf32>
    %16 = vector.extract_strided_slice %11 {offsets = [0, 2, 0], sizes = [16, 16, 4], strides = [1, 1, 1]} : vector<18x18x4xf32> to vector<16x16x4xf32>
    %17 = vector.shape_cast %16 : vector<16x16x4xf32> to vector<256x4xf32>
    %18 = vector.extract_strided_slice %11 {offsets = [1, 0, 0], sizes = [16, 16, 4], strides = [1, 1, 1]} : vector<18x18x4xf32> to vector<16x16x4xf32>
    %19 = vector.shape_cast %18 : vector<16x16x4xf32> to vector<256x4xf32>
    %20 = vector.extract_strided_slice %11 {offsets = [1, 1, 0], sizes = [16, 16, 4], strides = [1, 1, 1]} : vector<18x18x4xf32> to vector<16x16x4xf32>
    %21 = vector.shape_cast %20 : vector<16x16x4xf32> to vector<256x4xf32>
    %22 = vector.extract_strided_slice %11 {offsets = [1, 2, 0], sizes = [16, 16, 4], strides = [1, 1, 1]} : vector<18x18x4xf32> to vector<16x16x4xf32>
    %23 = vector.shape_cast %22 : vector<16x16x4xf32> to vector<256x4xf32>
    %24 = vector.extract_strided_slice %11 {offsets = [2, 0, 0], sizes = [16, 16, 4], strides = [1, 1, 1]} : vector<18x18x4xf32> to vector<16x16x4xf32>
    %25 = vector.shape_cast %24 : vector<16x16x4xf32> to vector<256x4xf32>
    %26 = vector.extract_strided_slice %11 {offsets = [2, 1, 0], sizes = [16, 16, 4], strides = [1, 1, 1]} : vector<18x18x4xf32> to vector<16x16x4xf32>
    %27 = vector.shape_cast %26 : vector<16x16x4xf32> to vector<256x4xf32>
    %28 = vector.extract_strided_slice %11 {offsets = [2, 2, 0], sizes = [16, 16, 4], strides = [1, 1, 1]} : vector<18x18x4xf32> to vector<16x16x4xf32>
    %29 = vector.shape_cast %28 : vector<16x16x4xf32> to vector<256x4xf32>
    %30 = tpu.concatenate %13, %15, %17, %19, %21, %23, %25, %27, %29 in 1 : vector<256x4xf32>, vector<256x4xf32>, vector<256x4xf32>, vector<256x4xf32>, vector<256x4xf32>, vector<256x4xf32>, vector<256x4xf32>, vector<256x4xf32>, vector<256x4xf32> -> vector<256x36xf32>
    %c0_22 = arith.constant 0 : index
    %c0_23 = arith.constant 0 : index
    %31 = vector.load %arg2[%c0_22, %c0_23] : memref<36x4xf32, #tpu.memory_space<vmem>>, vector<36x4xf32>
    %cst_24 = arith.constant dense<0.000000e+00> : vector<256x4xf32>
    %32 = tpu.matmul %30, %31, %cst_24 {dimension_numbers = #tpu.dot_dimension_numbers<[1], [0], [0], [1], [0, 0, 1, 1], [], []>} : vector<256x36xf32>, vector<36x4xf32>, vector<256x4xf32> -> vector<256x4xf32>
    %c0_25 = arith.constant 0 : index
    %c0_26 = arith.constant 0 : index
    %33 = vector.load %arg3[%c0_25, %c0_26] : memref<1x4xf32, #tpu.memory_space<vmem>>, vector<1x4xf32>
    %34 = vector.broadcast %33 : vector<1x4xf32> to vector<256x4xf32>
    %35 = arith.addf %32, %34 : vector<256x4xf32>
    %cst_27 = arith.constant 0.000000e+00 : f32
    %36 = vector.broadcast %cst_27 : f32 to vector<256x4xf32>
    %37 = arith.maximumf %35, %36 : vector<256x4xf32>
    %38 = vector.shape_cast %37 : vector<256x4xf32> to vector<16x16x4xf32>
    %c1_28 = arith.constant 1 : index
    %c1_29 = arith.constant 1 : index
    %c0_30 = arith.constant 0 : index
    %39 = vector.load %arg7[%c1_28, %c1_29, %c0_30] : memref<18x18x4xf32, #tpu.memory_space<vmem>>, vector<16x16x4xf32>
    tpu.vector_store %arg7[%c1_28, %c1_29, %c0_30], %38 {strides = array<i32>} : memref<18x18x4xf32, #tpu.memory_space<vmem>>, vector<16x16x4xf32>,
    %c0_31 = arith.constant 0 : index
    %c0_32 = arith.constant 0 : index
    %c0_33 = arith.constant 0 : index
    %40 = vector.load %arg7[%c0_31, %c0_32, %c0_33] : memref<18x18x4xf32, #tpu.memory_space<vmem>>, vector<18x18x4xf32>
    %41 = vector.extract_strided_slice %40 {offsets = [0, 0, 0], sizes = [16, 16, 4], strides = [1, 1, 1]} : vector<18x18x4xf32> to vector<16x16x4xf32>
    %42 = vector.shape_cast %41 : vector<16x16x4xf32> to vector<256x4xf32>
    %43 = vector.extract_strided_slice %40 {offsets = [0, 1, 0], sizes = [16, 16, 4], strides = [1, 1, 1]} : vector<18x18x4xf32> to vector<16x16x4xf32>
    %44 = vector.shape_cast %43 : vector<16x16x4xf32> to vector<256x4xf32>
    %45 = vector.extract_strided_slice %40 {offsets = [0, 2, 0], sizes = [16, 16, 4], strides = [1, 1, 1]} : vector<18x18x4xf32> to vector<16x16x4xf32>
    %46 = vector.shape_cast %45 : vector<16x16x4xf32> to vector<256x4xf32>
    %47 = vector.extract_strided_slice %40 {offsets = [1, 0, 0], sizes = [16, 16, 4], strides = [1, 1, 1]} : vector<18x18x4xf32> to vector<16x16x4xf32>
    %48 = vector.shape_cast %47 : vector<16x16x4xf32> to vector<256x4xf32>
    %49 = vector.extract_strided_slice %40 {offsets = [1, 1, 0], sizes = [16, 16, 4], strides = [1, 1, 1]} : vector<18x18x4xf32> to vector<16x16x4xf32>
    %50 = vector.shape_cast %49 : vector<16x16x4xf32> to vector<256x4xf32>
    %51 = vector.extract_strided_slice %40 {offsets = [1, 2, 0], sizes = [16, 16, 4], strides = [1, 1, 1]} : vector<18x18x4xf32> to vector<16x16x4xf32>
    %52 = vector.shape_cast %51 : vector<16x16x4xf32> to vector<256x4xf32>
    %53 = vector.extract_strided_slice %40 {offsets = [2, 0, 0], sizes = [16, 16, 4], strides = [1, 1, 1]} : vector<18x18x4xf32> to vector<16x16x4xf32>
    %54 = vector.shape_cast %53 : vector<16x16x4xf32> to vector<256x4xf32>
    %55 = vector.extract_strided_slice %40 {offsets = [2, 1, 0], sizes = [16, 16, 4], strides = [1, 1, 1]} : vector<18x18x4xf32> to vector<16x16x4xf32>
    %56 = vector.shape_cast %55 : vector<16x16x4xf32> to vector<256x4xf32>
    %57 = vector.extract_strided_slice %40 {offsets = [2, 2, 0], sizes = [16, 16, 4], strides = [1, 1, 1]} : vector<18x18x4xf32> to vector<16x16x4xf32>
    %58 = vector.shape_cast %57 : vector<16x16x4xf32> to vector<256x4xf32>
    %59 = tpu.concatenate %42, %44, %46, %48, %50, %52, %54, %56, %58 in 1 : vector<256x4xf32>, vector<256x4xf32>, vector<256x4xf32>, vector<256x4xf32>, vector<256x4xf32>, vector<256x4xf32>, vector<256x4xf32>, vector<256x4xf32>, vector<256x4xf32> -> vector<256x36xf32>
    %c0_34 = arith.constant 0 : index
    %c0_35 = arith.constant 0 : index
    %60 = vector.load %arg4[%c0_34, %c0_35] : memref<36x4xf32, #tpu.memory_space<vmem>>, vector<36x4xf32>
    %cst_36 = arith.constant dense<0.000000e+00> : vector<256x4xf32>
    %61 = tpu.matmul %59, %60, %cst_36 {dimension_numbers = #tpu.dot_dimension_numbers<[1], [0], [0], [1], [0, 0, 1, 1], [], []>} : vector<256x36xf32>, vector<36x4xf32>, vector<256x4xf32> -> vector<256x4xf32>
    %c0_37 = arith.constant 0 : index
    %c0_38 = arith.constant 0 : index
    %62 = vector.load %arg5[%c0_37, %c0_38] : memref<1x4xf32, #tpu.memory_space<vmem>>, vector<1x4xf32>
    %63 = vector.broadcast %62 : vector<1x4xf32> to vector<256x4xf32>
    %64 = arith.addf %61, %63 : vector<256x4xf32>
    %65 = vector.shape_cast %64 : vector<256x4xf32> to vector<16x16x4xf32>
    %66 = arith.addf %9, %65 : vector<16x16x4xf32>
    %c0_39 = arith.constant 0 : index
    %c0_40 = arith.constant 0 : index
    %c0_41 = arith.constant 0 : index
    %c0_42 = arith.constant 0 : index
    %67 = vector.load %arg6[%c0_39, %c0_40, %c0_41, %c0_42] : memref<1x16x16x4xf32, #tpu.memory_space<vmem>>, vector<1x16x16x4xf32>
    %68 = vector.shape_cast %67 : vector<1x16x16x4xf32> to vector<16x16x4xf32>
    %69 = vector.shape_cast %66 : vector<16x16x4xf32> to vector<1x16x16x4xf32>
    tpu.vector_store %arg6[%c0_39, %c0_40, %c0_41, %c0_42], %69 {strides = array<i32>} : memref<1x16x16x4xf32, #tpu.memory_space<vmem>>, vector<1x16x16x4xf32>,
    return
  }
  func.func @transform_0(%arg0: i32) -> (i32, i32, i32, i32) {
    %c0_i32 = arith.constant 0 : i32
    %c0_i32_0 = arith.constant 0 : i32
    %c0_i32_1 = arith.constant 0 : i32
    %c0_i32_2 = arith.constant 0 : i32
    return %arg0, %c0_i32, %c0_i32_0, %c0_i32_1 : i32, i32, i32, i32
  }
  func.func @transform_1(%arg0: i32) -> (i32, i32) {
    %c0_i32 = arith.constant 0 : i32
    %c0_i32_0 = arith.constant 0 : i32
    %c0_i32_1 = arith.constant 0 : i32
    return %c0_i32, %c0_i32_0 : i32, i32
  }
  func.func @transform_2(%arg0: i32) -> (i32, i32) {
    %c0_i32 = arith.constant 0 : i32
    %c0_i32_0 = arith.constant 0 : i32
    %c0_i32_1 = arith.constant 0 : i32
    return %c0_i32, %c0_i32_0 : i32, i32
  }
  func.func @transform_3(%arg0: i32) -> (i32, i32) {
    %c0_i32 = arith.constant 0 : i32
    %c0_i32_0 = arith.constant 0 : i32
    %c0_i32_1 = arith.constant 0 : i32
    return %c0_i32, %c0_i32_0 : i32, i32
  }
  func.func @transform_4(%arg0: i32) -> (i32, i32) {
    %c0_i32 = arith.constant 0 : i32
    %c0_i32_0 = arith.constant 0 : i32
    %c0_i32_1 = arith.constant 0 : i32
    return %c0_i32, %c0_i32_0 : i32, i32
  }
  func.func @transform_5(%arg0: i32) -> (i32, i32, i32, i32) {
    %c0_i32 = arith.constant 0 : i32
    %c0_i32_0 = arith.constant 0 : i32
    %c0_i32_1 = arith.constant 0 : i32
    %c0_i32_2 = arith.constant 0 : i32
    return %arg0, %c0_i32, %c0_i32_0, %c0_i32_1 : i32, i32, i32, i32
  }
}

</mosaic_0001>

<bundles_post_ra>
// kernel: tpu_custom_call.1
= control target key start
LH: loop header
LB: loop body
LE: loop exit
PB: predicated region body
PF: predicated region fallthrough
CT: control target
= control target key end

     0   :  { %s3808_s18 = smov 0   ;;  %s7944_s0 = inlined_call_operand.vmem [shape: f32[2,16,16,4], index: 0, kind: input, shape index: {}]   ;;  %s7945_s1 = inlined_call_operand.vmem [shape: f32[36,4], index: 1, kind: input, shape index: {}]   ;;  %s7946_s2 = inlined_call_operand.vmem [shape: f32[1,4], index: 2, kind: input, shape index: {}]   ;;  %s7947_s3 = inlined_call_operand.vmem [shape: f32[36,4], index: 3, kind: input, shape index: {}]   ;;  %s7948_s4 = inlined_call_operand.vmem [shape: f32[1,4], index: 4, kind: input, shape index: {}]   ;;  %s7949_s5 = inlined_call_operand.vmem [shape: f32[2,16,16,4], index: 5, kind: output, shape index: {}]  }
   0x1 LB: > { %s3592_s19 = sadd.s32 4294967295, %s3767_s18   ;;  %p3596_p0 = scmp.ge.s32.totalorder %s3767_s18, 1  ;;  %s3767_s18 = sphi %s3808_s18, %s15_s18  }
   0x2   : > { %p187_p1 = scmp.lt.s32.totalorder %s3767_s18, 3 }
   0x4   : > { %p188_p2 = pnand %p3596_p0, %p187_p1 }
   0x6   : > { %191 = sbr.rel (%p188_p2) target bundleno = 1924 (0x784), region = 40 }
   0xb   : > { %vm225_vm0 = vcmask 31744   ;;  %p215_p3 = scmp.lt.s32.totalorder %s3592_s19, 1  ;;  %v3769_v0 = vmov 0.0   ;;  %vm235_vm1 = vcmask 24576   ;;  %vm434_vm2 = vcmask 1046528   ;;  %s3770_s24 = smov 4  }
   0xc   : > { %226 = vst.msk [vmem:[#allocation2] sm:$0xff] %vm225_vm0, %v3769_v0  ;;  %vm228_vm3 = vcmask 25600   ;;  %vm515_vm4 = vcmask 1045504   ;;  %s3771_s25 = smov 8   ;;  %s3772_s26 = smov 12   ;;  %vm1759_vm5 = vcmask 1043456  }
   0xd   : > { %227 = vst.msk [vmem:[#allocation2 + $0x8] sm:$0xff] %vm225_vm0, %v3769_v0  ;;  %s9001_s19 = smov (!%p215_p3, %s3592_s19), 1  ;;  %s3773_s27 = smov 16   ;;  %vm1422_vm6 = vcmask 64512   ;;  %vm1455_vm7 = vcmask 97280   ;;  %vm1521_vm8 = vcmask 162816  }
   0xe   : > { %231 = vst.msk [vmem:[#allocation2 + $0x198] sm:$0xff] %vm225_vm0, %v3769_v0  ;;  %s3669_s20 = sshll.u32 %s9001_s19, 8  ;;  %s3774_s28 = smov 20   ;;  %vm1488_vm9 = vcmask 130048   ;;  %vm1554_vm10 = vcmask 195584   ;;  %vm1620_vm11 = vcmask 261120  }
   0xf   : > { %232 = vst.msk [vmem:[#allocation2 + $0x1a0] sm:$0xff] %vm225_vm0, %v3769_v0  ;;  %s3832_s23 = scalar_lea.vmem %s7944_s0, %s3669_s20  ;;  %s3775_s29 = smov 24   ;;  %vm1587_vm12 = vcmask 228352   ;;  %vm1662_vm13 = vcmask 293888  }
  0x10   : > { %237 = vst.msk [vmem:[#allocation2 + $0x30] sm:$0x1] %vm235_vm1, %v3769_v0  ;;  %v3837_v1 = vld [vmem:[%s3832_s23 + $0x10] sm:$0xff]  ;;  %v3840_v2 = vld [vmem:[%s3832_s23 + $0x18] sm:$0xff]  ;;  %v3934_v16 = vld [vmem:[%s3832_s23] sm:$0xff]  ;;  %s3776_s30 = smov 28   ;;  %s7667_s14 = scalar_lea.vmem %s7949_s5, %s3669_s20 }
  0x11   : > { %8156 = vst [vmem:[#allocation3_spill] sm:$0xff] %v3837_v1  ;;  %v3939_v17 = vld [vmem:[%s3832_s23 + $0x8] sm:$0xff]  ;;  %v3948_v18 = vld [vmem:[%s3832_s23 + $0x20] sm:$0xff]  ;;  %v3956_v20 = vld [vmem:[%s3832_s23 + $0x30] sm:$0xff]  ;;  %s3777_s6 = smov 32  }
  0x12   : > { %8157 = vst [vmem:[#allocation4_spill] sm:$0xff] %v3840_v2  ;;  %v3952_v19 = vld [vmem:[%s3832_s23 + $0x28] sm:$0xff]  ;;  %v3961_v21 = vld [vmem:[%s3832_s23 + $0x38] sm:$0xff]  ;;  %v3966_v22 = vld [vmem:[%s3832_s23 + $0x40] sm:$0xff] }
  0x13   : > { %236 = vst.msk [vmem:[#allocation2 + $0x18] sm:$0x1] %vm235_vm1, %v3769_v0  ;;  %v3846_v3 = vld [vmem:[#allocation2] sm:$0xff]  ;;  %v3971_v23 = vld [vmem:[%s3832_s23 + $0x48] sm:$0xff]  ;;  %v3978_v25 = vld [vmem:[%s3832_s23 + $0x50] sm:$0xff] }
  0x14   : > { %302 = vst.msk [vmem:[#allocation2 + $0x31] sm:$0xff] %vm225_vm0, %v3837_v1  ;;  %v3850_v4 = vld [vmem:[#allocation2 + $0x8] sm:$0xff]  ;;  %v435_v5 = vrot.slane %v3846_v3, 1  ;;  %v3986_v28 = vld [vmem:[%s3832_s23 + $0x58] sm:$0xff]  ;;  %v3994_v31 = vld [vmem:[%s3832_s23 + $0x60] sm:$0xff] }
  0x15   : > { %303 = vst.msk [vmem:[#allocation2 + $0x39] sm:$0xff] %vm225_vm0, %v3840_v2  ;;  %v436_v6 = vrot.slane %v3850_v4, 1  ;;  %v4002_v34 = vld [vmem:[%s3832_s23 + $0x68] sm:$0xff]  ;;  %v4012_v37 = vld [vmem:[%s3832_s23 + $0x70] sm:$0xff]  ;;  %v4024_v40 = vld [vmem:[%s3832_s23 + $0x78] sm:$0xff] }
  0x16   : > { %238 = vst.msk [vmem:[#allocation2 + $0x48] sm:$0x1] %vm235_vm1, %v3769_v0  ;;  %v4033_v43 = vld [vmem:[%s3832_s23 + $0x80] sm:$0xff]  ;;  %v4043_v48 = vld [vmem:[%s3832_s23 + $0x88] sm:$0xff]  ;;  %v4055_v52 = vld [vmem:[%s3832_s23 + $0x90] sm:$0xff] }
  0x17   : > { %239 = vst.msk [vmem:[#allocation2 + $0x60] sm:$0x1] %vm235_vm1, %v3769_v0  ;;  %v437_v7 = vsel %vm434_vm2, %v435_v5, %v436_v6  ;;  %v4066_v55 = vld [vmem:[%s3832_s23 + $0x98] sm:$0xff] }
  0x18   : > { %240 = vst.msk [vmem:[#allocation2 + $0x78] sm:$0x1] %vm235_vm1, %v3769_v0  ;;  %622 = vrot.lane.b32.xlu0 %v437_v7, %s3770_s24 }
  0x19   : > { %241 = vst.msk [vmem:[#allocation2 + $0x90] sm:$0x1] %vm235_vm1, %v3769_v0 }
  0x1a   : > { %242 = vst.msk [vmem:[#allocation2 + $0xa8] sm:$0x1] %vm235_vm1, %v3769_v0 }
  0x1b   : > { %v3868_v8 = vld [vmem:[#allocation2 + $0x30] sm:$0xff]  ;;  %243 = vst.msk [vmem:[#allocation2 + $0xc0] sm:$0x1] %vm235_vm1, %v3769_v0 }
  0x1c   : > { %v3872_v9 = vld [vmem:[#allocation2 + $0x38] sm:$0xff]  ;;  %v445_v10 = vrot.slane %v3868_v8, 1  ;;  %244 = vst.msk [vmem:[#allocation2 + $0xd8] sm:$0x1] %vm235_vm1, %v3769_v0 }
  0x1d   : > { %v446_v11 = vrot.slane %v3872_v9, 1  ;;  %245 = vst.msk [vmem:[#allocation2 + $0xf0] sm:$0x1] %vm235_vm1, %v3769_v0 }
  0x1e   : > { %246 = vst.msk [vmem:[#allocation2 + $0x108] sm:$0x1] %vm235_vm1, %v3769_v0 }
  0x1f   : > { %v3883_v12 = vsel %vm434_vm2, %v445_v10, %v446_v11  ;;  %247 = vst.msk [vmem:[#allocation2 + $0x120] sm:$0x1] %vm235_vm1, %v3769_v0  ;;  %v4103_v10 = vld [vmem:[%s3832_s23 + $0xa8] sm:$0xff] }
  0x20   : > { %630 = vrot.lane.b32.xlu2 %v3883_v12, %s3770_s24  ;;  %248 = vst.msk [vmem:[#allocation2 + $0x138] sm:$0x1] %vm235_vm1, %v3769_v0 }
  0x21   : > { %249 = vst.msk [vmem:[#allocation2 + $0x150] sm:$0x1] %vm235_vm1, %v3769_v0 }
  0x22   : > { %250 = vst.msk [vmem:[#allocation2 + $0x168] sm:$0x1] %vm235_vm1, %v3769_v0 }
  0x23   : > { %251 = vst.msk [vmem:[#allocation2 + $0x180] sm:$0x1] %vm235_vm1, %v3769_v0 }
  0x24   : > { %252 = vst.msk [vmem:[#allocation2 + $0x29] sm:$0x1] %vm235_vm1, %v3769_v0 }
  0x25   : > { %253 = vst.msk [vmem:[#allocation2 + $0x41] sm:$0x1] %vm235_vm1, %v3769_v0 }
  0x26   : > { %254 = vst.msk [vmem:[#allocation2 + $0x59] sm:$0x1] %vm235_vm1, %v3769_v0 }
  0x27   : > { %255 = vst.msk [vmem:[#allocation2 + $0x71] sm:$0x1] %vm235_vm1, %v3769_v0 }
  0x28   : > { %256 = vst.msk [vmem:[#allocation2 + $0x89] sm:$0x1] %vm235_vm1, %v3769_v0 }
  0x29   : > { %257 = vst.msk [vmem:[#allocation2 + $0xa1] sm:$0x1] %vm235_vm1, %v3769_v0 }
  0x2a   : > { %258 = vst.msk [vmem:[#allocation2 + $0xb9] sm:$0x1] %vm235_vm1, %v3769_v0 }
  0x2b   : > { %259 = vst.msk [vmem:[#allocation2 + $0xd1] sm:$0x1] %vm235_vm1, %v3769_v0 }
  0x2c   : > { %260 = vst.msk [vmem:[#allocation2 + $0xe9] sm:$0x1] %vm235_vm1, %v3769_v0  ;;  %v3915_v13 = vld [vmem:[#allocation2 + $0x40] sm:$0x3] }
  0x2d   : > { %261 = vst.msk [vmem:[#allocation2 + $0x101] sm:$0x1] %vm235_vm1, %v3769_v0  ;;  %v448_v14 = vrot.slane %v3915_v13, 1 }
  0x2e   : > { %262 = vst.msk [vmem:[#allocation2 + $0x119] sm:$0x1] %vm235_vm1, %v3769_v0 }
  0x2f   : > { %263 = vst.msk [vmem:[#allocation2 + $0x131] sm:$0x1] %vm235_vm1, %v3769_v0  ;;  %v3925_v15 = vsel %vm434_vm2, %v446_v11, %v448_v14 }
  0x30   : > { %264 = vst.msk [vmem:[#allocation2 + $0x149] sm:$0x1] %vm235_vm1, %v3769_v0  ;;  %632 = vrot.lane.b32.xlu2 %v3925_v15, %s3770_s24 }
  0x31   : > { %265 = vst.msk [vmem:[#allocation2 + $0x161] sm:$0x1] %vm235_vm1, %v3769_v0 }
  0x32   : > { %8158 = vst [vmem:[#allocation5_spill] sm:$0xff] %v3934_v16 }
  0x33   : > { %266 = vst.msk [vmem:[#allocation2 + $0x179] sm:$0x1] %vm235_vm1, %v3769_v0 }
  0x34   : > { %8159 = vst [vmem:[#allocation6_spill] sm:$0xff] %v3939_v17 }
  0x35   : > { %267 = vst.msk [vmem:[#allocation2 + $0x191] sm:$0x1] %vm235_vm1, %v3769_v0 }
  0x36   : > { %300 = vst.msk [vmem:[#allocation2 + $0x19] sm:$0xff] %vm225_vm0, %v3934_v16 }
  0x37   : > { %301 = vst.msk [vmem:[#allocation2 + $0x21] sm:$0xff] %vm225_vm0, %v3939_v17 }
  0x38   : > { %8160 = vst [vmem:[#allocation7_spill] sm:$0xff] %v3948_v18 }
  0x39   : > { %229 = vst.msk [vmem:[#allocation2 + $0x10] sm:$0x3] %vm228_vm3, %v3769_v0 }
  0x3a   : > { %8161 = vst [vmem:[#allocation8_spill] sm:$0xff] %v3952_v19 }
  0x3b   : > { %233 = vst.msk [vmem:[#allocation2 + $0x1a8] sm:$0x3] %vm228_vm3, %v3769_v0 }
  0x3c   : > { %8162 = vst [vmem:[#allocation9_spill] sm:$0xff] %v3956_v20 }
  0x3d   : > { %304 = vst.msk [vmem:[#allocation2 + $0x49] sm:$0xff] %vm225_vm0, %v3948_v18  ;;  %v3973_v24 = vld [vmem:[#allocation2 + $0x18] sm:$0xff] }
  0x3e   : > { %8163 = vst [vmem:[#allocation10_spill] sm:$0xff] %v3961_v21  ;;  %v3980_v26 = vld [vmem:[#allocation2 + $0x20] sm:$0xff]  ;;  %v440_v27 = vrot.slane %v3973_v24, 1  ;;  %v3997_v33 = vld [vmem:[#allocation2 + $0x28] sm:$0x3] }
  0x3f   : > { %305 = vst.msk [vmem:[#allocation2 + $0x51] sm:$0xff] %vm225_vm0, %v3952_v19  ;;  %v441_v29 = vrot.slane %v3980_v26, 1  ;;  %v443_v41 = vrot.slane %v3997_v33, 1 }
  0x40   : > { %8164 = vst [vmem:[#allocation11_spill] sm:$0xff] %v3966_v22  ;;  %v3989_v30 = vld [vmem:[#allocation2 + $0x10] sm:$0x3] }
  0x41   : > { %306 = vst.msk [vmem:[#allocation2 + $0x61] sm:$0xff] %vm225_vm0, %v3956_v20  ;;  %v438_v32 = vrot.slane %v3989_v30, 1  ;;  %v4005_v35 = vsel %vm434_vm2, %v440_v27, %v441_v29  ;;  %v4058_v53 = vsel %vm434_vm2, %v441_v29, %v443_v41  ;;  %v4117_v27 = vld [vmem:[%s3832_s23 + $0xb0] sm:$0xff]  ;;  %v4204_v20 = vld [vmem:[%s3832_s23 + $0xe0] sm:$0xff] }
  0x42   : > { %8165 = vst [vmem:[#allocation12_spill] sm:$0xff] %v3971_v23  ;;  %626 = vrot.lane.b32.xlu1 %v4005_v35, %s3770_s24 }
  0x43   : > { %307 = vst.msk [vmem:[#allocation2 + $0x69] sm:$0xff] %vm225_vm0, %v3961_v21  ;;  %v439_v38 = vsel %vm434_vm2, %v436_v6, %v438_v32  ;;  %v4097_v6 = vld [vmem:[%s3832_s23 + $0xa0] sm:$0xff] }
  0x44   : > { %8166 = vst [vmem:[#allocation13_spill] sm:$0xff] %v3978_v25  ;;  %v4007_v36 = vld [vmem:[#allocation2 + $0x48] sm:$0xff]  ;;  %624 = vrot.lane.b32.xlu0 %v439_v38, %s3770_s24 }
  0x45   : > { %308 = vst.msk [vmem:[#allocation2 + $0x79] sm:$0xff] %vm225_vm0, %v3966_v22  ;;  %v450_v44 = vrot.slane %v4007_v36, 1  ;;  %v4184_v22 = vld [vmem:[%s3832_s23 + $0xd0] sm:$0xff] }
  0x46   : > { %8167 = vst [vmem:[#allocation14_spill] sm:$0xff] %v3986_v28  ;;  %v4019_v39 = vld [vmem:[#allocation2 + $0x50] sm:$0xff]  ;;  %v4073_v57 = vld [vmem:[#allocation2 + $0x58] sm:$0x3] }
  0x47   : > { %309 = vst.msk [vmem:[#allocation2 + $0x81] sm:$0xff] %vm225_vm0, %v3971_v23  ;;  %v451_v45 = vrot.slane %v4019_v39, 1  ;;  %v453_v61 = vrot.slane %v4073_v57, 1 }
  0x48   : > { %8168 = vst [vmem:[#allocation15_spill] sm:$0xff] %v3994_v31  ;;  %v4028_v42 = vld [vmem:[#allocation2 + $0x60] sm:$0xff] }
  0x49   : > { %310 = vst.msk [vmem:[#allocation2 + $0x91] sm:$0xff] %vm225_vm0, %v3978_v25  ;;  %v455_v47 = vrot.slane %v4028_v42, 1  ;;  %v4069_v56 = vsel %vm434_vm2, %v450_v44, %v451_v45  ;;  %v4100_v7 = vsel %vm434_vm2, %v451_v45, %v453_v61  ;;  %v4126_v44 = vld [vmem:[%s3832_s23 + $0xb8] sm:$0xff] }
  0x4a   : > { %8169 = vst [vmem:[#allocation16_spill] sm:$0xff] %v4002_v34  ;;  %v4037_v46 = vld [vmem:[#allocation2 + $0x68] sm:$0xff]  ;;  %v4077_v58 = vld [vmem:[#allocation2 + $0x70] sm:$0x3]  ;;  %628 = vrot.lane.b32.xlu1 %v4058_v53, %s3770_s24 }
  0x4b   : > { %311 = vst.msk [vmem:[#allocation2 + $0x99] sm:$0xff] %vm225_vm0, %v3986_v28  ;;  %v456_v49 = vrot.slane %v4037_v46, 1  ;;  %v458_v62 = vrot.slane %v4077_v58, 1 }
  0x4c   : > { %8170 = vst [vmem:[#allocation17_spill] sm:$0xff] %v4012_v37  ;;  %634 = vrot.lane.b32.xlu0 %v4069_v56, %s3770_s24  ;;  %v4112_v14 = vld [vmem:[#allocation2 + $0x78] sm:$0xff] }
  0x4d   : > { %312 = vst.msk [vmem:[#allocation2 + $0xa9] sm:$0xff] %vm225_vm0, %v3994_v31  ;;  %v4061_v54 = vsel %vm434_vm2, %v455_v47, %v456_v49  ;;  %v4108_v11 = vsel %vm434_vm2, %v456_v49, %v458_v62  ;;  %v460_v45 = vrot.slane %v4112_v14, 1 }
  0x4e   : > { %8171 = vst [vmem:[#allocation18_spill] sm:$0xff] %v4024_v40  ;;  %v4048_v50 = vld [vmem:[#allocation2 + $0x80] sm:$0xff]  ;;  %v4050_v51 = vld [vmem:[#allocation2 + $0x88] sm:$0x3]  ;;  %638 = vrot.lane.b32.xlu2 %v4061_v54, %s3770_s24 }
  0x4f   : > { %313 = vst.msk [vmem:[#allocation2 + $0xb1] sm:$0xff] %vm225_vm0, %v4002_v34  ;;  %v461_v59 = vrot.slane %v4048_v50, 1  ;;  %v463_v60 = vrot.slane %v4050_v51, 1 }
  0x50   : > { %8172 = vst [vmem:[#allocation19_spill] sm:$0xff] %v4033_v43  ;;  %v4119_v29 = vld [vmem:[#allocation2 + $0x90] sm:$0xff] }
  0x51   : > { %314 = vst.msk [vmem:[#allocation2 + $0xc1] sm:$0xff] %vm225_vm0, %v4012_v37  ;;  %v4090_v63 = vsel %vm434_vm2, %v461_v59, %v463_v60  ;;  %v465_v47 = vrot.slane %v4119_v29, 1  ;;  %v4150_v37 = vld [vmem:[%s3832_s23 + $0xc8] sm:$0xff]  ;;  %v4153_v34 = vsel %vm434_vm2, %v460_v45, %v461_v59 }
  0x52   : > { %8173 = vst [vmem:[#allocation20_spill] sm:$0xff] %v4043_v48  ;;  %v4121_v32 = vld [vmem:[#allocation2 + $0x98] sm:$0xff]  ;;  %636 = vrot.lane.b32.xlu1 %v4100_v7, %s3770_s24 }
  0x53   : > { %315 = vst.msk [vmem:[#allocation2 + $0xc9] sm:$0xff] %vm225_vm0, %v4024_v40  ;;  %v466_v49 = vrot.slane %v4121_v32, 1  ;;  %v4147_v40 = vld [vmem:[%s3832_s23 + $0xc0] sm:$0xff] }
  0x54   : > { %316 = vst.msk [vmem:[#allocation2 + $0xd9] sm:$0xff] %vm225_vm0, %v4033_v43  ;;  %v4092_v0 = vld [vmem:[#allocation2 + $0xa8] sm:$0xff]  ;;  %640 = vrot.lane.b32.xlu0 %v4108_v11, %s3770_s24 }
  0x55   : > { %8174 = vst [vmem:[#allocation21_spill] sm:$0xff] %v4055_v52  ;;  %v470_v38 = vrot.slane %v4092_v0, 1  ;;  %v4158_v31 = vsel %vm434_vm2, %v465_v47, %v466_v49 }
  0x56   : > { %8175 = vst [vmem:[#allocation22_spill] sm:$0xff] %v4061_v54  ;;  %v4094_v5 = vld [vmem:[#allocation2 + $0xb0] sm:$0xff]  ;;  %644 = vrot.lane.b32.xlu2 %v4090_v63, %s3770_s24  ;;  %v4166_v28 = vld [vmem:[#allocation2 + $0xb8] sm:$0x3]  ;;  %v516_v54 = vrot.slane %v3846_v3, 2 }
  0x57   : > { %317 = vst.msk [vmem:[#allocation2 + $0xe1] sm:$0xff] %vm225_vm0, %v4043_v48  ;;  %v471_v41 = vrot.slane %v4094_v5, 1  ;;  %v473_v25 = vrot.slane %v4166_v28, 1 }
  0x58   : > { %8176 = vst [vmem:[#allocation23_spill] sm:$0xff] %v4066_v55 }
  0x59   : > { %318 = vst.msk [vmem:[#allocation2 + $0xf1] sm:$0xff] %vm225_vm0, %v4055_v52  ;;  %v4140_v60 = vsel %vm434_vm2, %v470_v38, %v471_v41  ;;  %v4162_v38 = vld [vmem:[#allocation2 + $0xa0] sm:$0x3] }
  0x5a   : > { %319 = vst.msk [vmem:[#allocation2 + $0xf9] sm:$0xff] %vm225_vm0, %v4066_v55  ;;  %v4142_v61 = vld [vmem:[#allocation2 + $0xc8] sm:$0xff]  ;;  %v4144_v62 = vld [vmem:[#allocation2 + $0xd0] sm:$0x3]  ;;  %642 = vrot.lane.b32.xlu1 %v4153_v34, %s3770_s24  ;;  %v468_v47 = vrot.slane %v4162_v38, 1 }
  0x5b   : > { %8177 = vst [vmem:[#allocation24_spill] sm:$0xff] %v4090_v63  ;;  %v476_v59 = vrot.slane %v4142_v61, 1  ;;  %v478_v45 = vrot.slane %v4144_v62, 1 }
  0x5c   : > { %8178 = vst [vmem:[#allocation25_spill] sm:$0xff] %v4097_v6  ;;  %646 = vrot.lane.b32.xlu0 %v4158_v31, %s3770_s24  ;;  %v4190_v21 = vsel %vm434_vm2, %v466_v49, %v468_v47  ;;  %v4209_v49 = vld [vmem:[#allocation2 + $0xd8] sm:$0xff] }
  0x5d   : > { %8179 = vst [vmem:[#allocation26_spill] sm:$0xff] %v4103_v10 }
  0x5e   : > { %320 = vst.msk [vmem:[#allocation2 + $0x109] sm:$0xff] %vm225_vm0, %v4097_v6  ;;  %650 = vrot.lane.b32.xlu2 %v4140_v60, %s3770_s24  ;;  %v4211_v47 = vld [vmem:[#allocation2 + $0xe0] sm:$0xff]  ;;  %v4241_v2 = vld [vmem:[#allocation2 + $0xe8] sm:$0x3] }
  0x5f   : > { %8180 = vst [vmem:[#allocation27_spill] sm:$0xff] %v4108_v11  ;;  %v481_v19 = vrot.slane %v4211_v47, 1 }
  0x60   : > { %321 = vst.msk [vmem:[#allocation2 + $0x111] sm:$0xff] %vm225_vm0, %v4103_v10  ;;  %v4179_v23 = vld [vmem:[#allocation2 + $0xf0] sm:$0xff]  ;;  %v4207_v10 = vld [vmem:[%s3832_s23 + $0xe8] sm:$0xff] }
  0x61   : > { %8181 = vst [vmem:[#allocation28_spill] sm:$0xff] %v4117_v27  ;;  %v4243_v52 = vld [vmem:[#allocation2 + $0x100] sm:$0x3] }
  0x62   : > { %8182 = vst [vmem:[#allocation29_spill] sm:$0xff] %v4126_v44  ;;  %648 = vrot.lane.b32.xlu1 %v4190_v21, %s3770_s24 }
  0x63   : > { %322 = vst.msk [vmem:[#allocation2 + $0x121] sm:$0xff] %vm225_vm0, %v4117_v27  ;;  %v4195_v27 = vsel %vm434_vm2, %v471_v41, %v473_v25 }
  0x64   : > { %323 = vst.msk [vmem:[#allocation2 + $0x129] sm:$0xff] %vm225_vm0, %v4126_v44  ;;  %v4187_v44 = vld [vmem:[%s3832_s23 + $0xd8] sm:$0xff]  ;;  %652 = vrot.lane.b32.xlu0 %v4195_v27, %s3770_s24 }
  0x65   : > { %8183 = vst [vmem:[#allocation30_spill] sm:$0xff] %v4140_v60 }
  0x66   : > { %8184 = vst [vmem:[#allocation31_spill] sm:$0xff] %v4147_v40 }
  0x67   : > { %8185 = vst [vmem:[#allocation32_spill] sm:$0xff] %v4150_v37  ;;  %v4229_v18 = vld [vmem:[#allocation2 + $0x110] sm:$0xff] }
  0x68   : > { %324 = vst.msk [vmem:[#allocation2 + $0x139] sm:$0xff] %vm225_vm0, %v4147_v40  ;;  %v4181_v40 = vld [vmem:[#allocation2 + $0xf8] sm:$0xff] }
  0x69   : > { %8186 = vst [vmem:[#allocation33_spill] sm:$0xff] %v4158_v31  ;;  %v486_v25 = vrot.slane %v4181_v40, 1 }
  0x6a   : > { %325 = vst.msk [vmem:[#allocation2 + $0x141] sm:$0xff] %vm225_vm0, %v4150_v37  ;;  %v4177_v37 = vsel %vm434_vm2, %v476_v59, %v478_v45  ;;  %v4199_v45 = vld [vmem:[#allocation2 + $0xc0] sm:$0xff] }
  0x6b   : > { %8187 = vst [vmem:[#allocation34_spill] sm:$0xff] %v4177_v37  ;;  %656 = vrot.lane.b32.xlu2 %v4177_v37, %s3770_s24  ;;  %v475_v41 = vrot.slane %v4199_v45, 1  ;;  %v4272_v37 = vld [vmem:[#allocation2 + $0x128] sm:$0xff] }
  0x6c   : > { %8188 = vst [vmem:[#allocation35_spill] sm:$0xff] %v4184_v22 }
  0x6d   : > { %8189 = vst [vmem:[#allocation36_spill] sm:$0xff] %v4187_v44  ;;  %v4234_v55 = vsel %vm434_vm2, %v475_v41, %v476_v59  ;;  %v488_v59 = vrot.slane %v4243_v52, 1 }
  0x6e   : > { %8190 = vst [vmem:[#allocation37_spill] sm:$0xff] %v4190_v21  ;;  %654 = vrot.lane.b32.xlu1 %v4234_v55, %s3770_s24 }
  0x6f   : > { %326 = vst.msk [vmem:[#allocation2 + $0x151] sm:$0xff] %vm225_vm0, %v4184_v22  ;;  %v485_v22 = vrot.slane %v4179_v23, 1  ;;  %v4256_v48 = vld [vmem:[#allocation2 + $0x138] sm:$0xff]  ;;  %v4264_v16 = vsel %vm434_vm2, %v486_v25, %v488_v59 }
  0x70   : > { %8191 = vst [vmem:[#allocation38_spill] sm:$0xff] %v4195_v27 }
  0x71   : > { %327 = vst.msk [vmem:[#allocation2 + $0x159] sm:$0xff] %vm225_vm0, %v4187_v44  ;;  %v480_v44 = vrot.slane %v4209_v49, 1  ;;  %v4227_v6 = vsel %vm434_vm2, %v485_v22, %v486_v25  ;;  %v491_v22 = vrot.slane %v4229_v18, 1  ;;  %v4258_v17 = vld [vmem:[#allocation2 + $0x140] sm:$0xff] }
  0x72   : > { %8192 = vst [vmem:[#allocation39_spill] sm:$0xff] %v4204_v20  ;;  %v501_v27 = vrot.slane %v4258_v17, 1 }
  0x73   : > { %8193 = vst [vmem:[#allocation40_spill] sm:$0xff] %v4207_v10  ;;  %662 = vrot.lane.b32.xlu2 %v4227_v6, %s3770_s24 }
  0x74   : > { %328 = vst.msk [vmem:[#allocation2 + $0x169] sm:$0xff] %vm225_vm0, %v4204_v20  ;;  %v4231_v20 = vld [vmem:[#allocation2 + $0x118] sm:$0x3] }
  0x75   : > { %329 = vst.msk [vmem:[#allocation2 + $0x171] sm:$0xff] %vm225_vm0, %v4207_v10  ;;  %v4237_v10 = vsel %vm434_vm2, %v480_v44, %v481_v19  ;;  %v493_v1 = vrot.slane %v4231_v20, 1  ;;  %v483_v44 = vrot.slane %v4241_v2, 1 }
  0x76   : > { %8194 = vst [vmem:[#allocation41_spill] sm:$0xff] %v4227_v6  ;;  %658 = vrot.lane.b32.xlu0 %v4237_v10, %s3770_s24  ;;  %v4268_v6 = vld [vmem:[#allocation2 + $0x108] sm:$0xff] }
  0x77   : > { %8195 = vst [vmem:[#allocation42_spill] sm:$0xff] %v4234_v55  ;;  %v4254_v41 = vsel %vm434_vm2, %v491_v22, %v493_v1  ;;  %v4261_v43 = vsel %vm434_vm2, %v481_v19, %v483_v44  ;;  %v500_v1 = vrot.slane %v4256_v48, 1  ;;  %v490_v19 = vrot.slane %v4268_v6, 1  ;;  %v4300_v55 = vld [vmem:[#allocation2 + $0x148] sm:$0x3] }
  0x78   : > { %8196 = vst [vmem:[#allocation43_spill] sm:$0xff] %v4237_v10  ;;  %v4270_v10 = vld [vmem:[#allocation2 + $0x120] sm:$0xff]  ;;  %660 = vrot.lane.b32.xlu1 %v4261_v43, %s3770_s24  ;;  %v496_v44 = vrot.slane %v4272_v37, 1 }
  0x79   : > { %8197 = vst [vmem:[#allocation44_spill] sm:$0xff] %v4254_v41  ;;  %v495_v25 = vrot.slane %v4270_v10, 1  ;;  %v4284_v59 = vsel %vm434_vm2, %v500_v1, %v501_v27  ;;  %v4288_v60 = vld [vmem:[#allocation2 + $0x160] sm:$0x3]  ;;  %v4291_v31 = vsel %vm434_vm2, %v490_v19, %v491_v22  ;;  %v503_v19 = vrot.slane %v4300_v55, 1 }
  0x7a   : > { %8198 = vst [vmem:[#allocation45_spill] sm:$0xff] %v4261_v43  ;;  %v508_v63 = vrot.slane %v4288_v60, 1 }
  0x7b   : > { %8199 = vst [vmem:[#allocation46_spill] sm:$0xff] %v4264_v16  ;;  %668 = vrot.lane.b32.xlu2 %v4254_v41, %s3770_s24  ;;  %v4286_v41 = vld [vmem:[#allocation2 + $0x158] sm:$0xff]  ;;  %v4294_v43 = vsel %vm434_vm2, %v495_v25, %v496_v44  ;;  %v4317_v11 = vsel %vm434_vm2, %v501_v27, %v503_v19  ;;  %v4323_v21 = vld [vmem:[#allocation2 + $0x168] sm:$0xff] }
  0x7c   : > { %8200 = vst [vmem:[#allocation47_spill] sm:$0xff] %v4284_v59  ;;  %v506_v1 = vrot.slane %v4286_v41, 1 }
  0x7d   : > { %8201 = vst [vmem:[#allocation48_spill] sm:$0xff] %v4291_v31 }
  0x7e   : > { %664 = vrot.lane.b32.xlu0 %v4264_v16, %s3770_s24  ;;  %8202 = vst [vmem:[#allocation49_spill] sm:$0xff] %v4294_v43  ;;  %v4298_v16 = vld [vmem:[#allocation2 + $0x130] sm:$0x3]  ;;  %v4311_v25 = vsel %vm434_vm2, %v506_v1, %v508_v63  ;;  %v517_v63 = vrot.slane %v3850_v4, 2  ;;  %v4344_v4 = vld [vmem:[#allocation2 + $0x178] sm:$0x3] }
  0x7f   : > { %v498_v22 = vrot.slane %v4298_v16, 1  ;;  %8203 = vst [vmem:[#allocation50_spill] sm:$0xff] %v4311_v25 }
  0x80   : > { %666 = vrot.lane.b32.xlu1 %v4291_v31, %s3770_s24  ;;  %8205 = vst [vmem:[#allocation52_spill] sm:$0xff] %v4317_v11  ;;  %v4321_v31 = vld [vmem:[#allocation2 + $0x150] sm:$0xff]  ;;  %v518_v19 = vsel %vm515_vm4, %v516_v54, %v517_v63  ;;  %v513_v54 = vrot.slane %v4344_v4, 1 }
  0x81   : > { %v505_v27 = vrot.slane %v4321_v31, 1 }
  0x83   : > { %674 = vrot.lane.b32.xlu2 %v4284_v59, %s3770_s24  ;;  %v4314_v59 = vsel %vm434_vm2, %v496_v44, %v498_v22  ;;  %v510_v44 = vrot.slane %v4323_v21, 1 }
  0x84   : > { %8204 = vst [vmem:[#allocation51_spill] sm:$0xff] %v4314_v59 }
  0x86   : > { %670 = vrot.lane.b32.xlu0 %v4294_v43, %s3770_s24  ;;  %v4325_v43 = vld [vmem:[#allocation2 + $0x170] sm:$0xff] }
  0x87   : > { %v511_v22 = vrot.slane %v4325_v43, 1 }
  0x88   : > { %672 = vrot.lane.b32.xlu1 %v4314_v59, %s3770_s24  ;;  %v524_v59 = vrot.slane %v3997_v33, 2 }
  0x89   : > { %v4341_v3 = vsel %vm434_vm2, %v510_v44, %v511_v22  ;;  %v4357_v44 = vpop.permute.xlu2 %630 }
  0x8a   : > { %8207 = vst [vmem:[#allocation54_spill] sm:$0xff] %v4341_v3 }
  0x8b   : > { %680 = vrot.lane.b32.xlu2 %v4311_v25, %s3770_s24  ;;  %v4338_v25 = vsel %vm434_vm2, %v505_v27, %v506_v1  ;;  %v519_v1 = vrot.slane %v3989_v30, 2  ;;  %8209 = vst [vmem:[#allocation56_spill] sm:$0xff] %v4357_v44  ;;  %v521_v30 = vrot.slane %v3973_v24, 2 }
  0x8c   : > { %8206 = vst [vmem:[#allocation53_spill] sm:$0xff] %v4338_v25 }
  0x8d   : > { %v520_v33 = vsel %vm515_vm4, %v517_v63, %v519_v1 }
  0x8e   : > { %676 = vrot.lane.b32.xlu0 %v4317_v11, %s3770_s24  ;;  %v522_v11 = vrot.slane %v3980_v26, 2 }
  0x90   : > { %678 = vrot.lane.b32.xlu1 %v4338_v25, %s3770_s24  ;;  %v4355_v27 = vsel %vm515_vm4, %v522_v11, %v524_v59  ;;  %v531_v25 = vrot.slane %v4007_v36, 2  ;;  %v526_v59 = vrot.slane %v3868_v8, 2 }
  0x91   : > { %8208 = vst [vmem:[#allocation55_spill] sm:$0xff] %v4355_v27  ;;  %v4384_v44 = vpop.permute.xlu2 %632 }
  0x92   : > { %8212 = vst [vmem:[#allocation59_spill] sm:$0xff] %v4384_v44 }
  0x93   : > { %718 = vrot.lane.b32.xlu2 %v518_v19, %s3771_s25  ;;  %v4360_v19 = vsel %vm434_vm2, %v511_v22, %v513_v54  ;;  %v527_v22 = vrot.slane %v3872_v9, 2  ;;  %v4377_v54 = vsel %vm515_vm4, %v521_v30, %v522_v11  ;;  %v529_v11 = vrot.slane %v3915_v13, 2 }
  0x94   : > { %8210 = vst [vmem:[#allocation57_spill] sm:$0xff] %v4360_v19 }
  0x95   : > { %v4380_v1 = vsel %vm515_vm4, %v526_v59, %v527_v22  ;;  %v4398_v59 = vsel %vm515_vm4, %v527_v22, %v529_v11 }
  0x96   : > { %682 = vrot.lane.b32.xlu0 %v4341_v3, %s3770_s24  ;;  %v532_v3 = vrot.slane %v4019_v39, 2 }
  0x98   : > { %684 = vrot.lane.b32.xlu1 %v4360_v19, %s3770_s24  ;;  %v4374_v63 = vsel %vm515_vm4, %v531_v25, %v532_v3  ;;  %v534_v25 = vrot.slane %v4073_v57, 2  ;;  %v536_v57 = vrot.slane %v4028_v42, 2 }
  0x99   : > { %8211 = vst [vmem:[#allocation58_spill] sm:$0xff] %v4374_v63 }
  0x9a   : > { %v4401_v44 = vsel %vm515_vm4, %v532_v3, %v534_v25  ;;  %v541_v3 = vrot.slane %v4112_v14, 2 }
  0x9b   : > { %724 = vrot.lane.b32.xlu2 %v4355_v27, %s3771_s25  ;;  %v539_v27 = vrot.slane %v4077_v58, 2  ;;  %8214 = vst [vmem:[#allocation61_spill] sm:$0xff] %v4401_v44  ;;  %v546_v58 = vrot.slane %v4119_v29, 2 }
  0x9e   : > { %720 = vrot.lane.b32.xlu0 %v520_v33, %s3771_s25  ;;  %v537_v33 = vrot.slane %v4037_v46, 2 }
  0xa0   : > { %722 = vrot.lane.b32.xlu1 %v4377_v54, %s3771_s25  ;;  %v4395_v30 = vsel %vm515_vm4, %v537_v33, %v539_v27  ;;  %v542_v27 = vrot.slane %v4048_v50, 2  ;;  %v4420_v11 = vsel %vm515_vm4, %v536_v57, %v537_v33  ;;  %v4435_v33 = vpop.permute.xlu0 %622  ;;  %v549_v57 = vrot.slane %v4162_v38, 2 }
  0xa1   : > { %8213 = vst [vmem:[#allocation60_spill] sm:$0xff] %v4395_v30  ;;  %v551_v38 = vrot.slane %v4092_v0, 2 }
  0xa2   : > { %8217 = vst [vmem:[#allocation64_spill] sm:$0xff] %v4420_v11  ;;  %v4423_v25 = vsel %vm515_vm4, %v541_v3, %v542_v27 }
  0xa3   : > { %730 = vrot.lane.b32.xlu2 %v4374_v63, %s3771_s25  ;;  %v547_v63 = vrot.slane %v4121_v32, 2  ;;  %8218 = vst [vmem:[#allocation65_spill] sm:$0xff] %v4423_v25 }
  0xa4   : > { %8220 = vst [vmem:[#allocation67_spill] sm:$0xff] %v4435_v33  ;;  %v562_v33 = vrot.slane %v4211_v47, 2 }
  0xa5   : > { %v4417_v22 = vsel %vm515_vm4, %v546_v58, %v547_v63  ;;  %v544_v58 = vrot.slane %v4050_v51, 2 }
  0xa6   : > { %726 = vrot.lane.b32.xlu0 %v4380_v1, %s3771_s25  ;;  %8216 = vst [vmem:[#allocation63_spill] sm:$0xff] %v4417_v22 }
  0xa8   : > { %728 = vrot.lane.b32.xlu1 %v4398_v59, %s3771_s25  ;;  %v4409_v13 = vpop.permute.xlu2 %638 }
  0xa9   : > { %8215 = vst [vmem:[#allocation62_spill] sm:$0xff] %v4409_v13  ;;  %v552_v13 = vrot.slane %v4094_v5, 2 }
  0xab   : > { %736 = vrot.lane.b32.xlu2 %v4395_v30, %s3771_s25  ;;  %v554_v30 = vrot.slane %v4166_v28, 2  ;;  %v4446_v28 = vsel %vm515_vm4, %v547_v63, %v549_v57  ;;  %v556_v63 = vrot.slane %v4199_v45, 2 }
  0xac   : > { %8223 = vst [vmem:[#allocation70_spill] sm:$0xff] %v4446_v28 }
  0xad   : > { %v4440_v3 = vsel %vm515_vm4, %v552_v13, %v554_v30 }
  0xae   : > { %732 = vrot.lane.b32.xlu0 %v4401_v44, %s3771_s25  ;;  %8221 = vst [vmem:[#allocation68_spill] sm:$0xff] %v4440_v3 }
  0xb0   : > { %734 = vrot.lane.b32.xlu1 %v4420_v11, %s3771_s25  ;;  %v4431_v44 = vpop.permute.xlu2 %644 }
  0xb1   : > { %8219 = vst [vmem:[#allocation66_spill] sm:$0xff] %v4431_v44  ;;  %v561_v44 = vrot.slane %v4209_v49, 2 }
  0xb3   : > { %742 = vrot.lane.b32.xlu2 %v4417_v22, %s3771_s25  ;;  %v4443_v22 = vsel %vm515_vm4, %v542_v27, %v544_v58  ;;  %v557_v27 = vrot.slane %v4142_v61, 2  ;;  %v4466_v57 = vsel %vm515_vm4, %v561_v44, %v562_v33  ;;  %v559_v44 = vrot.slane %v4144_v62, 2 }
  0xb4   : > { %8222 = vst [vmem:[#allocation69_spill] sm:$0xff] %v4443_v22  ;;  %v4459_v30 = vpop.permute.xlu1 %626  ;;  %v576_v62 = vrot.slane %v4270_v10, 2 }
  0xb5   : > { %8225 = vst [vmem:[#allocation72_spill] sm:$0xff] %v4459_v30  ;;  %v567_v30 = vrot.slane %v4181_v40, 2 }
  0xb6   : > { %738 = vrot.lane.b32.xlu0 %v4423_v25, %s3771_s25  ;;  %v4463_v58 = vpop.permute.xlu0 %624  ;;  %8227 = vst [vmem:[#allocation74_spill] sm:$0xff] %v4466_v57 }
  0xb7   : > { %8226 = vst [vmem:[#allocation73_spill] sm:$0xff] %v4463_v58 }
  0xb8   : > { %740 = vrot.lane.b32.xlu1 %v4443_v22, %s3771_s25  ;;  %v4454_v51 = vpop.permute.xlu2 %650 }
  0xb9   : > { %8224 = vst [vmem:[#allocation71_spill] sm:$0xff] %v4454_v51  ;;  %v4472_v51 = vsel %vm515_vm4, %v556_v63, %v557_v27 }
  0xbb   : > { %748 = vrot.lane.b32.xlu2 %v4440_v3, %s3771_s25  ;;  %v4469_v3 = vsel %vm515_vm4, %v551_v38, %v552_v13  ;;  %v564_v38 = vrot.slane %v4241_v2, 2 }
  0xbc   : > { %8228 = vst [vmem:[#allocation75_spill] sm:$0xff] %v4469_v3  ;;  %v4485_v13 = vpop.permute.xlu1 %628 }
  0xbd   : > { %8230 = vst [vmem:[#allocation77_spill] sm:$0xff] %v4485_v13  ;;  %v4497_v25 = vsel %vm515_vm4, %v562_v33, %v564_v38  ;;  %v571_v33 = vrot.slane %v4268_v6, 2 }
  0xbe   : > { %744 = vrot.lane.b32.xlu0 %v4446_v28, %s3771_s25  ;;  %v569_v28 = vrot.slane %v4243_v52, 2  ;;  %v4488_v63 = vpop.permute.xlu0 %634  ;;  %v4494_v52 = vsel %vm515_vm4, %v557_v27, %v559_v44  ;;  %8234 = vst [vmem:[#allocation81_spill] sm:$0xff] %v4497_v25  ;;  %v572_v44 = vrot.slane %v4229_v18, 2 }
  0xbf   : > { %8231 = vst [vmem:[#allocation78_spill] sm:$0xff] %v4488_v63 }
  0xc0   : > { %746 = vrot.lane.b32.xlu1 %v4469_v3, %s3771_s25  ;;  %8233 = vst [vmem:[#allocation80_spill] sm:$0xff] %v4494_v52 }
  0xc3   : > { %754 = vrot.lane.b32.xlu2 %v4466_v57, %s3771_s25  ;;  %v4491_v57 = vsel %vm515_vm4, %v567_v30, %v569_v28  ;;  %v566_v28 = vrot.slane %v4179_v23, 2 }
  0xc4   : > { %8232 = vst [vmem:[#allocation79_spill] sm:$0xff] %v4491_v57  ;;  %v4510_v27 = vpop.permute.xlu1 %636 }
  0xc5   : > { %v4480_v58 = vpop.permute.xlu2 %656  ;;  %8236 = vst [vmem:[#allocation83_spill] sm:$0xff] %v4510_v27  ;;  %v4520_v13 = vsel %vm515_vm4, %v566_v28, %v567_v30  ;;  %v582_v27 = vrot.slane %v4258_v17, 2  ;;  %v574_v30 = vrot.slane %v4231_v20, 2  ;;  %v579_v28 = vrot.slane %v4298_v16, 2 }
  0xc6   : > { %8229 = vst [vmem:[#allocation76_spill] sm:$0xff] %v4480_v58  ;;  %750 = vrot.lane.b32.xlu0 %v4472_v51, %s3771_s25  ;;  %v577_v58 = vrot.slane %v4272_v37, 2  ;;  %v4514_v38 = vpop.permute.xlu0 %640  ;;  %v591_v20 = vrot.slane %v4323_v21, 2 }
  0xc7   : > { %8237 = vst [vmem:[#allocation84_spill] sm:$0xff] %v4514_v38 }
  0xc8   : > { %752 = vrot.lane.b32.xlu1 %v4494_v52, %s3771_s25  ;;  %v4517_v63 = vsel %vm515_vm4, %v576_v62, %v577_v58  ;;  %8239 = vst [vmem:[#allocation86_spill] sm:$0xff] %v4520_v13 }
  0xc9   : > { %8238 = vst [vmem:[#allocation85_spill] sm:$0xff] %v4517_v63 }
  0xcb   : > { %760 = vrot.lane.b32.xlu2 %v4491_v57, %s3771_s25  ;;  %v584_v57 = vrot.slane %v4300_v55, 2  ;;  %v4545_v55 = vsel %vm515_vm4, %v572_v44, %v574_v30  ;;  %v587_v30 = vrot.slane %v4286_v41, 2 }
  0xcc   : > { %v4536_v62 = vpop.permute.xlu1 %642  ;;  %8244 = vst [vmem:[#allocation91_spill] sm:$0xff] %v4545_v55 }
  0xcd   : > { %v4505_v2 = vpop.permute.xlu2 %662  ;;  %8241 = vst [vmem:[#allocation88_spill] sm:$0xff] %v4536_v62 }
  0xce   : > { %8235 = vst [vmem:[#allocation82_spill] sm:$0xff] %v4505_v2  ;;  %756 = vrot.lane.b32.xlu0 %v4497_v25, %s3771_s25  ;;  %v4523_v2 = vsel %vm515_vm4, %v571_v33, %v572_v44  ;;  %v4539_v33 = vpop.permute.xlu0 %646  ;;  %v4548_v25 = vsel %vm515_vm4, %v577_v58, %v579_v28  ;;  %v586_v58 = vrot.slane %v4321_v31, 2 }
  0xcf   : > { %8242 = vst [vmem:[#allocation89_spill] sm:$0xff] %v4539_v33 }
  0xd0   : > { %758 = vrot.lane.b32.xlu1 %v4520_v13, %s3771_s25 }
  0xd3   : > { %766 = vrot.lane.b32.xlu2 %v4517_v63, %s3771_s25  ;;  %v4542_v63 = vsel %vm515_vm4, %v582_v27, %v584_v57  ;;  %v581_v57 = vrot.slane %v4256_v48, 2 }
  0xd4   : > { %8243 = vst [vmem:[#allocation90_spill] sm:$0xff] %v4542_v63  ;;  %v4561_v44 = vpop.permute.xlu1 %648 }
  0xd5   : > { %v4531_v38 = vpop.permute.xlu2 %668  ;;  %8246 = vst [vmem:[#allocation93_spill] sm:$0xff] %v4561_v44  ;;  %v4571_v62 = vsel %vm515_vm4, %v581_v57, %v582_v27  ;;  %v594_v27 = vrot.slane %v4344_v4, 2 }
  0xd6   : > { %8240 = vst [vmem:[#allocation87_spill] sm:$0xff] %v4531_v38  ;;  %762 = vrot.lane.b32.xlu0 %v4523_v2, %s3771_s25  ;;  %v592_v38 = vrot.slane %v4325_v43, 2  ;;  %v4565_v28 = vpop.permute.xlu0 %652 }
  0xd7   : > { %8247 = vst [vmem:[#allocation94_spill] sm:$0xff] %v4565_v28 }
  0xd8   : > { %764 = vrot.lane.b32.xlu1 %v4545_v55, %s3771_s25  ;;  %v4568_v33 = vsel %vm515_vm4, %v591_v20, %v592_v38  ;;  %8249 = vst [vmem:[#allocation96_spill] sm:$0xff] %v4571_v62  ;;  %v589_v20 = vrot.slane %v4288_v60, 2 }
  0xd9   : > { %8248 = vst [vmem:[#allocation95_spill] sm:$0xff] %v4568_v33 }
  0xdb   : > { %772 = vrot.lane.b32.xlu2 %v4542_v63, %s3771_s25 }
  0xdd   : > { %v4556_v16 = vpop.permute.xlu2 %674 }
  0xde   : > { %8245 = vst [vmem:[#allocation92_spill] sm:$0xff] %v4556_v16  ;;  %768 = vrot.lane.b32.xlu0 %v4548_v25, %s3771_s25  ;;  %v4574_v16 = vsel %vm515_vm4, %v586_v58, %v587_v30  ;;  %v4591_v58 = vsel %vm515_vm4, %v587_v30, %v589_v20 }
  0xdf   : > { %8253 = vst [vmem:[#allocation100_spill] sm:$0xff] %v4591_v58 }
  0xe0   : > { %770 = vrot.lane.b32.xlu1 %v4571_v62, %s3771_s25  ;;  %v4585_v28 = vpop.permute.xlu1 %654 }
  0xe1   : > { %8251 = vst [vmem:[#allocation98_spill] sm:$0xff] %v4585_v28 }
  0xe3   : > { %778 = vrot.lane.b32.xlu2 %v4568_v33, %s3771_s25  ;;  %v4594_v33 = vsel %vm515_vm4, %v592_v38, %v594_v27 }
  0xe5   : > { %v4580_v44 = vpop.permute.xlu2 %680 }
  0xe6   : > { %8250 = vst [vmem:[#allocation97_spill] sm:$0xff] %v4580_v44  ;;  %774 = vrot.lane.b32.xlu0 %v4574_v16, %s3771_s25 }
  0xe8   : > { %v4588_v57 = vpop.permute.xlu0 %658  ;;  %776 = vrot.lane.b32.xlu1 %v4591_v58, %s3771_s25 }
  0xe9   : > { %8252 = vst [vmem:[#allocation99_spill] sm:$0xff] %v4588_v57 }
  0xea   : > { %v4604_v4 = vpop.permute.xlu1 %660 }
  0xeb   : > { %816 = vrot.lane.b32.xlu2 %v3980_v26, %s3772_s26  ;;  %8255 = vst [vmem:[#allocation102_spill] sm:$0xff] %v4604_v4 }
  0xed   : > { %v4600_v60 = vpop.permute.xlu2 %718 }
  0xee   : > { %8254 = vst [vmem:[#allocation101_spill] sm:$0xff] %v4600_v60  ;;  %780 = vrot.lane.b32.xlu0 %v4594_v33, %s3771_s25  ;;  %v8320_v60 = vld [vmem:[#allocation41_spill] sm:$0xff] }
  0xf0   : > { %v4606_v44 = vpop.permute.xlu0 %664  ;;  %814 = vrot.lane.b32.xlu1 %v3973_v24, %s3772_s26 }
  0xf1   : > { %8256 = vst [vmem:[#allocation103_spill] sm:$0xff] %v4606_v44 }
  0xf2   : > { %v4616_v26 = vpop.permute.xlu1 %666 }
  0xf3   : > { %822 = vrot.lane.b32.xlu2 %v4007_v36, %s3772_s26  ;;  %8258 = vst [vmem:[#allocation105_spill] sm:$0xff] %v4616_v26 }
  0xf5   : > { %v4612_v38 = vpop.permute.xlu2 %724 }
  0xf6   : > { %8257 = vst [vmem:[#allocation104_spill] sm:$0xff] %v4612_v38  ;;  %818 = vrot.lane.b32.xlu0 %v3868_v8, %s3772_s26  ;;  %v8311_v38 = vld [vmem:[#allocation45_spill] sm:$0xff] }
  0xf8   : > { %v4618_v30 = vpop.permute.xlu0 %670  ;;  %820 = vrot.lane.b32.xlu1 %v3872_v9, %s3772_s26 }
  0xf9   : > { %8259 = vst [vmem:[#allocation106_spill] sm:$0xff] %v4618_v30 }
  0xfa   : > { %v4628_v24 = vpop.permute.xlu1 %672 }
  0xfb   : > { %828 = vrot.lane.b32.xlu2 %v4037_v46, %s3772_s26  ;;  %8261 = vst [vmem:[#allocation108_spill] sm:$0xff] %v4628_v24  ;;  %v4674_v24 = vld [vmem:[%s3832_s23 + $0xf8] sm:$0xff] }
  0xfc   : > { %8273 = vst [vmem:[#allocation120_spill] sm:$0xff] %v4674_v24 }
  0xfd   : > { %v4624_v20 = vpop.permute.xlu2 %730  ;;  %331 = vst.msk [vmem:[#allocation2 + $0x189] sm:$0xff] %vm225_vm0, %v4674_v24 }
  0xfe   : > { %8260 = vst [vmem:[#allocation107_spill] sm:$0xff] %v4624_v20  ;;  %824 = vrot.lane.b32.xlu0 %v4019_v39, %s3772_s26  ;;  %v8302_v20 = vld [vmem:[#allocation24_spill] sm:$0xff] }
 0x100   : > { %v4630_v36 = vpop.permute.xlu0 %676  ;;  %826 = vrot.lane.b32.xlu1 %v4028_v42, %s3772_s26 }
 0x101   : > { %8262 = vst [vmem:[#allocation109_spill] sm:$0xff] %v4630_v36 }
 0x102   : > { %v4640_v9 = vpop.permute.xlu1 %678 }
 0x103   : > { %834 = vrot.lane.b32.xlu2 %v4119_v29, %s3772_s26  ;;  %8264 = vst [vmem:[#allocation111_spill] sm:$0xff] %v4640_v9 }
 0x105   : > { %v4636_v8 = vpop.permute.xlu2 %736 }
 0x106   : > { %8263 = vst [vmem:[#allocation110_spill] sm:$0xff] %v4636_v8  ;;  %830 = vrot.lane.b32.xlu0 %v4112_v14, %s3772_s26 }
 0x108   : > { %v4642_v39 = vpop.permute.xlu0 %682  ;;  %832 = vrot.lane.b32.xlu1 %v4048_v50, %s3772_s26 }
 0x109   : > { %8265 = vst [vmem:[#allocation112_spill] sm:$0xff] %v4642_v39 }
 0x10a   : > { %v4652_v42 = vpop.permute.xlu1 %684 }
 0x10b   : > { %840 = vrot.lane.b32.xlu2 %v4094_v5, %s3772_s26  ;;  %8267 = vst [vmem:[#allocation114_spill] sm:$0xff] %v4652_v42  ;;  %v4671_v42 = vld [vmem:[%s3832_s23 + $0xf0] sm:$0xff] }
 0x10c   : > { %8272 = vst [vmem:[#allocation119_spill] sm:$0xff] %v4671_v42 }
 0x10d   : > { %v4648_v46 = vpop.permute.xlu2 %742  ;;  %330 = vst.msk [vmem:[#allocation2 + $0x181] sm:$0xff] %vm225_vm0, %v4671_v42 }
 0x10e   : > { %8266 = vst [vmem:[#allocation113_spill] sm:$0xff] %v4648_v46  ;;  %836 = vrot.lane.b32.xlu0 %v4121_v32, %s3772_s26 }
 0x110   : > { %v4654_v27 = vpop.permute.xlu0 %720  ;;  %838 = vrot.lane.b32.xlu1 %v4092_v0, %s3772_s26 }
 0x111   : > { %8268 = vst [vmem:[#allocation115_spill] sm:$0xff] %v4654_v27  ;;  %v8317_v27 = vld [vmem:[#allocation48_spill] sm:$0xff] }
 0x112   : > { %v4664_v9 = vpop.permute.xlu1 %722 }
 0x113   : > { %846 = vrot.lane.b32.xlu2 %v4209_v49, %s3772_s26  ;;  %8270 = vst [vmem:[#allocation117_spill] sm:$0xff] %v4664_v9  ;;  %v8314_v9 = vld [vmem:[#allocation34_spill] sm:$0xff] }
 0x115   : > { %v4660_v39 = vpop.permute.xlu2 %748 }
 0x116   : > { %8269 = vst [vmem:[#allocation116_spill] sm:$0xff] %v4660_v39  ;;  %842 = vrot.lane.b32.xlu0 %v4199_v45, %s3772_s26 }
 0x118   : > { %v4666_v36 = vpop.permute.xlu0 %726  ;;  %844 = vrot.lane.b32.xlu1 %v4142_v61, %s3772_s26 }
 0x119   : > { %8271 = vst [vmem:[#allocation118_spill] sm:$0xff] %v4666_v36 }
 0x11a   : > { %v4686_v39 = vpop.permute.xlu1 %728 }
 0x11b   : > { %852 = vrot.lane.b32.xlu2 %v4181_v40, %s3772_s26  ;;  %8275 = vst [vmem:[#allocation122_spill] sm:$0xff] %v4686_v39  ;;  %v8305_v39 = vld [vmem:[#allocation42_spill] sm:$0xff] }
 0x11d   : > { %v4678_v30 = vpop.permute.xlu2 %754 }
 0x11e   : > { %8274 = vst [vmem:[#allocation121_spill] sm:$0xff] %v4678_v30  ;;  %848 = vrot.lane.b32.xlu0 %v4211_v47, %s3772_s26 }
 0x120   : > { %v4688_v46 = vpop.permute.xlu0 %732  ;;  %850 = vrot.lane.b32.xlu1 %v4179_v23, %s3772_s26 }
 0x121   : > { %8276 = vst [vmem:[#allocation123_spill] sm:$0xff] %v4688_v46 }
 0x122   : > { %v4698_v42 = vpop.permute.xlu1 %734 }
 0x123   : > { %858 = vrot.lane.b32.xlu2 %v4270_v10, %s3772_s26  ;;  %8278 = vst [vmem:[#allocation125_spill] sm:$0xff] %v4698_v42  ;;  %v4726_v42 = vld [vmem:[#allocation2 + $0x188] sm:$0xff] }
 0x125   : > { %v4694_v26 = vpop.permute.xlu2 %760 }
 0x126   : > { %8277 = vst [vmem:[#allocation124_spill] sm:$0xff] %v4694_v26  ;;  %854 = vrot.lane.b32.xlu0 %v4268_v6, %s3772_s26 }
 0x128   : > { %v4700_v44 = vpop.permute.xlu0 %738  ;;  %856 = vrot.lane.b32.xlu1 %v4229_v18, %s3772_s26 }
 0x129   : > { %8279 = vst [vmem:[#allocation126_spill] sm:$0xff] %v4700_v44 }
 0x12a   : > { %v4710_v8 = vpop.permute.xlu1 %740 }
 0x12b   : > { %864 = vrot.lane.b32.xlu2 %v4258_v17, %s3772_s26  ;;  %8281 = vst [vmem:[#allocation128_spill] sm:$0xff] %v4710_v8 }
 0x12d   : > { %v4706_v24 = vpop.permute.xlu2 %766 }
 0x12e   : > { %8280 = vst [vmem:[#allocation127_spill] sm:$0xff] %v4706_v24  ;;  %860 = vrot.lane.b32.xlu0 %v4272_v37, %s3772_s26 }
 0x130   : > { %v4712_v26 = vpop.permute.xlu0 %744  ;;  %862 = vrot.lane.b32.xlu1 %v4256_v48, %s3772_s26 }
 0x131   : > { %8282 = vst [vmem:[#allocation129_spill] sm:$0xff] %v4712_v26 }
 0x132   : > { %v4722_v4 = vpop.permute.xlu1 %746 }
 0x133   : > { %870 = vrot.lane.b32.xlu2 %v4323_v21, %s3772_s26  ;;  %8284 = vst [vmem:[#allocation131_spill] sm:$0xff] %v4722_v4  ;;  %v4740_v4 = vld [vmem:[#allocation2 + $0x180] sm:$0xff] }
 0x135   : > { %v4718_v44 = vpop.permute.xlu2 %772 }
 0x136   : > { %8283 = vst [vmem:[#allocation130_spill] sm:$0xff] %v4718_v44  ;;  %866 = vrot.lane.b32.xlu0 %v4321_v31, %s3772_s26 }
 0x138   : > { %v4724_v24 = vpop.permute.xlu0 %750  ;;  %868 = vrot.lane.b32.xlu1 %v4286_v41, %s3772_s26 }
 0x139   : > { %8285 = vst [vmem:[#allocation132_spill] sm:$0xff] %v4724_v24  ;;  %v8299_v24 = vld [vmem:[#allocation37_spill] sm:$0xff] }
 0x13a   : > { %v4736_v44 = vpop.permute.xlu1 %752 }
 0x13b   : > { %876 = vrot.lane.b32.xlu2 %v4726_v42, %s3772_s26  ;;  %8287 = vst [vmem:[#allocation134_spill] sm:$0xff] %v4736_v44 }
 0x13d   : > { %v4732_v26 = vpop.permute.xlu2 %778 }
 0x13e   : > { %8286 = vst [vmem:[#allocation133_spill] sm:$0xff] %v4732_v26  ;;  %872 = vrot.lane.b32.xlu0 %v4325_v43, %s3772_s26 }
 0x140   : > { %v4738_v8 = vpop.permute.xlu0 %756  ;;  %874 = vrot.lane.b32.xlu1 %v4740_v4, %s3772_s26 }
 0x141   : > { %8288 = vst [vmem:[#allocation135_spill] sm:$0xff] %v4738_v8 }
 0x142   : > { %v4750_v26 = vpop.permute.xlu1 %758 }
 0x143   : > { %914 = vrot.lane.b32.xlu2 %v3883_v12, %s3773_s27  ;;  %8290 = vst [vmem:[#allocation137_spill] sm:$0xff] %v4750_v26 }
 0x145   : > { %v4746_v30 = vpop.permute.xlu2 %816 }
 0x146   : > { %8289 = vst [vmem:[#allocation136_spill] sm:$0xff] %v4746_v30  ;;  %910 = vrot.lane.b32.xlu0 %v4005_v35, %s3773_s27 }
 0x148   : > { %v4752_v57 = vpop.permute.xlu0 %762  ;;  %912 = vrot.lane.b32.xlu1 %v4058_v53, %s3773_s27 }
 0x149   : > { %8291 = vst [vmem:[#allocation138_spill] sm:$0xff] %v4752_v57  ;;  %v8296_v57 = vld [vmem:[#allocation22_spill] sm:$0xff] }
 0x14a   : > { %v4762_v44 = vpop.permute.xlu1 %764 }
 0x14b   : > { %920 = vrot.lane.b32.xlu2 %v4100_v7, %s3773_s27  ;;  %8293 = vst [vmem:[#allocation140_spill] sm:$0xff] %v4762_v44 }
 0x14d   : > { %v4758_v8 = vpop.permute.xlu2 %822 }
 0x14e   : > { %8292 = vst [vmem:[#allocation139_spill] sm:$0xff] %v4758_v8  ;;  %916 = vrot.lane.b32.xlu0 %v3925_v15, %s3773_s27  ;;  %v8308_v8 = vld [vmem:[#allocation30_spill] sm:$0xff] }
 0x150   : > { %v4764_v46 = vpop.permute.xlu0 %768  ;;  %918 = vrot.lane.b32.xlu1 %v4069_v56, %s3773_s27 }
 0x151   : > { %8294 = vst [vmem:[#allocation141_spill] sm:$0xff] %v4764_v46  ;;  %v8300_v46 = vld [vmem:[#allocation27_spill] sm:$0xff] }
 0x152   : > { %v4774_v53 = vpop.permute.xlu1 %770 }
 0x153   : > { %926 = vrot.lane.b32.xlu2 %v4153_v34, %s3773_s27  ;;  %8297 = vst [vmem:[#allocation22_spill] sm:$0xff] %v4774_v53 }
 0x155   : > { %v4770_v35 = vpop.permute.xlu2 %828 }
 0x156   : > { %8295 = vst [vmem:[#allocation142_spill] sm:$0xff] %v4770_v35  ;;  %922 = vrot.lane.b32.xlu0 %v8296_v57, %s3773_s27 }
 0x158   : > { %v4776_v26 = vpop.permute.xlu0 %774  ;;  %924 = vrot.lane.b32.xlu1 %v8300_v46, %s3773_s27 }
 0x159   : > { %8298 = vst [vmem:[#allocation143_spill] sm:$0xff] %v4776_v26  ;;  %v8306_v26 = vld [vmem:[#allocation33_spill] sm:$0xff] }
 0x15a   : > { %v4786_v28 = vpop.permute.xlu1 %776 }
 0x15b   : > { %932 = vrot.lane.b32.xlu2 %v8299_v24, %s3773_s27  ;;  %8303 = vst [vmem:[#allocation27_spill] sm:$0xff] %v4786_v28 }
 0x15d   : > { %v4782_v44 = vpop.permute.xlu2 %834 }
 0x15e   : > { %8301 = vst [vmem:[#allocation37_spill] sm:$0xff] %v4782_v44  ;;  %928 = vrot.lane.b32.xlu0 %v8302_v20, %s3773_s27 }
 0x160   : > { %v4788_v35 = vpop.permute.xlu0 %780  ;;  %930 = vrot.lane.b32.xlu1 %v8306_v26, %s3773_s27 }
 0x161   : > { %8304 = vst [vmem:[#allocation24_spill] sm:$0xff] %v4788_v35  ;;  %v8312_v35 = vld [vmem:[#allocation38_spill] sm:$0xff] }
 0x162   : > { %v4798_v36 = vpop.permute.xlu1 %814 }
 0x163   : > { %938 = vrot.lane.b32.xlu2 %v8305_v39, %s3773_s27  ;;  %8309 = vst [vmem:[#allocation30_spill] sm:$0xff] %v4798_v36 }
 0x165   : > { %v4794_v53 = vpop.permute.xlu2 %840 }
 0x166   : > { %8307 = vst [vmem:[#allocation33_spill] sm:$0xff] %v4794_v53  ;;  %934 = vrot.lane.b32.xlu0 %v8308_v8, %s3773_s27 }
 0x168   : > { %v4800_v44 = vpop.permute.xlu0 %818  ;;  %936 = vrot.lane.b32.xlu1 %v8312_v35, %s3773_s27 }
 0x169   : > { %8310 = vst [vmem:[#allocation144_spill] sm:$0xff] %v4800_v44  ;;  %v8318_v44 = vld [vmem:[#allocation43_spill] sm:$0xff] }
 0x16a   : > { %v4810_v30 = vpop.permute.xlu1 %820 }
 0x16b   : > { %944 = vrot.lane.b32.xlu2 %v8311_v38, %s3773_s27  ;;  %8315 = vst [vmem:[#allocation145_spill] sm:$0xff] %v4810_v30 }
 0x16d   : > { %v4806_v28 = vpop.permute.xlu2 %846 }
 0x16e   : > { %8313 = vst [vmem:[#allocation38_spill] sm:$0xff] %v4806_v28  ;;  %940 = vrot.lane.b32.xlu0 %v8314_v9, %s3773_s27  ;;  %v8323_v9 = vld [vmem:[#allocation51_spill] sm:$0xff] }
 0x170   : > { %v4812_v53 = vpop.permute.xlu0 %824  ;;  %942 = vrot.lane.b32.xlu1 %v8318_v44, %s3773_s27 }
 0x171   : > { %8316 = vst [vmem:[#allocation146_spill] sm:$0xff] %v4812_v53  ;;  %v8324_v53 = vld [vmem:[#allocation46_spill] sm:$0xff] }
 0x172   : > { %v4822_v38 = vpop.permute.xlu1 %826 }
 0x173   : > { %950 = vrot.lane.b32.xlu2 %v8317_v27, %s3773_s27  ;;  %8321 = vst [vmem:[#allocation147_spill] sm:$0xff] %v4822_v38  ;;  %v8326_v27 = vld [vmem:[#allocation44_spill] sm:$0xff] }
 0x175   : > { %v4818_v36 = vpop.permute.xlu2 %852 }
 0x176   : > { %8319 = vst [vmem:[#allocation43_spill] sm:$0xff] %v4818_v36  ;;  %946 = vrot.lane.b32.xlu0 %v8320_v60, %s3773_s27  ;;  %v8329_v60 = vld [vmem:[#allocation53_spill] sm:$0xff] }
 0x178   : > { %v4824_v28 = vpop.permute.xlu0 %830  ;;  %948 = vrot.lane.b32.xlu1 %v8324_v53, %s3773_s27 }
 0x179   : > { %8322 = vst [vmem:[#allocation148_spill] sm:$0xff] %v4824_v28  ;;  %v8330_v28 = vld [vmem:[#allocation49_spill] sm:$0xff] }
 0x17a   : > { %v4834_v39 = vpop.permute.xlu1 %832 }
 0x17b   : > { %956 = vrot.lane.b32.xlu2 %v8323_v9, %s3773_s27  ;;  %8327 = vst [vmem:[#allocation150_spill] sm:$0xff] %v4834_v39  ;;  %v8332_v9 = vld [vmem:[#allocation47_spill] sm:$0xff] }
 0x17d   : > { %v4830_v30 = vpop.permute.xlu2 %858 }
 0x17e   : > { %8325 = vst [vmem:[#allocation149_spill] sm:$0xff] %v4830_v30  ;;  %952 = vrot.lane.b32.xlu0 %v8326_v27, %s3773_s27 }
 0x180   : > { %v4836_v36 = vpop.permute.xlu0 %836  ;;  %954 = vrot.lane.b32.xlu1 %v8330_v28, %s3773_s27 }
 0x181   : > { %8328 = vst [vmem:[#allocation151_spill] sm:$0xff] %v4836_v36  ;;  %v8335_v36 = vld [vmem:[#allocation52_spill] sm:$0xff] }
 0x182   : > { %v4846_v53 = vpop.permute.xlu1 %838 }
 0x183   : > { %962 = vrot.lane.b32.xlu2 %v8329_v60, %s3773_s27  ;;  %8333 = vst [vmem:[#allocation152_spill] sm:$0xff] %v4846_v53  ;;  %v8337_v60 = vld [vmem:[#allocation50_spill] sm:$0xff] }
 0x185   : > { %v4842_v38 = vpop.permute.xlu2 %864 }
 0x186   : > { %8331 = vst [vmem:[#allocation49_spill] sm:$0xff] %v4842_v38  ;;  %958 = vrot.lane.b32.xlu0 %v8332_v9, %s3773_s27  ;;  %v599_v38 = vrot.slane %v4740_v4, 1  ;;  %v600_v9 = vrot.slane %v4726_v42, 1 }
 0x188   : > { %v4848_v30 = vpop.permute.xlu0 %842  ;;  %960 = vrot.lane.b32.xlu1 %v8335_v36, %s3773_s27 }
 0x189   : > { %8334 = vst [vmem:[#allocation153_spill] sm:$0xff] %v4848_v30  ;;  %v4865_v30 = vsel %vm434_vm2, %v599_v38, %v600_v9 }
 0x18a   : > { %v4858_v27 = vpop.permute.xlu1 %844  ;;  %8340 = vst [vmem:[#allocation157_spill] sm:$0xff] %v4865_v30 }
 0x18b   : > { %968 = vrot.lane.b32.xlu2 %v4360_v19, %s3773_s27  ;;  %8338 = vst [vmem:[#allocation155_spill] sm:$0xff] %v4858_v27  ;;  %v4869_v19 = vld [vmem:[#allocation2 + $0x190] sm:$0x3] }
 0x18c   : > { %v602_v27 = vrot.slane %v4869_v19, 1 }
 0x18d   : > { %v4854_v39 = vpop.permute.xlu2 %870 }
 0x18e   : > { %8336 = vst [vmem:[#allocation154_spill] sm:$0xff] %v4854_v39  ;;  %964 = vrot.lane.b32.xlu0 %v8337_v60, %s3773_s27  ;;  %v8341_v39 = vld [vmem:[#allocation54_spill] sm:$0xff]  ;;  %v4883_v36 = vsel %vm434_vm2, %v600_v9, %v602_v27 }
 0x18f   : > { %v8350_v27 = vld [vmem:[#allocation58_spill] sm:$0xff] }
 0x190   : > { %v4862_v53 = vpop.permute.xlu0 %848  ;;  %966 = vrot.lane.b32.xlu1 %v8341_v39, %s3773_s27 }
 0x191   : > { %8339 = vst [vmem:[#allocation156_spill] sm:$0xff] %v4862_v53 }
 0x192   : > { %v4878_v53 = vpop.permute.xlu1 %850 }
 0x193   : > { %1006 = vrot.lane.b32.xlu2 %v4377_v54, %s3774_s28  ;;  %8343 = vst [vmem:[#allocation159_spill] sm:$0xff] %v4878_v53 }
 0x195   : > { %v4873_v60 = vpop.permute.xlu2 %876 }
 0x196   : > { %8342 = vst [vmem:[#allocation158_spill] sm:$0xff] %v4873_v60  ;;  %970 = vrot.lane.b32.xlu0 %v4865_v30, %s3773_s27  ;;  %v8346_v60 = vld [vmem:[#allocation55_spill] sm:$0xff] }
 0x198   : > { %v4880_v38 = vpop.permute.xlu0 %854  ;;  %972 = vrot.lane.b32.xlu1 %v4883_v36, %s3773_s27 }
 0x199   : > { %8344 = vst [vmem:[#allocation160_spill] sm:$0xff] %v4880_v38 }
 0x19a   : > { %v4893_v30 = vpop.permute.xlu1 %856 }
 0x19b   : > { %1012 = vrot.lane.b32.xlu2 %v4398_v59, %s3774_s28  ;;  %8347 = vst [vmem:[#allocation55_spill] sm:$0xff] %v4893_v30  ;;  %v8355_v30 = vld [vmem:[#allocation60_spill] sm:$0xff] }
 0x19d   : > { %v4889_v54 = vpop.permute.xlu2 %914 }
 0x19e   : > { %8345 = vst [vmem:[#allocation161_spill] sm:$0xff] %v4889_v54  ;;  %1008 = vrot.lane.b32.xlu0 %v8346_v60, %s3774_s28  ;;  %v8353_v60 = vld [vmem:[#allocation61_spill] sm:$0xff] }
 0x1a0   : > { %v4895_v39 = vpop.permute.xlu0 %860  ;;  %1010 = vrot.lane.b32.xlu1 %v4380_v1, %s3774_s28 }
 0x1a1   : > { %8348 = vst [vmem:[#allocation162_spill] sm:$0xff] %v4895_v39 }
 0x1a2   : > { %v4905_v38 = vpop.permute.xlu1 %862 }
 0x1a3   : > { %1018 = vrot.lane.b32.xlu2 %v4420_v11, %s3774_s28  ;;  %8351 = vst [vmem:[#allocation58_spill] sm:$0xff] %v4905_v38 }
 0x1a5   : > { %v4901_v9 = vpop.permute.xlu2 %920 }
 0x1a6   : > { %8349 = vst [vmem:[#allocation163_spill] sm:$0xff] %v4901_v9  ;;  %1014 = vrot.lane.b32.xlu0 %v8350_v27, %s3774_s28 }
 0x1a8   : > { %v4907_v53 = vpop.permute.xlu0 %866  ;;  %1016 = vrot.lane.b32.xlu1 %v8353_v60, %s3774_s28 }
 0x1a9   : > { %8352 = vst [vmem:[#allocation164_spill] sm:$0xff] %v4907_v53  ;;  %v8358_v53 = vld [vmem:[#allocation65_spill] sm:$0xff] }
 0x1aa   : > { %v4917_v54 = vpop.permute.xlu1 %868 }
 0x1ab   : > { %1024 = vrot.lane.b32.xlu2 %v4443_v22, %s3774_s28  ;;  %8356 = vst [vmem:[#allocation165_spill] sm:$0xff] %v4917_v54  ;;  %v8360_v22 = vld [vmem:[#allocation63_spill] sm:$0xff] }
 0x1ad   : > { %v4913_v39 = vpop.permute.xlu2 %926 }
 0x1ae   : > { %8354 = vst [vmem:[#allocation61_spill] sm:$0xff] %v4913_v39  ;;  %1020 = vrot.lane.b32.xlu0 %v8355_v30, %s3774_s28 }
 0x1b0   : > { %v4919_v9 = vpop.permute.xlu0 %872  ;;  %1022 = vrot.lane.b32.xlu1 %v8358_v53, %s3774_s28 }
 0x1b1   : > { %8357 = vst [vmem:[#allocation166_spill] sm:$0xff] %v4919_v9  ;;  %v8363_v9 = vld [vmem:[#allocation70_spill] sm:$0xff] }
 0x1b2   : > { %v4929_v11 = vpop.permute.xlu1 %874 }
 0x1b3   : > { %1030 = vrot.lane.b32.xlu2 %v4469_v3, %s3774_s28  ;;  %8361 = vst [vmem:[#allocation63_spill] sm:$0xff] %v4929_v11  ;;  %v8365_v3 = vld [vmem:[#allocation68_spill] sm:$0xff] }
 0x1b5   : > { %v4925_v38 = vpop.permute.xlu2 %932 }
 0x1b6   : > { %8359 = vst [vmem:[#allocation65_spill] sm:$0xff] %v4925_v38  ;;  %1026 = vrot.lane.b32.xlu0 %v8360_v22, %s3774_s28 }
 0x1b8   : > { %v4931_v39 = vpop.permute.xlu0 %910  ;;  %1028 = vrot.lane.b32.xlu1 %v8363_v9, %s3774_s28 }
 0x1b9   : > { %8362 = vst [vmem:[#allocation167_spill] sm:$0xff] %v4931_v39  ;;  %v8369_v39 = vld [vmem:[#allocation74_spill] sm:$0xff] }
 0x1ba   : > { %v4941_v30 = vpop.permute.xlu1 %912 }
 0x1bb   : > { %1036 = vrot.lane.b32.xlu2 %v4494_v52, %s3774_s28  ;;  %8366 = vst [vmem:[#allocation168_spill] sm:$0xff] %v4941_v30 }
 0x1bd   : > { %v4937_v54 = vpop.permute.xlu2 %938 }
 0x1be   : > { %8364 = vst [vmem:[#allocation70_spill] sm:$0xff] %v4937_v54  ;;  %1032 = vrot.lane.b32.xlu0 %v8365_v3, %s3774_s28 }
 0x1c0   : > { %v4943_v38 = vpop.permute.xlu0 %916  ;;  %1034 = vrot.lane.b32.xlu1 %v4472_v51, %s3774_s28 }
 0x1c1   : > { %8367 = vst [vmem:[#allocation169_spill] sm:$0xff] %v4943_v38  ;;  %v8372_v38 = vld [vmem:[#allocation81_spill] sm:$0xff] }
 0x1c2   : > { %v4953_v52 = vpop.permute.xlu1 %918 }
 0x1c3   : > { %1042 = vrot.lane.b32.xlu2 %v4520_v13, %s3774_s28  ;;  %8370 = vst [vmem:[#allocation74_spill] sm:$0xff] %v4953_v52  ;;  %v8374_v13 = vld [vmem:[#allocation79_spill] sm:$0xff]  ;;  %v8378_v52 = vld [vmem:[#allocation85_spill] sm:$0xff] }
 0x1c5   : > { %v4949_v11 = vpop.permute.xlu2 %944 }
 0x1c6   : > { %8368 = vst [vmem:[#allocation170_spill] sm:$0xff] %v4949_v11  ;;  %1038 = vrot.lane.b32.xlu0 %v8369_v39, %s3774_s28 }
 0x1c8   : > { %v4955_v54 = vpop.permute.xlu0 %922  ;;  %1040 = vrot.lane.b32.xlu1 %v8372_v38, %s3774_s28 }
 0x1c9   : > { %8371 = vst [vmem:[#allocation171_spill] sm:$0xff] %v4955_v54 }
 0x1ca   : > { %v4965_v3 = vpop.permute.xlu1 %924 }
 0x1cb   : > { %1048 = vrot.lane.b32.xlu2 %v4545_v55, %s3774_s28  ;;  %8375 = vst [vmem:[#allocation79_spill] sm:$0xff] %v4965_v3  ;;  %v605_v3 = vrot.slane %v4726_v42, 2 }
 0x1cd   : > { %v4961_v30 = vpop.permute.xlu2 %950 }
 0x1ce   : > { %8373 = vst [vmem:[#allocation81_spill] sm:$0xff] %v4961_v30  ;;  %1044 = vrot.lane.b32.xlu0 %v8374_v13, %s3774_s28 }
 0x1d0   : > { %v4967_v11 = vpop.permute.xlu0 %928  ;;  %1046 = vrot.lane.b32.xlu1 %v4523_v2, %s3774_s28 }
 0x1d1   : > { %8376 = vst [vmem:[#allocation172_spill] sm:$0xff] %v4967_v11  ;;  %v604_v11 = vrot.slane %v4740_v4, 2 }
 0x1d2   : > { %v4977_v55 = vpop.permute.xlu1 %930 }
 0x1d3   : > { %1054 = vrot.lane.b32.xlu2 %v4571_v62, %s3774_s28  ;;  %8379 = vst [vmem:[#allocation174_spill] sm:$0xff] %v4977_v55 }
 0x1d5   : > { %v4973_v54 = vpop.permute.xlu2 %956 }
 0x1d6   : > { %8377 = vst [vmem:[#allocation173_spill] sm:$0xff] %v4973_v54  ;;  %1050 = vrot.lane.b32.xlu0 %v8378_v52, %s3774_s28 }
 0x1d8   : > { %v4979_v30 = vpop.permute.xlu0 %934  ;;  %1052 = vrot.lane.b32.xlu1 %v4548_v25, %s3774_s28 }
 0x1d9   : > { %8380 = vst [vmem:[#allocation175_spill] sm:$0xff] %v4979_v30  ;;  %v4996_v30 = vsel %vm515_vm4, %v604_v11, %v605_v3 }
 0x1da   : > { %v4991_v54 = vpop.permute.xlu1 %936 }
 0x1db   : > { %1060 = vrot.lane.b32.xlu2 %v4591_v58, %s3774_s28  ;;  %8382 = vst [vmem:[#allocation177_spill] sm:$0xff] %v4991_v54  ;;  %v607_v54 = vrot.slane %v4869_v19, 2 }
 0x1dd   : > { %v4987_v62 = vpop.permute.xlu2 %962  ;;  %v5012_v11 = vsel %vm515_vm4, %v605_v3, %v607_v54  ;;  %v5028_v3 = vld [vmem:[#allocation2 + $0x60] sm:$0xff]  ;;  %v5032_v54 = vld [vmem:[#allocation2 + $0x30] sm:$0xff] }
 0x1de   : > { %8381 = vst [vmem:[#allocation176_spill] sm:$0xff] %v4987_v62  ;;  %1056 = vrot.lane.b32.xlu0 %v4542_v63, %s3774_s28  ;;  %v8385_v62 = vld [vmem:[#allocation95_spill] sm:$0xff] }
 0x1df   : > { %8391 = vst [vmem:[#allocation184_spill] sm:$0xff] %v5028_v3 }
 0x1e0   : > { %v4993_v55 = vpop.permute.xlu0 %940  ;;  %1058 = vrot.lane.b32.xlu1 %v4574_v16, %s3774_s28  ;;  %8392 = vst [vmem:[#allocation185_spill] sm:$0xff] %v5032_v54 }
 0x1e1   : > { %8383 = vst [vmem:[#allocation178_spill] sm:$0xff] %v4993_v55  ;;  %v5014_v55 = vld [vmem:[#allocation2 + $0x38] sm:$0xff] }
 0x1e2   : > { %v5006_v52 = vpop.permute.xlu1 %942  ;;  %8388 = vst [vmem:[#allocation181_spill] sm:$0xff] %v5014_v55 }
 0x1e3   : > { %1066 = vrot.lane.b32.xlu2 %v4996_v30, %s3774_s28  ;;  %8386 = vst [vmem:[#allocation95_spill] sm:$0xff] %v5006_v52 }
 0x1e5   : > { %v5002_v58 = vpop.permute.xlu2 %968 }
 0x1e6   : > { %8384 = vst [vmem:[#allocation179_spill] sm:$0xff] %v5002_v58  ;;  %1062 = vrot.lane.b32.xlu0 %v8385_v62, %s3774_s28 }
 0x1e8   : > { %v5009_v63 = vpop.permute.xlu0 %946  ;;  %1064 = vrot.lane.b32.xlu1 %v4594_v33, %s3774_s28 }
 0x1e9   : > { %8387 = vst [vmem:[#allocation180_spill] sm:$0xff] %v5009_v63 }
 0x1ea   : > { %v5024_v19 = vpop.permute.xlu1 %948 }
 0x1eb   : > { %1104 = vrot.lane.b32.xlu2 %v5014_v55, %s3775_s29  ;;  %8389 = vst [vmem:[#allocation182_spill] sm:$0xff] %v5024_v19  ;;  %v5038_v55 = vld [vmem:[#allocation2 + $0x48] sm:$0xff] }
 0x1ec   : > { %8394 = vst [vmem:[#allocation187_spill] sm:$0xff] %v5038_v55 }
 0x1ed   : > { %v5020_v58 = vpop.permute.xlu2 %1006 }
 0x1ee   : > { %1068 = vrot.lane.b32.xlu0 %v5012_v11, %s3774_s28 }
 0x1f0   : > { %v5026_v63 = vpop.permute.xlu0 %952  ;;  %1102 = vrot.lane.b32.xlu1 %v5032_v54, %s3775_s29 }
 0x1f1   : > { %8390 = vst [vmem:[#allocation183_spill] sm:$0xff] %v5026_v63 }
 0x1f2   : > { %v5042_v19 = vpop.permute.xlu1 %954 }
 0x1f3   : > { %1110 = vrot.lane.b32.xlu2 %v5028_v3, %s3775_s29  ;;  %8395 = vst [vmem:[#allocation188_spill] sm:$0xff] %v5042_v19  ;;  %v5048_v3 = vld [vmem:[#allocation2 + $0x50] sm:$0xff] }
 0x1f4   : > { %8397 = vst [vmem:[#allocation190_spill] sm:$0xff] %v5048_v3 }
 0x1f5   : > { %v5036_v52 = vpop.permute.xlu2 %1012 }
 0x1f6   : > { %8393 = vst [vmem:[#allocation186_spill] sm:$0xff] %v5036_v52  ;;  %1106 = vrot.lane.b32.xlu0 %v5038_v55, %s3775_s29  ;;  %v5054_v52 = vld [vmem:[#allocation2 + $0x68] sm:$0xff] }
 0x1f8   : > { %v5044_v63 = vpop.permute.xlu0 %958  ;;  %1108 = vrot.lane.b32.xlu1 %v5048_v3, %s3775_s29 }
 0x1f9   : > { %8396 = vst [vmem:[#allocation189_spill] sm:$0xff] %v5044_v63 }
 0x1fa   : > { %v5058_v55 = vpop.permute.xlu1 %960 }
 0x1fb   : > { %1116 = vrot.lane.b32.xlu2 %v4048_v50, %s3775_s29  ;;  %8398 = vst [vmem:[#allocation191_spill] sm:$0xff] %v5058_v55 }
 0x1fd   : > { %v5052_v54 = vpop.permute.xlu2 %1018 }
 0x1fe   : > { %1112 = vrot.lane.b32.xlu0 %v5054_v52, %s3775_s29 }
 0x200   : > { %v5060_v19 = vpop.permute.xlu0 %964  ;;  %1114 = vrot.lane.b32.xlu1 %v4112_v14, %s3775_s29 }
 0x201   : > { %8399 = vst [vmem:[#allocation192_spill] sm:$0xff] %v5060_v19 }
 0x202   : > { %v5070_v63 = vpop.permute.xlu1 %966 }
 0x203   : > { %1122 = vrot.lane.b32.xlu2 %v4092_v0, %s3775_s29  ;;  %8400 = vst [vmem:[#allocation193_spill] sm:$0xff] %v5070_v63 }
 0x205   : > { %v5066_v50 = vpop.permute.xlu2 %1024 }
 0x206   : > { %1118 = vrot.lane.b32.xlu0 %v4119_v29, %s3775_s29 }
 0x208   : > { %v5072_v3 = vpop.permute.xlu0 %970  ;;  %1120 = vrot.lane.b32.xlu1 %v4121_v32, %s3775_s29 }
 0x209   : > { %8401 = vst [vmem:[#allocation194_spill] sm:$0xff] %v5072_v3 }
 0x20a   : > { %v5082_v0 = vpop.permute.xlu1 %972 }
 0x20b   : > { %1128 = vrot.lane.b32.xlu2 %v4142_v61, %s3775_s29  ;;  %8403 = vst [vmem:[#allocation196_spill] sm:$0xff] %v5082_v0  ;;  %v5160_v0 = vld [vmem:[#allocation2 + $0x198] sm:$0xff] }
 0x20d   : > { %v5078_v19 = vpop.permute.xlu2 %1030 }
 0x20e   : > { %8402 = vst [vmem:[#allocation195_spill] sm:$0xff] %v5078_v19  ;;  %1124 = vrot.lane.b32.xlu0 %v4094_v5, %s3775_s29 }
 0x210   : > { %v5084_v14 = vpop.permute.xlu0 %1008  ;;  %1126 = vrot.lane.b32.xlu1 %v4199_v45, %s3775_s29 }
 0x212   : > { %v5094_v32 = vpop.permute.xlu1 %1010 }
 0x213   : > { %1134 = vrot.lane.b32.xlu2 %v4179_v23, %s3775_s29 }
 0x215   : > { %v5090_v29 = vpop.permute.xlu2 %1036 }
 0x216   : > { %8404 = vst [vmem:[#allocation197_spill] sm:$0xff] %v5090_v29  ;;  %1130 = vrot.lane.b32.xlu0 %v4209_v49, %s3775_s29 }
 0x218   : > { %v5096_v61 = vpop.permute.xlu0 %1014  ;;  %1132 = vrot.lane.b32.xlu1 %v4211_v47, %s3775_s29 }
 0x21a   : > { %v5106_v23 = vpop.permute.xlu1 %1016 }
 0x21b   : > { %1140 = vrot.lane.b32.xlu2 %v4229_v18, %s3775_s29 }
 0x21d   : > { %v5102_v5 = vpop.permute.xlu2 %1042 }
 0x21e   : > { %1136 = vrot.lane.b32.xlu0 %v4181_v40, %s3775_s29 }
 0x220   : > { %v5108_v45 = vpop.permute.xlu0 %1020  ;;  %1138 = vrot.lane.b32.xlu1 %v4268_v6, %s3775_s29 }
 0x222   : > { %v5118_v18 = vpop.permute.xlu1 %1022 }
 0x223   : > { %1146 = vrot.lane.b32.xlu2 %v4256_v48, %s3775_s29 }
 0x225   : > { %v5114_v49 = vpop.permute.xlu2 %1048 }
 0x226   : > { %1142 = vrot.lane.b32.xlu0 %v4270_v10, %s3775_s29 }
 0x228   : > { %v5120_v47 = vpop.permute.xlu0 %1026  ;;  %1144 = vrot.lane.b32.xlu1 %v4272_v37, %s3775_s29 }
 0x22a   : > { %v5130_v48 = vpop.permute.xlu1 %1028 }
 0x22b   : > { %1152 = vrot.lane.b32.xlu2 %v4286_v41, %s3775_s29 }
 0x22d   : > { %v5126_v40 = vpop.permute.xlu2 %1054 }
 0x22e   : > { %8405 = vst [vmem:[#allocation198_spill] sm:$0xff] %v5126_v40  ;;  %1148 = vrot.lane.b32.xlu0 %v4258_v17, %s3775_s29  ;;  %v5146_v17 = vld [vmem:[#allocation2 + $0x1a0] sm:$0xff]  ;;  %v8425_v40 = vld [vmem:[#allocation44_spill] sm:$0xff] }
 0x230   : > { %v5132_v6 = vpop.permute.xlu0 %1032  ;;  %1150 = vrot.lane.b32.xlu1 %v4321_v31, %s3775_s29 }
 0x231   : > { %8406 = vst [vmem:[#allocation199_spill] sm:$0xff] %v5132_v6 }
 0x232   : > { %v5142_v37 = vpop.permute.xlu1 %1034 }
 0x233   : > { %1158 = vrot.lane.b32.xlu2 %v4740_v4, %s3775_s29  ;;  %8408 = vst [vmem:[#allocation201_spill] sm:$0xff] %v5142_v37  ;;  %v8424_v37 = vld [vmem:[#allocation52_spill] sm:$0xff] }
 0x235   : > { %v5138_v10 = vpop.permute.xlu2 %1060 }
 0x236   : > { %8407 = vst [vmem:[#allocation200_spill] sm:$0xff] %v5138_v10  ;;  %1154 = vrot.lane.b32.xlu0 %v4323_v21, %s3775_s29 }
 0x238   : > { %v5144_v41 = vpop.permute.xlu0 %1038  ;;  %1156 = vrot.lane.b32.xlu1 %v4325_v43, %s3775_s29 }
 0x23a   : > { %v5156_v31 = vpop.permute.xlu1 %1040 }
 0x23b   : > { %1164 = vrot.lane.b32.xlu2 %v5146_v17, %s3775_s29 }
 0x23d   : > { %v5152_v4 = vpop.permute.xlu2 %1066 }
 0x23e   : > { %8409 = vst [vmem:[#allocation202_spill] sm:$0xff] %v5152_v4  ;;  %1160 = vrot.lane.b32.xlu0 %v4726_v42, %s3775_s29 }
 0x240   : > { %v5158_v21 = vpop.permute.xlu0 %1044  ;;  %1162 = vrot.lane.b32.xlu1 %v5160_v0, %s3775_s29 }
 0x242   : > { %v5170_v43 = vpop.permute.xlu1 %1046 }
 0x243   : > { %1202 = vrot.lane.b32.xlu2 %v4069_v56, %s3776_s30 }
 0x245   : > { %v5166_v3 = vpop.permute.xlu2 %1104 }
 0x246   : > { %1198 = vrot.lane.b32.xlu0 %v3883_v12, %s3776_s30 }
 0x248   : > { %v5172_v42 = vpop.permute.xlu0 %1050  ;;  %1200 = vrot.lane.b32.xlu1 %v3925_v15, %s3776_s30 }
 0x249   : > { %8410 = vst [vmem:[#allocation203_spill] sm:$0xff] %v5172_v42 }
 0x24a   : > { %v5182_v56 = vpop.permute.xlu1 %1052 }
 0x24b   : > { %1208 = vrot.lane.b32.xlu2 %v8300_v46, %s3776_s30  ;;  %8411 = vst [vmem:[#allocation204_spill] sm:$0xff] %v5182_v56  ;;  %v8429_v56 = vld [vmem:[#allocation47_spill] sm:$0xff] }
 0x24d   : > { %v5178_v4 = vpop.permute.xlu2 %1110 }
 0x24e   : > { %1204 = vrot.lane.b32.xlu0 %v4100_v7, %s3776_s30 }
 0x250   : > { %v5184_v63 = vpop.permute.xlu0 %1056  ;;  %1206 = vrot.lane.b32.xlu1 %v8296_v57, %s3776_s30 }
 0x251   : > { %8412 = vst [vmem:[#allocation205_spill] sm:$0xff] %v5184_v63 }
 0x252   : > { %v5194_v15 = vpop.permute.xlu1 %1058 }
 0x253   : > { %1214 = vrot.lane.b32.xlu2 %v8306_v26, %s3776_s30  ;;  %8413 = vst [vmem:[#allocation206_spill] sm:$0xff] %v5194_v15  ;;  %v612_v15 = vrot.slane %v5160_v0, 1 }
 0x255   : > { %v5190_v12 = vpop.permute.xlu2 %1116 }
 0x256   : > { %1210 = vrot.lane.b32.xlu0 %v4153_v34, %s3776_s30 }
 0x258   : > { %v5196_v46 = vpop.permute.xlu0 %1062  ;;  %1212 = vrot.lane.b32.xlu1 %v8302_v20, %s3776_s30 }
 0x259   : > { %8414 = vst [vmem:[#allocation207_spill] sm:$0xff] %v5196_v46 }
 0x25a   : > { %v5206_v57 = vpop.permute.xlu1 %1064 }
 0x25b   : > { %1220 = vrot.lane.b32.xlu2 %v8312_v35, %s3776_s30  ;;  %8415 = vst [vmem:[#allocation208_spill] sm:$0xff] %v5206_v57  ;;  %v8418_v35 = vld [vmem:[#allocation42_spill] sm:$0xff] }
 0x25d   : > { %v5202_v7 = vpop.permute.xlu2 %1122 }
 0x25e   : > { %1216 = vrot.lane.b32.xlu0 %v8299_v24, %s3776_s30  ;;  %v8419_v24 = vld [vmem:[#allocation46_spill] sm:$0xff] }
 0x260   : > { %v5208_v26 = vpop.permute.xlu0 %1068  ;;  %1218 = vrot.lane.b32.xlu1 %v8308_v8, %s3776_s30 }
 0x261   : > { %8416 = vst [vmem:[#allocation209_spill] sm:$0xff] %v5208_v26  ;;  %v8420_v26 = vld [vmem:[#allocation34_spill] sm:$0xff] }
 0x262   : > { %v5218_v20 = vpop.permute.xlu1 %1102 }
 0x263   : > { %1226 = vrot.lane.b32.xlu2 %v8318_v44, %s3776_s30  ;;  %v8421_v44 = vld [vmem:[#allocation45_spill] sm:$0xff] }
 0x265   : > { %v5214_v34 = vpop.permute.xlu2 %1128 }
 0x266   : > { %8417 = vst [vmem:[#allocation210_spill] sm:$0xff] %v5214_v34  ;;  %1222 = vrot.lane.b32.xlu0 %v8418_v35, %s3776_s30  ;;  %v613_v35 = vrot.slane %v5146_v17, 1 }
 0x268   : > { %v5220_v46 = vpop.permute.xlu0 %1106  ;;  %1224 = vrot.lane.b32.xlu1 %v8420_v26, %s3776_s30  ;;  %v614_v63 = vsel %vm434_vm2, %v612_v15, %v613_v35 }
 0x26a   : > { %v5230_v8 = vpop.permute.xlu1 %1108 }
 0x26b   : > { %1232 = vrot.lane.b32.xlu2 %v8419_v24, %s3776_s30  ;;  %v8422_v24 = vld [vmem:[#allocation41_spill] sm:$0xff] }
 0x26d   : > { %v5226_v57 = vpop.permute.xlu2 %1134 }
 0x26e   : > { %1228 = vrot.lane.b32.xlu0 %v8421_v44, %s3776_s30  ;;  %v8423_v44 = vld [vmem:[#allocation48_spill] sm:$0xff] }
 0x270   : > { %v5232_v10 = vpop.permute.xlu0 %1112  ;;  %1230 = vrot.lane.b32.xlu1 %v8422_v24, %s3776_s30  ;;  %v8427_v24 = vld [vmem:[#allocation51_spill] sm:$0xff] }
 0x272   : > { %v5245_v29 = vpop.permute.xlu1 %1114 }
 0x273   : > { %1238 = vrot.lane.b32.xlu2 %v8330_v28, %s3776_s30 }
 0x275   : > { %v5240_v26 = vpop.permute.xlu2 %1140 }
 0x276   : > { %1234 = vrot.lane.b32.xlu0 %v8423_v44, %s3776_s30  ;;  %v8428_v44 = vld [vmem:[#allocation54_spill] sm:$0xff] }
 0x278   : > { %v5247_v55 = vpop.permute.xlu0 %1118  ;;  %1236 = vrot.lane.b32.xlu1 %v8425_v40, %s3776_s30 }
 0x27a   : > { %v5257_v34 = vpop.permute.xlu1 %1120 }
 0x27b   : > { %1244 = vrot.lane.b32.xlu2 %v8424_v37, %s3776_s30  ;;  %v8431_v37 = vld [vmem:[#allocation53_spill] sm:$0xff] }
 0x27d   : > { %v5253_v28 = vpop.permute.xlu2 %1146 }
 0x27e   : > { %8426 = vst [vmem:[#allocation42_spill] sm:$0xff] %v5253_v28  ;;  %1240 = vrot.lane.b32.xlu0 %v8427_v24, %s3776_s30  ;;  %v8434_v24 = vld [vmem:[#allocation50_spill] sm:$0xff] }
 0x280   : > { %v5259_v15 = vpop.permute.xlu0 %1124  ;;  %1242 = vrot.lane.b32.xlu1 %v8429_v56, %s3776_s30 }
 0x282   : > { %v5269_v40 = vpop.permute.xlu1 %1126 }
 0x283   : > { %1250 = vrot.lane.b32.xlu2 %v8428_v44, %s3776_s30  ;;  %8432 = vst [vmem:[#allocation34_spill] sm:$0xff] %v5269_v40  ;;  %v8436_v44 = vld [vmem:[#allocation57_spill] sm:$0xff]  ;;  %v8458_v40 = vld [vmem:[#allocation96_spill] sm:$0xff] }
 0x285   : > { %v5265_v6 = vpop.permute.xlu2 %1152 }
 0x286   : > { %8430 = vst [vmem:[#allocation46_spill] sm:$0xff] %v5265_v6  ;;  %1246 = vrot.lane.b32.xlu0 %v8431_v37, %s3776_s30  ;;  %v5287_v37 = vld [vmem:[#allocation2 + $0x1a8] sm:$0x3] }
 0x288   : > { %v5271_v28 = vpop.permute.xlu0 %1130  ;;  %1248 = vrot.lane.b32.xlu1 %v8434_v24, %s3776_s30  ;;  %v615_v24 = vrot.slane %v5287_v37, 1 }
 0x289   : > { %8433 = vst [vmem:[#allocation45_spill] sm:$0xff] %v5271_v28 }
 0x28a   : > { %v5281_v56 = vpop.permute.xlu1 %1132 }
 0x28b   : > { %1256 = vrot.lane.b32.xlu2 %v4883_v36, %s3776_s30  ;;  %8437 = vst [vmem:[#allocation48_spill] sm:$0xff] %v5281_v56  ;;  %v8438_v36 = vld [vmem:[#allocation157_spill] sm:$0xff]  ;;  %v616_v56 = vsel %vm434_vm2, %v613_v35, %v615_v24 }
 0x28d   : > { %v5277_v42 = vpop.permute.xlu2 %1158 }
 0x28e   : > { %8435 = vst [vmem:[#allocation41_spill] sm:$0xff] %v5277_v42  ;;  %1252 = vrot.lane.b32.xlu0 %v8436_v44, %s3776_s30 }
 0x290   : > { %v5283_v6 = vpop.permute.xlu0 %1136  ;;  %1254 = vrot.lane.b32.xlu1 %v8438_v36, %s3776_s30 }
 0x292   : > { %v5295_v44 = vpop.permute.xlu1 %1138 }
 0x293   : > { %1294 = vrot.lane.b32.xlu2 %v4380_v1, %s3777_s6 }
 0x295   : > { %v5291_v28 = vpop.permute.xlu2 %1164 }
 0x296   : > { %8439 = vst [vmem:[#allocation52_spill] sm:$0xff] %v5291_v28  ;;  %1258 = vrot.lane.b32.xlu0 %v614_v63, %s3776_s30 }
 0x298   : > { %v5297_v42 = vpop.permute.xlu0 %1142  ;;  %1260 = vrot.lane.b32.xlu1 %v616_v56, %s3776_s30 }
 0x29a   : > { %v5307_v36 = vpop.permute.xlu1 %1144 }
 0x29b   : > { %1300 = vrot.lane.b32.xlu2 %v8353_v60, %s3777_s6  ;;  %v8441_v60 = vld [vmem:[#allocation64_spill] sm:$0xff] }
 0x29d   : > { %v5303_v1 = vpop.permute.xlu2 %1202 }
 0x29e   : > { %1296 = vrot.lane.b32.xlu0 %v4398_v59, %s3777_s6  ;;  %v8444_v59 = vld [vmem:[#allocation60_spill] sm:$0xff] }
 0x2a0   : > { %v5309_v63 = vpop.permute.xlu0 %1148  ;;  %1298 = vrot.lane.b32.xlu1 %v8350_v27, %s3777_s6 }
 0x2a1   : > { %8440 = vst [vmem:[#allocation44_spill] sm:$0xff] %v5309_v63 }
 0x2a2   : > { %v5319_v56 = vpop.permute.xlu1 %1150 }
 0x2a3   : > { %1306 = vrot.lane.b32.xlu2 %v8358_v53, %s3777_s6  ;;  %8442 = vst [vmem:[#allocation51_spill] sm:$0xff] %v5319_v56  ;;  %v8445_v53 = vld [vmem:[#allocation69_spill] sm:$0xff] }
 0x2a5   : > { %v5315_v35 = vpop.permute.xlu2 %1208 }
 0x2a6   : > { %1302 = vrot.lane.b32.xlu0 %v8441_v60, %s3777_s6 }
 0x2a8   : > { %v5321_v24 = vpop.permute.xlu0 %1154  ;;  %1304 = vrot.lane.b32.xlu1 %v8444_v59, %s3777_s6 }
 0x2a9   : > { %8443 = vst [vmem:[#allocation54_spill] sm:$0xff] %v5321_v24 }
 0x2aa   : > { %v5331_v27 = vpop.permute.xlu1 %1156 }
 0x2ab   : > { %1312 = vrot.lane.b32.xlu2 %v8363_v9, %s3777_s6  ;;  %8446 = vst [vmem:[#allocation47_spill] sm:$0xff] %v5331_v27  ;;  %v8449_v9 = vld [vmem:[#allocation75_spill] sm:$0xff] }
 0x2ad   : > { %v5327_v28 = vpop.permute.xlu2 %1214 }
 0x2ae   : > { %1308 = vrot.lane.b32.xlu0 %v8445_v53, %s3777_s6  ;;  %v8451_v53 = vld [vmem:[#allocation68_spill] sm:$0xff] }
 0x2b0   : > { %v5333_v63 = vpop.permute.xlu0 %1160  ;;  %1310 = vrot.lane.b32.xlu1 %v8360_v22, %s3777_s6 }
 0x2b1   : > { %8447 = vst [vmem:[#allocation53_spill] sm:$0xff] %v5333_v63 }
 0x2b2   : > { %v5343_v59 = vpop.permute.xlu1 %1162 }
 0x2b3   : > { %1318 = vrot.lane.b32.xlu2 %v4472_v51, %s3777_s6  ;;  %8450 = vst [vmem:[#allocation57_spill] sm:$0xff] %v5343_v59  ;;  %v8453_v51 = vld [vmem:[#allocation80_spill] sm:$0xff]  ;;  %v617_v59 = vrot.slane %v5160_v0, 2 }
 0x2b5   : > { %v5339_v60 = vpop.permute.xlu2 %1220 }
 0x2b6   : > { %8448 = vst [vmem:[#allocation50_spill] sm:$0xff] %v5339_v60  ;;  %1314 = vrot.lane.b32.xlu0 %v8449_v9, %s3777_s6  ;;  %v618_v9 = vrot.slane %v5146_v17, 2  ;;  %v1657_v17 = vld [vmem:[%s7945_s1 + $0x20] sm:$0xf] }
 0x2b7   : > { %3601 = vmatpush.msk.msra.mxu0 %vm1759_vm5, %v1657_v17  ;;  %3671 = vmatpush.msk.msra.mxu2 %vm1759_vm5, %v1657_v17 }
 0x2b8   : > { %v5345_v24 = vpop.permute.xlu0 %1198  ;;  %1316 = vrot.lane.b32.xlu1 %v8451_v53, %s3777_s6  ;;  %v8454_v53 = vld [vmem:[#allocation86_spill] sm:$0xff]  ;;  %v619_v56 = vsel %vm515_vm4, %v617_v59, %v618_v9 }
 0x2b9   : > { %v1654_v59 = vld [vmem:[%s7945_s1 + $0x8] sm:$0xff] }
 0x2ba   : > { %v5355_v22 = vpop.permute.xlu1 %1200 }
 0x2bb   : > { %1324 = vrot.lane.b32.xlu2 %v8372_v38, %s3777_s6 }
 0x2bd   : > { %v5351_v63 = vpop.permute.xlu2 %1226 }
 0x2be   : > { %8452 = vst [vmem:[#allocation157_spill] sm:$0xff] %v5351_v63  ;;  %1320 = vrot.lane.b32.xlu0 %v8453_v51, %s3777_s6 }
 0x2c0   : > { %v5357_v27 = vpop.permute.xlu0 %1204  ;;  %1322 = vrot.lane.b32.xlu1 %v8369_v39, %s3777_s6  ;;  %v8455_v39 = vld [vmem:[#allocation91_spill] sm:$0xff] }
 0x2c2   : > { %v5369_v51 = vpop.permute.xlu1 %1206 }
 0x2c3   : > { %1330 = vrot.lane.b32.xlu2 %v4523_v2, %s3777_s6 }
 0x2c5   : > { %v5365_v38 = vpop.permute.xlu2 %1232 }
 0x2c6   : > { %1326 = vrot.lane.b32.xlu0 %v8454_v53, %s3777_s6 }
 0x2c8   : > { %v5371_v63 = vpop.permute.xlu0 %1210  ;;  %1328 = vrot.lane.b32.xlu1 %v8374_v13, %s3777_s6  ;;  %v1655_v13 = vld [vmem:[%s7945_s1 + $0x10] sm:$0xff] }
 0x2ca   : > { %v5382_v0 = vpop.permute.xlu1 %1212 }
 0x2cb   : > { %1336 = vrot.lane.b32.xlu2 %v4548_v25, %s3777_s6  ;;  %v1656_v25 = vld [vmem:[%s7945_s1 + $0x18] sm:$0xff] }
 0x2cc   : > { %1775 = vmatpush.msra.mxu0 %v1656_v25  ;;  %3672 = vmatpush.msra.mxu2 %v1656_v25 }
 0x2cd   : > { %v5378_v2 = vpop.permute.xlu2 %1238 }
 0x2ce   : > { %1332 = vrot.lane.b32.xlu0 %v8455_v39, %s3777_s6  ;;  %1776 = vmatpush.msra.mxu0 %v1655_v13  ;;  %v8456_v39 = vld [vmem:[#allocation85_spill] sm:$0xff] }
 0x2cf   : > { %3673 = vmatpush.msra.mxu2 %v1655_v13  ;;  %v8460_v13 = vld [vmem:[#allocation90_spill] sm:$0xff] }
 0x2d0   : > { %v5387_v53 = vpop.permute.xlu0 %1216  ;;  %1334 = vrot.lane.b32.xlu1 %v8456_v39, %s3777_s6  ;;  %1777 = vmatpush.msra.mxu0 %v1654_v59 }
 0x2d1   : > { %3674 = vmatpush.msra.mxu2 %v1654_v59 }
 0x2d2   : > { %v5408_v19 = vpop.permute.xlu1 %1218 }
 0x2d3   : > { %1342 = vrot.lane.b32.xlu2 %v4574_v16, %s3777_s6  ;;  %v1653_v16 = vld [vmem:[%s7945_s1] sm:$0xff] }
 0x2d4   : > { %1778 = vmatpush.msra.mxu0 %v1653_v16  ;;  %3675 = vmatpush.msra.mxu2 %v1653_v16  ;;  %v8466_v16 = vld [vmem:[#allocation67_spill] sm:$0xff] }
 0x2d5   : > { %v5404_v17 = vpop.permute.xlu2 %1244 }
 0x2d6   : > { %8457 = vst [vmem:[#allocation64_spill] sm:$0xff] %v5404_v17  ;;  %1338 = vrot.lane.b32.xlu0 %v8458_v40, %s3777_s6  ;;  %v8462_v40 = vld [vmem:[#allocation100_spill] sm:$0xff] }
 0x2d8   : > { %v5413_v25 = vpop.permute.xlu0 %1222  ;;  %1340 = vrot.lane.b32.xlu1 %v8460_v13, %s3777_s6 }
 0x2d9   : > { %8459 = vst [vmem:[#allocation60_spill] sm:$0xff] %v5413_v25 }
 0x2da   : > { %v5423_v17 = vpop.permute.xlu1 %1224 }
 0x2db   : > { %1348 = vrot.lane.b32.xlu2 %v4594_v33, %s3777_s6  ;;  %8463 = vst [vmem:[#allocation75_spill] sm:$0xff] %v5423_v17  ;;  %v3706_v33 = vld [vmem:[#allocation2] sm:$0xff] }
 0x2dc   : > { %v1390_v13 = vsel %vm225_vm0, %v3706_v33, %v8466_v16 }
 0x2dd   : > { %v5419_v39 = vpop.permute.xlu2 %1250 }
 0x2de   : > { %8461 = vst [vmem:[#allocation69_spill] sm:$0xff] %v5419_v39  ;;  %1344 = vrot.lane.b32.xlu0 %v8462_v40, %s3777_s6  ;;  %v620_v39 = vrot.slane %v5287_v37, 2 }
 0x2e0   : > { %v5425_v60 = vpop.permute.xlu0 %1228  ;;  %1346 = vrot.lane.b32.xlu1 %v8385_v62, %s3777_s6  ;;  %v8468_v62 = vld [vmem:[#allocation30_spill] sm:$0xff]  ;;  %v621_v37 = vsel %vm515_vm4, %v618_v9, %v620_v39 }
 0x2e1   : > { %8464 = vst [vmem:[#allocation68_spill] sm:$0xff] %v5425_v60  ;;  %v8467_v60 = vld [vmem:[#allocation101_spill] sm:$0xff] }
 0x2e2   : > { %v5436_v40 = vpop.permute.xlu1 %1230 }
 0x2e3   : > { %1354 = vrot.lane.b32.xlu2 %v619_v56, %s3777_s6  ;;  %v1423_v56 = vsel %vm1422_vm6, %v1390_v13, %v8467_v60 }
 0x2e5   : > { %v5430_v59 = vpop.permute.xlu2 %1256 }
 0x2e6   : > { %8465 = vst [vmem:[#allocation80_spill] sm:$0xff] %v5430_v59  ;;  %1350 = vrot.lane.b32.xlu0 %v4996_v30, %s3777_s6  ;;  %v1456_v59 = vsel %vm1455_vm7, %v1423_v56, %v8468_v62  ;;  %v8469_v30 = vld [vmem:[#allocation167_spill] sm:$0xff]  ;;  %v3707_v62 = vld [vmem:[#allocation2 + $0x8] sm:$0xff] }
 0x2e7   : > { %v1489_v25 = vsel %vm1488_vm9, %v1456_v59, %v8469_v30  ;;  %v8475_v30 = vld [vmem:[#allocation73_spill] sm:$0xff] }
 0x2e8   : > { %v5441_v17 = vpop.permute.xlu0 %1234  ;;  %v1522_v33 = vsel %vm1521_vm8, %v1489_v25, %v5020_v58  ;;  %1352 = vrot.lane.b32.xlu1 %v5012_v11, %s3777_s6 }
 0x2e9   : > { %v1555_v60 = vsel %vm1554_vm10, %v1522_v33, %v5218_v20  ;;  %v1391_v33 = vsel %vm225_vm0, %v3707_v62, %v8475_v30 }
 0x2ea   : > { %v1588_v16 = vsel %vm1587_vm12, %v1555_v60, %v5345_v24  ;;  %v5458_v25 = vpop.permute.xlu1 %1236 }
 0x2ed   : > { %v1295_v13 = vpop.permute.xlu2 %1294 }
 0x2ee   : > { %1356 = vrot.lane.b32.xlu0 %v621_v37, %s3777_s6  ;;  %v1621_v58 = vsel %vm1620_vm11, %v1588_v16, %v1295_v13  ;;  %v8476_v37 = vld [vmem:[#allocation115_spill] sm:$0xff]  ;;  %v8477_v16 = vld [vmem:[#allocation136_spill] sm:$0xff] }
 0x2ef   : > { %3602 = vmatmul.msk.f32.vlgmr.msra.gmra.mxu0 %vm1662_vm13, %v1621_v58  ;;  %v1424_v60 = vsel %vm1422_vm6, %v1391_v33, %v8476_v37  ;;  %v8478_v58 = vld [vmem:[#allocation168_spill] sm:$0xff] }
 0x2f0   : > { %v5461_v9 = vpop.permute.xlu0 %1240  ;;  %v1457_v13 = vsel %vm1455_vm7, %v1424_v60, %v8477_v16  ;;  %v3708_v37 = vld [vmem:[#allocation2 + $0x18] sm:$0xff]  ;;  %v8480_v16 = vld [vmem:[#allocation117_spill] sm:$0xff] }
 0x2f2   : > { %v5463_v20 = vpop.permute.xlu1 %1242 }
 0x2f8   : > { %v5465_v39 = vpop.permute.xlu0 %1246 }
 0x2f9   : > { %8470 = vst [vmem:[#allocation86_spill] sm:$0xff] %v5465_v39  ;;  %v1490_v39 = vsel %vm1488_vm9, %v1457_v13, %v8478_v58  ;;  %v8482_v13 = vld [vmem:[#allocation161_spill] sm:$0xff] }
 0x2fa   : > { %v5467_v59 = vpop.permute.xlu1 %1248 }
 0x2fb   : > { %8471 = vst [vmem:[#allocation91_spill] sm:$0xff] %v5467_v59  ;;  %v8479_v59 = vld [vmem:[#allocation72_spill] sm:$0xff] }
 0x2fc   : > { %v1392_v60 = vsel %vm225_vm0, %v3708_v37, %v8479_v59  ;;  %v3709_v37 = vld [vmem:[#allocation2 + $0x20] sm:$0xff] }
 0x300   : > { %v5469_v24 = vpop.permute.xlu0 %1252 }
 0x301   : > { %8472 = vst [vmem:[#allocation85_spill] sm:$0xff] %v5469_v24  ;;  %v1523_v24 = vsel %vm1521_vm8, %v1490_v39, %v5084_v14  ;;  %v1425_v14 = vsel %vm1422_vm6, %v1392_v60, %v8480_v16  ;;  %v8481_v39 = vld [vmem:[#allocation144_spill] sm:$0xff]  ;;  %v8483_v60 = vld [vmem:[#allocation77_spill] sm:$0xff] }
 0x302   : > { %v5471_v11 = vpop.permute.xlu1 %1254  ;;  %v1393_v16 = vsel %vm225_vm0, %v3709_v37, %v8483_v60  ;;  %v8488_v60 = vld [vmem:[#allocation56_spill] sm:$0xff] }
 0x303   : > { %8473 = vst [vmem:[#allocation96_spill] sm:$0xff] %v5471_v11  ;;  %v1556_v11 = vsel %vm1554_vm10, %v1523_v24, %v5166_v3  ;;  %v1458_v3 = vsel %vm1455_vm7, %v1425_v14, %v8481_v39  ;;  %v1301_v24 = vpop.permute.xlu2 %1300  ;;  %v8484_v14 = vld [vmem:[#allocation104_spill] sm:$0xff] }
 0x304   : > { %v1589_v62 = vsel %vm1587_vm12, %v1556_v11, %v5355_v22  ;;  %v1491_v58 = vsel %vm1488_vm9, %v1458_v3, %v8482_v13  ;;  %v1426_v39 = vsel %vm1422_vm6, %v1393_v16, %v8484_v14  ;;  %v8489_v16 = vld [vmem:[#allocation185_spill] sm:$0xff] }
 0x305   : > { %v1524_v22 = vsel %vm1521_vm8, %v1491_v58, %v5094_v32  ;;  %v8485_v32 = vld [vmem:[#allocation145_spill] sm:$0xff]  ;;  %v8487_v58 = vld [vmem:[#allocation186_spill] sm:$0xff]  ;;  %v1394_v14 = vsel %vm225_vm0, %v8489_v16, %v8488_v60  ;;  %v8493_v60 = vld [vmem:[#allocation59_spill] sm:$0xff] }
 0x306   : > { %v1557_v11 = vsel %vm1554_vm10, %v1524_v22, %v5220_v46  ;;  %v1459_v3 = vsel %vm1455_vm7, %v1426_v39, %v8485_v32  ;;  %v8486_v46 = vld [vmem:[#allocation169_spill] sm:$0xff]  ;;  %v8490_v39 = vld [vmem:[#allocation118_spill] sm:$0xff] }
 0x307   : > { %v1590_v59 = vsel %vm1587_vm12, %v1557_v11, %v5303_v1  ;;  %v1492_v13 = vsel %vm1488_vm9, %v1459_v3, %v8486_v46  ;;  %v1427_v32 = vsel %vm1422_vm6, %v1394_v14, %v8490_v39  ;;  %v8491_v3 = vld [vmem:[#allocation139_spill] sm:$0xff]  ;;  %v8492_v46 = vld [vmem:[#allocation74_spill] sm:$0xff]  ;;  %v8494_v16 = vld [vmem:[#allocation181_spill] sm:$0xff] }
 0x308   : > { %v5473_v56 = vpop.permute.xlu0 %1258  ;;  %v1525_v1 = vsel %vm1521_vm8, %v1492_v13, %v8487_v58  ;;  %v1395_v14 = vsel %vm225_vm0, %v8494_v16, %v8493_v60  ;;  %v8496_v39 = vld [vmem:[#allocation146_spill] sm:$0xff]  ;;  %v3710_v16 = vld [vmem:[#allocation2 + $0xc0] sm:$0xff] }
 0x309   : > { %8474 = vst [vmem:[#allocation90_spill] sm:$0xff] %v5473_v56  ;;  %v1558_v11 = vsel %vm1554_vm10, %v1525_v1, %v5230_v8  ;;  %v1460_v8 = vsel %vm1455_vm7, %v1427_v32, %v8491_v3  ;;  %v8497_v3 = vld [vmem:[#allocation163_spill] sm:$0xff] }
 0x30a   : > { %v5487_v56 = vpop.permute.xlu1 %1260  ;;  %v1493_v13 = vsel %vm1488_vm9, %v1460_v8, %v8492_v46 }
 0x30b   : > { %v1307_v22 = vpop.permute.xlu2 %1306 }
 0x310   : > { %v1297_v30 = vpop.permute.xlu0 %1296 }
 0x311   : > { %v1622_v33 = vsel %vm1620_vm11, %v1589_v62, %v1297_v30 }
 0x312   : > { %3603 = vmatmul.msk.f32.gmra.mxu0 %vm1662_vm13, %v1622_v33  ;;  %v1299_v62 = vpop.permute.xlu1 %1298 }
 0x313   : > { %v1623_v33 = vsel %vm1620_vm11, %v1590_v59, %v1299_v62  ;;  %v1591_v59 = vsel %vm1587_vm12, %v1558_v11, %v5357_v27  ;;  %v1526_v27 = vsel %vm1521_vm8, %v1493_v13, %v5096_v61  ;;  %v5544_v11 = vpop.permute.xlu2 %1312  ;;  %v8495_v61 = vld [vmem:[#allocation122_spill] sm:$0xff] }
 0x314   : > { %v1624_v37 = vsel %vm1620_vm11, %v1591_v59, %v1301_v24  ;;  %v1559_v24 = vsel %vm1554_vm10, %v1526_v27, %v5178_v4  ;;  %v1428_v4 = vsel %vm1422_vm6, %v1395_v14, %v8495_v61  ;;  %v8500_v14 = vld [vmem:[#allocation98_spill] sm:$0xff] }
 0x315   : > { %v1592_v1 = vsel %vm1587_vm12, %v1559_v24, %v5369_v51  ;;  %v1461_v32 = vsel %vm1455_vm7, %v1428_v4, %v8496_v39 }
 0x316   : > { %v1494_v51 = vsel %vm1488_vm9, %v1461_v32, %v8497_v3  ;;  %v8503_v32 = vld [vmem:[#allocation38_spill] sm:$0xff]  ;;  %v8504_v3 = vld [vmem:[#allocation147_spill] sm:$0xff] }
 0x317   : > { %v1527_v8 = vsel %vm1521_vm8, %v1494_v51, %v5106_v23  ;;  %v1406_v23 = vsel %vm225_vm0, %v3710_v16, %v8500_v14 }
 0x318   : > { %v1303_v30 = vpop.permute.xlu0 %1302 }
 0x31a   : > { %3604 = vmatmul.msk.f32.gmra.mxu0 %vm1662_vm13, %v1623_v33  ;;  %v1305_v62 = vpop.permute.xlu1 %1304 }
 0x31b   : > { %v5575_v61 = vpop.permute.xlu2 %1318 }
 0x320   : > { %v5523_v33 = vpop.permute.xlu0 %1308 }
 0x322   : > { %3605 = vmatmul.msk.f32.gmra.mxu0 %vm1662_vm13, %v1624_v37  ;;  %v5540_v58 = vpop.permute.xlu1 %1310  ;;  %v1625_v37 = vsel %vm1620_vm11, %v1592_v1, %v1303_v30  ;;  %v1560_v30 = vsel %vm1554_vm10, %v1527_v8, %v5232_v10  ;;  %v8498_v1 = vld [vmem:[#allocation78_spill] sm:$0xff]  ;;  %v8501_v10 = vld [vmem:[#allocation107_spill] sm:$0xff] }
 0x323   : > { %v1593_v13 = vsel %vm1587_vm12, %v1560_v30, %v5315_v35  ;;  %v8502_v35 = vld [vmem:[#allocation132_spill] sm:$0xff]  ;;  %v8505_v8 = vld [vmem:[#allocation171_spill] sm:$0xff] }
 0x324   : > { %v1626_v24 = vsel %vm1620_vm11, %v1593_v13, %v1305_v62  ;;  %v1439_v39 = vsel %vm1422_vm6, %v1406_v23, %v8502_v35  ;;  %v8506_v13 = vld [vmem:[#allocation95_spill] sm:$0xff] }
 0x325   : > { %v1472_v62 = vsel %vm1455_vm7, %v1439_v39, %v8503_v32  ;;  %v8507_v39 = vld [vmem:[#allocation76_spill] sm:$0xff]  ;;  %v8508_v32 = vld [vmem:[#allocation83_spill] sm:$0xff] }
 0x328   : > { %v5546_v59 = vpop.permute.xlu0 %1314 }
 0x32a   : > { %3606 = vmatmul.msk.f32.gmra.mxu0 %vm1662_vm13, %v1625_v37  ;;  %v5563_v46 = vpop.permute.xlu1 %1316  ;;  %v8499_v37 = vld [vmem:[#allocation187_spill] sm:$0xff] }
 0x32b   : > { %v1396_v60 = vsel %vm225_vm0, %v8499_v37, %v8498_v1  ;;  %v1505_v1 = vsel %vm1488_vm9, %v1472_v62, %v8506_v13  ;;  %v8509_v62 = vld [vmem:[#allocation190_spill] sm:$0xff] }
 0x32c   : > { %v1429_v4 = vsel %vm1422_vm6, %v1396_v60, %v8501_v10  ;;  %v1538_v37 = vsel %vm1521_vm8, %v1505_v1, %v5144_v41  ;;  %v3711_v41 = vld [vmem:[#allocation2 + $0xc8] sm:$0xff]  ;;  %v5621_v1 = vpop.permute.xlu2 %1324 }
 0x32d   : > { %v1462_v51 = vsel %vm1455_vm7, %v1429_v4, %v8504_v3  ;;  %v1571_v60 = vsel %vm1554_vm10, %v1538_v37, %v5226_v57  ;;  %v1407_v57 = vsel %vm225_vm0, %v3711_v41, %v8507_v39  ;;  %v8511_v3 = vld [vmem:[#allocation134_spill] sm:$0xff] }
 0x32e   : > { %v1495_v30 = vsel %vm1488_vm9, %v1462_v51, %v8505_v8  ;;  %v1604_v10 = vsel %vm1587_vm12, %v1571_v60, %v5436_v40  ;;  %v8512_v51 = vld [vmem:[#allocation142_spill] sm:$0xff]  ;;  %v8515_v60 = vld [vmem:[#allocation79_spill] sm:$0xff] }
 0x330   : > { %v5567_v27 = vpop.permute.xlu0 %1320 }
 0x332   : > { %3607 = vmatmul.msk.f32.gmra.mxu0 %vm1662_vm13, %v1626_v24  ;;  %v1528_v24 = vsel %vm1521_vm8, %v1495_v30, %v5052_v54  ;;  %v5598_v14 = vpop.permute.xlu1 %1322  ;;  %v8513_v30 = vld [vmem:[#allocation156_spill] sm:$0xff] }
 0x333   : > { %v1561_v16 = vsel %vm1554_vm10, %v1528_v24, %v5245_v29  ;;  %v1397_v29 = vsel %vm225_vm0, %v8509_v62, %v8508_v32  ;;  %v8514_v24 = vld [vmem:[#allocation170_spill] sm:$0xff] }
 0x334   : > { %v1594_v23 = vsel %vm1587_vm12, %v1561_v16, %v5371_v63  ;;  %v8510_v63 = vld [vmem:[#allocation123_spill] sm:$0xff]  ;;  %v8516_v32 = vld [vmem:[#allocation62_spill] sm:$0xff] }
 0x335   : > { %v1627_v54 = vsel %vm1620_vm11, %v1594_v23, %v1307_v22  ;;  %v1430_v40 = vsel %vm1422_vm6, %v1397_v29, %v8510_v63  ;;  %v1440_v22 = vsel %vm1422_vm6, %v1407_v57, %v8511_v3  ;;  %v8518_v29 = vld [vmem:[#allocation99_spill] sm:$0xff]  ;;  %v8520_v63 = vld [vmem:[#allocation125_spill] sm:$0xff] }
 0x336   : > { %v1463_v8 = vsel %vm1455_vm7, %v1430_v40, %v8512_v51  ;;  %v1473_v13 = vsel %vm1455_vm7, %v1440_v22, %v8513_v30  ;;  %v8521_v40 = vld [vmem:[#allocation148_spill] sm:$0xff]  ;;  %v8522_v22 = vld [vmem:[#allocation159_spill] sm:$0xff] }
 0x337   : > { %v1506_v37 = vsel %vm1488_vm9, %v1473_v13, %v8514_v24  ;;  %v1496_v16 = vsel %vm1488_vm9, %v1463_v8, %v8515_v60  ;;  %v8523_v8 = vld [vmem:[#allocation61_spill] sm:$0xff]  ;;  %v8524_v13 = vld [vmem:[#allocation180_spill] sm:$0xff] }
 0x338   : > { %v1327_v4 = vpop.permute.xlu0 %1326  ;;  %v1529_v23 = vsel %vm1521_vm8, %v1496_v16, %v5108_v45  ;;  %v1331_v16 = vpop.permute.xlu2 %1330 }
 0x339   : > { %v1637_v35 = vsel %vm1620_vm11, %v1604_v10, %v1327_v4  ;;  %v1539_v10 = vsel %vm1521_vm8, %v1506_v37, %v5156_v31  ;;  %v1562_v4 = vsel %vm1554_vm10, %v1529_v23, %v5190_v12  ;;  %v8517_v31 = vld [vmem:[#allocation184_spill] sm:$0xff] }
 0x33a   : > { %3608 = vmatmul.msk.f32.gmra.mxu0 %vm1662_vm13, %v1627_v54  ;;  %3618 = vmatmul.msk.f32.vlgmr.msra.gmra.mxu2 %vm1662_vm13, %v1637_v35  ;;  %v1572_v54 = vsel %vm1554_vm10, %v1539_v10, %v5283_v6  ;;  %v1329_v35 = vpop.permute.xlu1 %1328  ;;  %v1595_v39 = vsel %vm1587_vm12, %v1562_v4, %v5382_v0  ;;  %v1398_v62 = vsel %vm225_vm0, %v8517_v31, %v8516_v32  ;;  %v3712_v12 = vld [vmem:[#allocation2 + $0xd8] sm:$0xff]  ;;  %v8530_v31 = vld [vmem:[#allocation150_spill] sm:$0xff] }
 0x33b   : > { %v1605_v41 = vsel %vm1587_vm12, %v1572_v54, %v5365_v38  ;;  %v1628_v57 = vsel %vm1620_vm11, %v1595_v39, %v5523_v33  ;;  %v1408_v6 = vsel %vm225_vm0, %v3712_v12, %v8518_v29  ;;  %v8519_v38 = vld [vmem:[#allocation121_spill] sm:$0xff]  ;;  %v1431_v33 = vsel %vm1422_vm6, %v1398_v62, %v8520_v63  ;;  %v8531_v62 = vld [vmem:[#allocation172_spill] sm:$0xff]  ;;  %v8532_v29 = vld [vmem:[#allocation182_spill] sm:$0xff] }
 0x33c   : > { %v1638_v45 = vsel %vm1620_vm11, %v1605_v41, %v1329_v35  ;;  %v1441_v0 = vsel %vm1422_vm6, %v1408_v6, %v8519_v38  ;;  %v1464_v3 = vsel %vm1455_vm7, %v1431_v33, %v8521_v40  ;;  %v8525_v41 = vld [vmem:[#allocation84_spill] sm:$0xff]  ;;  %v3713_v39 = vld [vmem:[#allocation2 + $0xe0] sm:$0xff] }
 0x33d   : > { %v1474_v51 = vsel %vm1455_vm7, %v1441_v0, %v8522_v22  ;;  %v1497_v30 = vsel %vm1488_vm9, %v1464_v3, %v8523_v8  ;;  %v3714_v8 = vld [vmem:[#allocation2 + $0xf0] sm:$0xff] }
 0x33e   : > { %v1507_v24 = vsel %vm1488_vm9, %v1474_v51, %v8524_v13  ;;  %v1530_v60 = vsel %vm1521_vm8, %v1497_v30, %v5118_v18  ;;  %v1399_v18 = vsel %vm225_vm0, %v5054_v52, %v8525_v41  ;;  %v3715_v13 = vld [vmem:[#allocation2 + $0x78] sm:$0xff] }
 0x33f   : > { %v1540_v37 = vsel %vm1521_vm8, %v1507_v24, %v5102_v5  ;;  %v1563_v23 = vsel %vm1554_vm10, %v1530_v60, %v5247_v55  ;;  %v8526_v55 = vld [vmem:[#allocation102_spill] sm:$0xff] }
 0x340   : > { %v1573_v10 = vsel %vm1554_vm10, %v1540_v37, %v5295_v44  ;;  %v1596_v4 = vsel %vm1587_vm12, %v1563_v23, %v5327_v28  ;;  %v8527_v28 = vld [vmem:[#allocation110_spill] sm:$0xff]  ;;  %v1333_v63 = vpop.permute.xlu0 %1332  ;;  %v8537_v37 = vld [vmem:[#allocation37_spill] sm:$0xff] }
 0x341   : > { %v1606_v54 = vsel %vm1587_vm12, %v1573_v10, %v5441_v17  ;;  %v1629_v35 = vsel %vm1620_vm11, %v1596_v4, %v5540_v58  ;;  %v1432_v44 = vsel %vm1422_vm6, %v1399_v18, %v8527_v28  ;;  %v8528_v17 = vld [vmem:[#allocation135_spill] sm:$0xff]  ;;  %v8539_v10 = vld [vmem:[#allocation81_spill] sm:$0xff] }
 0x342   : > { %3609 = vmatmul.msk.f32.gmra.mxu0 %vm1662_vm13, %v1628_v57  ;;  %3619 = vmatmul.msk.f32.gmra.mxu2 %vm1662_vm13, %v1638_v45  ;;  %v1639_v5 = vsel %vm1620_vm11, %v1606_v54, %v1331_v16  ;;  %v1409_v57 = vsel %vm225_vm0, %v3713_v39, %v8526_v55  ;;  %v8529_v45 = vld [vmem:[#allocation43_spill] sm:$0xff]  ;;  %v1465_v52 = vsel %vm1455_vm7, %v1432_v44, %v8530_v31  ;;  %v8538_v16 = vld [vmem:[#allocation160_spill] sm:$0xff]  ;;  %v8540_v54 = vld [vmem:[#allocation174_spill] sm:$0xff]  ;;  %v1335_v18 = vpop.permute.xlu1 %1334 }
 0x343   : > { %v1442_v58 = vsel %vm1422_vm6, %v1409_v57, %v8528_v17  ;;  %v1498_v12 = vsel %vm1488_vm9, %v1465_v52, %v8531_v62  ;;  %v3716_v17 = vld [vmem:[#allocation2 + $0x80] sm:$0xff]  ;;  %v8545_v31 = vld [vmem:[#allocation151_spill] sm:$0xff] }
 0x344   : > { %v1475_v32 = vsel %vm1455_vm7, %v1442_v58, %v8529_v45  ;;  %v1531_v38 = vsel %vm1521_vm8, %v1498_v12, %v5066_v50  ;;  %v3717_v45 = vld [vmem:[#allocation2 + $0xf8] sm:$0xff]  ;;  %v8546_v62 = vld [vmem:[#allocation55_spill] sm:$0xff] }
 0x345   : > { %v1508_v6 = vsel %vm1488_vm9, %v1475_v32, %v8532_v29  ;;  %v1564_v40 = vsel %vm1554_vm10, %v1531_v38, %v5257_v34  ;;  %v8535_v34 = vld [vmem:[#allocation126_spill] sm:$0xff]  ;;  %v8547_v29 = vld [vmem:[#allocation65_spill] sm:$0xff]  ;;  %v8548_v38 = vld [vmem:[#allocation183_spill] sm:$0xff] }
 0x346   : > { %v1541_v0 = vsel %vm1521_vm8, %v1508_v6, %v5158_v21  ;;  %v1597_v3 = vsel %vm1587_vm12, %v1564_v40, %v5387_v53  ;;  %v8533_v21 = vld [vmem:[#allocation82_spill] sm:$0xff]  ;;  %v1337_v40 = vpop.permute.xlu2 %1336 }
 0x347   : > { %v1574_v33 = vsel %vm1554_vm10, %v1541_v0, %v5240_v26  ;;  %v1630_v51 = vsel %vm1620_vm11, %v1597_v3, %v5544_v11  ;;  %v1410_v30 = vsel %vm225_vm0, %v3714_v8, %v8533_v21  ;;  %v8534_v26 = vld [vmem:[#allocation88_spill] sm:$0xff] }
 0x348   : > { %v1607_v22 = vsel %vm1587_vm12, %v1574_v33, %v5458_v25  ;;  %v1400_v24 = vsel %vm225_vm0, %v3715_v13, %v8534_v26  ;;  %v8536_v25 = vld [vmem:[#allocation137_spill] sm:$0xff]  ;;  %v3719_v26 = vld [vmem:[#allocation2 + $0x108] sm:$0xff] }
 0x349   : > { %v1640_v50 = vsel %vm1620_vm11, %v1607_v22, %v1333_v63  ;;  %v1433_v53 = vsel %vm1422_vm6, %v1400_v24, %v8535_v34  ;;  %v1443_v11 = vsel %vm1422_vm6, %v1410_v30, %v8536_v25  ;;  %v3718_v30 = vld [vmem:[#allocation2 + $0x90] sm:$0xff]  ;;  %v8553_v34 = vld [vmem:[#allocation138_spill] sm:$0xff] }
 0x34a   : > { %3610 = vmatmul.msk.f32.gmra.mxu0 %vm1662_vm13, %v1629_v35  ;;  %3620 = vmatmul.msk.f32.gmra.mxu2 %vm1662_vm13, %v1639_v5  ;;  %v1466_v60 = vsel %vm1455_vm7, %v1433_v53, %v8537_v37  ;;  %v1476_v23 = vsel %vm1455_vm7, %v1443_v11, %v8538_v16  ;;  %v8554_v53 = vld [vmem:[#allocation149_spill] sm:$0xff]  ;;  %v8555_v11 = vld [vmem:[#allocation152_spill] sm:$0xff] }
 0x34b   : > { %v1509_v4 = vsel %vm1488_vm9, %v1476_v23, %v8539_v10  ;;  %v1499_v35 = vsel %vm1488_vm9, %v1466_v60, %v8540_v54  ;;  %v8556_v60 = vld [vmem:[#allocation175_spill] sm:$0xff]  ;;  %v8557_v23 = vld [vmem:[#allocation188_spill] sm:$0xff] }
 0x34c   : > { %v1532_v5 = vsel %vm1521_vm8, %v1499_v35, %v5120_v47  ;;  %v1542_v41 = vsel %vm1521_vm8, %v1509_v4, %v5170_v43  ;;  %v8541_v43 = vld [vmem:[#allocation66_spill] sm:$0xff]  ;;  %v8558_v4 = vld [vmem:[#allocation195_spill] sm:$0xff] }
 0x34d   : > { %v1565_v39 = vsel %vm1554_vm10, %v1532_v5, %v5202_v7  ;;  %v1575_v55 = vsel %vm1554_vm10, %v1542_v41, %v5297_v42  ;;  %v1401_v58 = vsel %vm225_vm0, %v3716_v17, %v8541_v43  ;;  %v8542_v7 = vld [vmem:[#allocation103_spill] sm:$0xff]  ;;  %v8543_v42 = vld [vmem:[#allocation124_spill] sm:$0xff]  ;;  %v1339_v41 = vpop.permute.xlu0 %1338 }
 0x34e   : > { %v1608_v57 = vsel %vm1587_vm12, %v1575_v55, %v5378_v2  ;;  %v1598_v28 = vsel %vm1587_vm12, %v1565_v39, %v5408_v19  ;;  %v1411_v32 = vsel %vm225_vm0, %v3717_v45, %v8542_v7  ;;  %v8544_v2 = vld [vmem:[#allocation128_spill] sm:$0xff]  ;;  %v8559_v35 = vld [vmem:[#allocation203_spill] sm:$0xff]  ;;  %v8561_v55 = vld [vmem:[#allocation34_spill] sm:$0xff] }
 0x34f   : > { %v1631_v44 = vsel %vm1620_vm11, %v1598_v28, %v5546_v59  ;;  %v1641_v47 = vsel %vm1620_vm11, %v1608_v57, %v1335_v18  ;;  %v1444_v19 = vsel %vm1422_vm6, %v1411_v32, %v8543_v42  ;;  %v1434_v59 = vsel %vm1422_vm6, %v1401_v58, %v8544_v2  ;;  %v8560_v18 = vld [vmem:[#allocation42_spill] sm:$0xff]  ;;  %v8562_v28 = vld [vmem:[#allocation60_spill] sm:$0xff]  ;;  %v5812_v58 = vld [vmem:[%s7946_s2] ss:$0 sm:$0xff] }
 0x350   : > { %v1467_v52 = vsel %vm1455_vm7, %v1434_v59, %v8545_v31  ;;  %v1477_v12 = vsel %vm1455_vm7, %v1444_v19, %v8546_v62  ;;  %v3720_v45 = vld [vmem:[#allocation2 + $0x110] sm:$0xff]  ;;  %v3721_v42 = vld [vmem:[#allocation2 + $0x98] sm:$0xff]  ;;  %v8564_v19 = vld [vmem:[#allocation93_spill] sm:$0xff] }
 0x351   : > { %v1500_v6 = vsel %vm1488_vm9, %v1467_v52, %v8547_v29  ;;  %v1510_v0 = vsel %vm1488_vm9, %v1477_v12, %v8548_v38  ;;  %v8563_v7 = vld [vmem:[#allocation87_spill] sm:$0xff]  ;;  %v1403_v2 = vsel %vm225_vm0, %v3721_v42, %v8564_v19  ;;  %v8566_v59 = vld [vmem:[#allocation140_spill] sm:$0xff]  ;;  %v8567_v52 = vld [vmem:[#allocation33_spill] sm:$0xff] }
 0x352   : > { %3611 = vmatmul.msk.f32.gmra.mxu0 %vm1662_vm13, %v1630_v51  ;;  %3621 = vmatmul.msk.f32.gmra.mxu2 %vm1662_vm13, %v1640_v50  ;;  %v1543_v63 = vsel %vm1521_vm8, %v1510_v0, %v5114_v49  ;;  %v1533_v33 = vsel %vm1521_vm8, %v1500_v6, %v5130_v48  ;;  %v8549_v51 = vld [vmem:[#allocation50_spill] sm:$0xff]  ;;  %v8550_v48 = vld [vmem:[#allocation89_spill] sm:$0xff]  ;;  %v1413_v32 = vsel %vm225_vm0, %v3720_v45, %v8563_v7 }
 0x353   : > { %v1566_v3 = vsel %vm1554_vm10, %v1533_v33, %v5259_v15  ;;  %v1576_v22 = vsel %vm1554_vm10, %v1543_v63, %v5307_v36  ;;  %v1402_v13 = vsel %vm225_vm0, %v3718_v30, %v8550_v48  ;;  %v8551_v15 = vld [vmem:[#allocation105_spill] sm:$0xff]  ;;  %v1446_v31 = vsel %vm1422_vm6, %v1413_v32, %v8566_v59  ;;  %v8568_v12 = vld [vmem:[#allocation162_spill] sm:$0xff]  ;;  %v8574_v30 = vld [vmem:[#allocation44_spill] sm:$0xff]  ;;  %v1343_v32 = vpop.permute.xlu2 %1342 }
 0x354   : > { %v1599_v50 = vsel %vm1587_vm12, %v1566_v3, %v8549_v51  ;;  %v1609_v8 = vsel %vm1587_vm12, %v1576_v22, %v5461_v9  ;;  %v1412_v24 = vsel %vm225_vm0, %v3719_v26, %v8551_v15  ;;  %v8552_v36 = vld [vmem:[#allocation113_spill] sm:$0xff]  ;;  %v1479_v29 = vsel %vm1455_vm7, %v1446_v31, %v8568_v12  ;;  %v8571_v3 = vld [vmem:[#allocation199_spill] sm:$0xff]  ;;  %v8572_v51 = vld [vmem:[#allocation204_spill] sm:$0xff] }
 0x355   : > { %v1632_v21 = vsel %vm1620_vm11, %v1599_v50, %v5563_v46  ;;  %v1642_v49 = vsel %vm1620_vm11, %v1609_v8, %v1337_v40  ;;  %v1435_v9 = vsel %vm1422_vm6, %v1402_v13, %v8552_v36  ;;  %v1445_v46 = vsel %vm1422_vm6, %v1412_v24, %v8553_v34  ;;  %v8569_v38 = vld [vmem:[#allocation173_spill] sm:$0xff]  ;;  %v1341_v8 = vpop.permute.xlu1 %1340  ;;  %v8575_v26 = vld [vmem:[#allocation64_spill] sm:$0xff]  ;;  %v8576_v24 = vld [vmem:[#allocation75_spill] sm:$0xff] }
 0x356   : > { %v1478_v25 = vsel %vm1455_vm7, %v1445_v46, %v8554_v53  ;;  %v1468_v37 = vsel %vm1455_vm7, %v1435_v9, %v8555_v11  ;;  %v1512_v0 = vsel %vm1488_vm9, %v1479_v29, %v8569_v38  ;;  %v8570_v63 = vld [vmem:[#allocation177_spill] sm:$0xff]  ;;  %v3722_v46 = vld [vmem:[#allocation2 + $0xa8] sm:$0xff]  ;;  %v8577_v53 = vld [vmem:[#allocation71_spill] sm:$0xff] }
 0x357   : > { %v1501_v16 = vsel %vm1488_vm9, %v1468_v37, %v8556_v60  ;;  %v1511_v10 = vsel %vm1488_vm9, %v1478_v25, %v8557_v23  ;;  %v1545_v50 = vsel %vm1521_vm8, %v1512_v0, %v8572_v51  ;;  %v1404_v25 = vsel %vm225_vm0, %v3722_v46, %v8577_v53  ;;  %v3723_v11 = vld [vmem:[#allocation2 + $0x120] sm:$0xff]  ;;  %v8578_v37 = vld [vmem:[#allocation106_spill] sm:$0xff] }
 0x358   : > { %v1534_v54 = vsel %vm1521_vm8, %v1501_v16, %v8558_v4  ;;  %v1544_v5 = vsel %vm1521_vm8, %v1511_v10, %v8559_v35  ;;  %v1578_v48 = vsel %vm1554_vm10, %v1545_v50, %v8574_v30  ;;  %v1414_v60 = vsel %vm225_vm0, %v3723_v11, %v8578_v37  ;;  %v8579_v16 = vld [vmem:[#allocation127_spill] sm:$0xff]  ;;  %v8581_v4 = vld [vmem:[#allocation153_spill] sm:$0xff]  ;;  %v8582_v35 = vld [vmem:[#allocation58_spill] sm:$0xff] }
 0x359   : > { %v1577_v39 = vsel %vm1554_vm10, %v1544_v5, %v8560_v18  ;;  %v1567_v57 = vsel %vm1554_vm10, %v1534_v54, %v8561_v55  ;;  %v1611_v15 = vsel %vm1587_vm12, %v1578_v48, %v8575_v26  ;;  %v1447_v23 = vsel %vm1422_vm6, %v1414_v60, %v8579_v16  ;;  %v5865_v18 = vld [vmem:[#allocation2 + $0x8] sm:$0xff]  ;;  %v8586_v45 = vld [vmem:[#allocation201_spill] sm:$0xff]  ;;  %v8603_v37 = vld [vmem:[#allocation68_spill] sm:$0xff] }
 0x35a   : > { %3612 = vmatmul.msk.f32.gmra.mxu0 %vm1662_vm13, %v1631_v44  ;;  %3622 = vmatmul.msk.f32.gmra.mxu2 %vm1662_vm13, %v1641_v47  ;;  %v1600_v44 = vsel %vm1587_vm12, %v1567_v57, %v8562_v28  ;;  %v1610_v47 = vsel %vm1587_vm12, %v1577_v39, %v5463_v20  ;;  %v8565_v20 = vld [vmem:[#allocation129_spill] sm:$0xff]  ;;  %v1644_v34 = vsel %vm1620_vm11, %v1611_v15, %v1341_v8  ;;  %v8583_v39 = vld [vmem:[#allocation70_spill] sm:$0xff]  ;;  %v8604_v16 = vld [vmem:[#allocation91_spill] sm:$0xff] }
 0x35b   : > { %v1633_v17 = vsel %vm1620_vm11, %v1600_v44, %v5575_v61  ;;  %v1643_v43 = vsel %vm1620_vm11, %v1610_v47, %v1339_v41  ;;  %v1436_v61 = vsel %vm1422_vm6, %v1403_v2, %v8565_v20  ;;  %v1480_v5 = vsel %vm1455_vm7, %v1447_v23, %v8582_v35  ;;  %v5863_v41 = vld [vmem:[#allocation2] sm:$0xff]  ;;  %v8588_v2 = vld [vmem:[#allocation51_spill] sm:$0xff]  ;;  %v8591_v38 = vld [vmem:[#allocation94_spill] sm:$0xff] }
 0x35c   : > { %v1469_v62 = vsel %vm1455_vm7, %v1436_v61, %v8567_v52  ;;  %v8584_v57 = vld [vmem:[#allocation189_spill] sm:$0xff]  ;;  %v2042_v44 = vrot.slane %v5863_v41, 1  ;;  %v2043_v47 = vrot.slane %v5865_v18, 1  ;;  %v8590_v52 = vld [vmem:[#allocation86_spill] sm:$0xff] }
 0x35d   : > { %v1502_v33 = vsel %vm1488_vm9, %v1469_v62, %v8570_v63  ;;  %v1513_v28 = vsel %vm1488_vm9, %v1480_v5, %v8584_v57  ;;  %v8587_v42 = vld [vmem:[#allocation45_spill] sm:$0xff]  ;;  %v3725_v63 = vld [vmem:[#allocation2 + $0x128] sm:$0xff] }
 0x35e   : > { %v1535_v22 = vsel %vm1521_vm8, %v1502_v33, %v8571_v3  ;;  %v2044_v61 = vsel %vm434_vm2, %v2042_v44, %v2043_v47  ;;  %v8589_v59 = vld [vmem:[#allocation157_spill] sm:$0xff]  ;;  %v8592_v33 = vld [vmem:[#allocation108_spill] sm:$0xff]  ;;  %v8597_v30 = vld [vmem:[#allocation178_spill] sm:$0xff] }
 0x35f   : > { %2228 = vrot.lane.b32.xlu1 %v2044_v61, %s3770_s24  ;;  %v8593_v3 = vld [vmem:[#allocation116_spill] sm:$0xff]  ;;  %v8594_v51 = vld [vmem:[#allocation141_spill] sm:$0xff]  ;;  %v8601_v46 = vld [vmem:[#allocation46_spill] sm:$0xff] }
 0x360   : > { %v8595_v50 = vld [vmem:[#allocation49_spill] sm:$0xff]  ;;  %v8606_v5 = vld [vmem:[#allocation22_spill] sm:$0xff]  ;;  %v8608_v44 = vld [vmem:[#allocation176_spill] sm:$0xff] }
 0x361   : > { %v8599_v15 = vld [vmem:[#allocation197_spill] sm:$0xff] }
 0x362   : > { %3613 = vmatmul.msk.f32.gmra.mxu0 %vm1662_vm13, %v1632_v21  ;;  %3623 = vmatmul.msk.f32.gmra.mxu2 %vm1662_vm13, %v1642_v49  ;;  %v8573_v21 = vld [vmem:[#allocation210_spill] sm:$0xff] }
 0x363   : > { %v1568_v49 = vsel %vm1554_vm10, %v1535_v22, %v8573_v21  ;;  %v8596_v21 = vld [vmem:[#allocation155_spill] sm:$0xff] }
 0x364   : > { %v1601_v36 = vsel %vm1587_vm12, %v1568_v49, %v8576_v24 }
 0x365   : > { %v1634_v9 = vsel %vm1620_vm11, %v1601_v36, %v5567_v27  ;;  %v8580_v27 = vld [vmem:[#allocation131_spill] sm:$0xff]  ;;  %v8600_v36 = vld [vmem:[#allocation205_spill] sm:$0xff] }
 0x366   : > { %v1437_v10 = vsel %vm1422_vm6, %v1404_v25, %v8580_v27  ;;  %v8602_v25 = vld [vmem:[#allocation48_spill] sm:$0xff] }
 0x367   : > { %v1470_v54 = vsel %vm1455_vm7, %v1437_v10, %v8581_v4  ;;  %v3726_v4 = vld [vmem:[#allocation2 + $0x138] sm:$0xff] }
 0x368   : > { %v1503_v55 = vsel %vm1488_vm9, %v1470_v54, %v8583_v39  ;;  %v8605_v54 = vld [vmem:[#allocation92_spill] sm:$0xff] }
 0x369   : > { %v1536_v7 = vsel %vm1521_vm8, %v1503_v55, %v8586_v45  ;;  %v1416_v35 = vsel %vm225_vm0, %v3726_v4, %v8605_v54  ;;  %v8607_v55 = vld [vmem:[#allocation164_spill] sm:$0xff]  ;;  %v8626_v54 = vld [vmem:[#allocation97_spill] sm:$0xff] }
 0x36a   : > { %3614 = vmatmul.msk.f32.gmra.mxu0 %vm1662_vm13, %v1633_v17  ;;  %3624 = vmatmul.msk.f32.gmra.mxu2 %vm1662_vm13, %v1643_v43  ;;  %v8585_v17 = vld [vmem:[#allocation198_spill] sm:$0xff]  ;;  %v1569_v19 = vsel %vm1554_vm10, %v1536_v7, %v8587_v42  ;;  %v1449_v39 = vsel %vm1422_vm6, %v1416_v35, %v8606_v5  ;;  %v1347_v7 = vpop.permute.xlu1 %1346  ;;  %v3729_v4 = vld [vmem:[#allocation2 + $0x158] sm:$0xff] }
 0x36b   : > { %v1546_v43 = vsel %vm1521_vm8, %v1513_v28, %v8585_v17  ;;  %v1602_v31 = vsel %vm1587_vm12, %v1569_v19, %v8589_v59  ;;  %v1482_v57 = vsel %vm1455_vm7, %v1449_v39, %v8607_v55  ;;  %v5931_v28 = vld [vmem:[#allocation2 + $0x10] sm:$0x3]  ;;  %v3727_v59 = vld [vmem:[#allocation2 + $0x140] sm:$0xff]  ;;  %v1419_v35 = vsel %vm225_vm0, %v3729_v4, %v8626_v54 }
 0x36c   : > { %v1780_v6 = vpop.f32.mrf.mxu0  ;;  %v1579_v20 = vsel %vm1554_vm10, %v1546_v43, %v8588_v2  ;;  %v1635_v12 = vsel %vm1620_vm11, %v1602_v31, %v5598_v14  ;;  %v2045_v17 = vrot.slane %v5931_v28, 1  ;;  %v8609_v43 = vld [vmem:[#allocation206_spill] sm:$0xff]  ;;  %v8611_v2 = vld [vmem:[#allocation69_spill] sm:$0xff]  ;;  %v8627_v39 = vld [vmem:[#allocation27_spill] sm:$0xff] }
 0x36d   : > { %v1781_v40 = vadd.f32 %v5812_v58, %v1780_v6  ;;  %v1612_v62 = vsel %vm1587_vm12, %v1579_v20, %v8590_v52  ;;  %v3724_v6 = vld [vmem:[#allocation2 + $0xb0] sm:$0xff]  ;;  %v8612_v31 = vld [vmem:[#allocation109_spill] sm:$0xff]  ;;  %v1452_v55 = vsel %vm1422_vm6, %v1419_v35, %v8627_v39 }
 0x36e   : > { %v1645_v29 = vsel %vm1620_vm11, %v1612_v62, %v1343_v32  ;;  %v1405_v0 = vsel %vm225_vm0, %v3724_v6, %v8591_v38  ;;  %v8610_v32 = vld [vmem:[#allocation54_spill] sm:$0xff]  ;;  %v2046_v19 = vsel %vm434_vm2, %v2043_v47, %v2045_v17  ;;  %v1417_v52 = vsel %vm225_vm0, %v3727_v59, %v8612_v31  ;;  %v8615_v47 = vld [vmem:[#allocation192_spill] sm:$0xff]  ;;  %v8631_v31 = vld [vmem:[#allocation53_spill] sm:$0xff] }
 0x36f   : > { %v1876_v13 = vmax.f32 %v1781_v40, 0.0  ;;  %v1415_v40 = vsel %vm225_vm0, %v3725_v63, %v8592_v33  ;;  %v1438_v22 = vsel %vm1422_vm6, %v1405_v0, %v8593_v3  ;;  %2230 = vrot.lane.b32.xlu2 %v2046_v19, %s3770_s24  ;;  %v8613_v62 = vld [vmem:[#allocation130_spill] sm:$0xff]  ;;  %v8616_v0 = vld [vmem:[#allocation200_spill] sm:$0xff]  ;;  %v1349_v33 = vpop.permute.xlu2 %1348 }
 0x370   : > { %v1448_v14 = vsel %vm1422_vm6, %v1415_v40, %v8594_v51  ;;  %v1471_v49 = vsel %vm1455_vm7, %v1438_v22, %v8596_v21  ;;  %v8617_v40 = vld [vmem:[#allocation47_spill] sm:$0xff]  ;;  %v8618_v51 = vld [vmem:[#allocation85_spill] sm:$0xff]  ;;  %v8630_v19 = vld [vmem:[#allocation208_spill] sm:$0xff] }
 0x371   : > { %1908 = vst.msk [vmem:[#allocation2 + $0x19] sm:$0xff] %vm225_vm0, %v1876_v13  ;;  %v1481_v8 = vsel %vm1455_vm7, %v1448_v14, %v8595_v50  ;;  %v1504_v48 = vsel %vm1488_vm9, %v1471_v49, %v8597_v30  ;;  %v8598_v13 = vld [vmem:[#allocation191_spill] sm:$0xff] }
 0x372   : > { %3615 = vmatmul.msk.f32.gmra.mxu0 %vm1662_vm13, %v1634_v9  ;;  %3625 = vmatmul.msk.f32.gmra.mxu2 %vm1662_vm13, %v1644_v34  ;;  %v1514_v26 = vsel %vm1488_vm9, %v1481_v8, %v8598_v13  ;;  %v1537_v24 = vsel %vm1521_vm8, %v1504_v48, %v8599_v15  ;;  %v1345_v34 = vpop.permute.xlu0 %1344  ;;  %v3728_v21 = vld [vmem:[#allocation2 + $0x150] sm:$0xff]  ;;  %v8621_v15 = vld [vmem:[#allocation154_spill] sm:$0xff] }
 0x373   : > { %v1547_v9 = vsel %vm1521_vm8, %v1514_v26, %v8600_v36  ;;  %v1570_v11 = vsel %vm1554_vm10, %v1537_v24, %v8602_v25  ;;  %v8619_v49 = vld [vmem:[#allocation111_spill] sm:$0xff]  ;;  %v8622_v36 = vld [vmem:[#allocation193_spill] sm:$0xff] }
 0x374   : > { %v1580_v53 = vsel %vm1554_vm10, %v1547_v9, %v8601_v46  ;;  %v1603_v60 = vsel %vm1587_vm12, %v1570_v11, %v8603_v37  ;;  %v1418_v30 = vsel %vm225_vm0, %v3728_v21, %v8619_v49  ;;  %v8620_v13 = vld [vmem:[#allocation143_spill] sm:$0xff]  ;;  %v8624_v25 = vld [vmem:[#allocation41_spill] sm:$0xff] }
 0x375   : > { %v1613_v23 = vsel %vm1587_vm12, %v1580_v53, %v8604_v16  ;;  %v1636_v27 = vsel %vm1620_vm11, %v1603_v60, %v5621_v1  ;;  %v1515_v1 = vsel %vm1488_vm9, %v1482_v57, %v8608_v44  ;;  %v1451_v26 = vsel %vm1422_vm6, %v1418_v30, %v8620_v13  ;;  %v8625_v60 = vld [vmem:[#allocation96_spill] sm:$0xff]  ;;  %v8638_v30 = vld [vmem:[#allocation57_spill] sm:$0xff] }
 0x376   : > { %v1646_v10 = vsel %vm1620_vm11, %v1613_v23, %v1345_v34  ;;  %v1548_v45 = vsel %vm1521_vm8, %v1515_v1, %v8609_v43  ;;  %v1484_v24 = vsel %vm1455_vm7, %v1451_v26, %v8621_v15  ;;  %v8623_v34 = vld [vmem:[#allocation207_spill] sm:$0xff]  ;;  %v8628_v1 = vld [vmem:[#allocation166_spill] sm:$0xff] }
 0x377   : > { %v1581_v42 = vsel %vm1554_vm10, %v1548_v45, %v8610_v32  ;;  %v1517_v9 = vsel %vm1488_vm9, %v1484_v24, %v8622_v36  ;;  %v1485_v17 = vsel %vm1455_vm7, %v1452_v55, %v8628_v1  ;;  %v8629_v32 = vld [vmem:[#allocation179_spill] sm:$0xff]  ;;  %v1355_v49 = vpop.permute.xlu2 %1354  ;;  %v8639_v26 = vld [vmem:[#allocation90_spill] sm:$0xff]  ;;  %v8644_v55 = vld [vmem:[#allocation209_spill] sm:$0xff] }
 0x378   : > { %v1614_v20 = vsel %vm1587_vm12, %v1581_v42, %v8611_v2  ;;  %v1550_v46 = vsel %vm1521_vm8, %v1517_v9, %v8623_v34  ;;  %v1518_v42 = vsel %vm1488_vm9, %v1485_v17, %v8629_v32  ;;  %v3731_v34 = vld [vmem:[#allocation2 + $0x170] sm:$0xff] }
 0x379   : > { %v1647_v61 = vsel %vm1620_vm11, %v1614_v20, %v1347_v7  ;;  %v1583_v11 = vsel %vm1554_vm10, %v1550_v46, %v8624_v25  ;;  %v1551_v2 = vsel %vm1521_vm8, %v1518_v42, %v8630_v19  ;;  %v1353_v20 = vpop.permute.xlu1 %1352  ;;  %v8640_v46 = vld [vmem:[#allocation114_spill] sm:$0xff] }
 0x37a   : > { %3616 = vmatmul.msk.f32.gmra.mxu0 %vm1662_vm13, %v1635_v12  ;;  %3626 = vmatmul.msk.f32.gmra.mxu2 %vm1662_vm13, %v1645_v29  ;;  %v1450_v12 = vsel %vm1422_vm6, %v1417_v52, %v8613_v62  ;;  %v8614_v29 = vld [vmem:[#allocation165_spill] sm:$0xff]  ;;  %v1351_v53 = vpop.permute.xlu0 %1350  ;;  %v1616_v16 = vsel %vm1587_vm12, %v1583_v11, %v8625_v60  ;;  %v1584_v52 = vsel %vm1554_vm10, %v1551_v2, %v8631_v31  ;;  %v8641_v11 = vld [vmem:[#allocation24_spill] sm:$0xff] }
 0x37b   : > { %v1483_v6 = vsel %vm1455_vm7, %v1450_v12, %v8614_v29  ;;  %v8632_v12 = vld [vmem:[#allocation80_spill] sm:$0xff] }
 0x37c   : > { %v1516_v38 = vsel %vm1488_vm9, %v1483_v6, %v8615_v47  ;;  %v1617_v29 = vsel %vm1587_vm12, %v1584_v52, %v8632_v12 }
 0x37d   : > { %v1549_v63 = vsel %vm1521_vm8, %v1516_v38, %v8616_v0  ;;  %v1650_v47 = vsel %vm1620_vm11, %v1617_v29, %v1353_v20  ;;  %v3730_v38 = vld [vmem:[#allocation2 + $0x168] sm:$0xff]  ;;  %v8633_v0 = vld [vmem:[#allocation112_spill] sm:$0xff] }
 0x37e   : > { %v1582_v3 = vsel %vm1554_vm10, %v1549_v63, %v8617_v40  ;;  %v1420_v63 = vsel %vm225_vm0, %v3730_v38, %v8633_v0  ;;  %v8634_v40 = vld [vmem:[#allocation133_spill] sm:$0xff] }
 0x37f   : > { %v1615_v14 = vsel %vm1587_vm12, %v1582_v3, %v8618_v51  ;;  %v1453_v3 = vsel %vm1422_vm6, %v1420_v63, %v8634_v40 }
 0x380   : > { %v1648_v8 = vsel %vm1620_vm11, %v1615_v14, %v1349_v33  ;;  %v8636_v14 = vld [vmem:[#allocation194_spill] sm:$0xff] }
 0x382   : > { %3617 = vmatmul.msk.f32.gmra.mxu0 %vm1662_vm13, %v1636_v27  ;;  %3627 = vmatmul.msk.f32.gmra.mxu2 %vm1662_vm13, %v1646_v10  ;;  %v1649_v27 = vsel %vm1620_vm11, %v1616_v16, %v1351_v53  ;;  %v5980_v10 = vld [vmem:[#allocation2 + $0x18] sm:$0xff]  ;;  %v1421_v53 = vsel %vm225_vm0, %v3731_v34, %v8640_v46  ;;  %v1357_v17 = vpop.permute.xlu0 %1356 }
 0x383   : > { %v2047_v7 = vrot.slane %v5980_v10, 1 }
 0x38a   : > { %3628 = vmatmul.msk.f32.gmra.mxu2 %vm1662_vm13, %v1647_v61 }
 0x38f   : > { %v1783_v22 = vpop.f32.mrf.mxu0 }
 0x390   : > { %v1784_v50 = vadd.f32 %v5812_v58, %v1783_v22  ;;  %v8635_v22 = vld [vmem:[#allocation63_spill] sm:$0xff] }
 0x391   : > { %v1486_v51 = vsel %vm1455_vm7, %v1453_v3, %v8635_v22 }
 0x392   : > { %v1877_v48 = vmax.f32 %v1784_v50, 0.0  ;;  %3629 = vmatmul.msk.f32.gmra.mxu2 %vm1662_vm13, %v1648_v8  ;;  %v1519_v50 = vsel %vm1488_vm9, %v1486_v51, %v8636_v14  ;;  %v8637_v8 = vld [vmem:[#allocation202_spill] sm:$0xff] }
 0x393   : > { %v1552_v21 = vsel %vm1521_vm8, %v1519_v50, %v8637_v8 }
 0x394   : > { %1909 = vst.msk [vmem:[#allocation2 + $0x21] sm:$0xff] %vm225_vm0, %v1877_v48  ;;  %v1585_v48 = vsel %vm1554_vm10, %v1552_v21, %v8638_v30 }
 0x395   : > { %v1618_v15 = vsel %vm1587_vm12, %v1585_v48, %v8639_v26 }
 0x396   : > { %v1651_v36 = vsel %vm1620_vm11, %v1618_v15, %v1355_v49 }
 0x397   : > { %v1786_v37 = vpop.f32.mrf.mxu0 }
 0x398   : > { %v1787_v23 = vadd.f32 %v5812_v58, %v1786_v37  ;;  %v1454_v37 = vsel %vm1422_vm6, %v1421_v53, %v8641_v11 }
 0x39a   : > { %v1878_v5 = vmax.f32 %v1787_v23, 0.0  ;;  %3630 = vmatmul.msk.f32.gmra.mxu2 %vm1662_vm13, %v1649_v27  ;;  %v8642_v23 = vld [vmem:[#allocation158_spill] sm:$0xff] }
 0x39b   : > { %v5987_v57 = vld [vmem:[#allocation2 + $0x20] sm:$0xff]  ;;  %v5989_v44 = vld [vmem:[#allocation2 + $0x28] sm:$0x3]  ;;  %v1487_v27 = vsel %vm1455_vm7, %v1454_v37, %v8642_v23 }
 0x39c   : > { %1910 = vst.msk [vmem:[#allocation2 + $0x31] sm:$0xff] %vm225_vm0, %v1878_v5  ;;  %v2048_v43 = vrot.slane %v5987_v57, 1  ;;  %v2050_v45 = vrot.slane %v5989_v44, 1  ;;  %v8643_v5 = vld [vmem:[#allocation196_spill] sm:$0xff] }
 0x39d   : > { %v1520_v39 = vsel %vm1488_vm9, %v1487_v27, %v8643_v5 }
 0x39e   : > { %v6002_v61 = vsel %vm434_vm2, %v2048_v43, %v2050_v45  ;;  %v6005_v59 = vsel %vm434_vm2, %v2047_v7, %v2048_v43  ;;  %v1553_v1 = vsel %vm1521_vm8, %v1520_v39, %v8644_v55  ;;  %v8645_v7 = vld [vmem:[#allocation52_spill] sm:$0xff] }
 0x39f   : > { %2234 = vrot.lane.b32.xlu1 %v6002_v61, %s3770_s24  ;;  %2232 = vrot.lane.b32.xlu0 %v6005_v59, %s3770_s24  ;;  %v1789_v62 = vpop.f32.mrf.mxu0  ;;  %v1586_v32 = vsel %vm1554_vm10, %v1553_v1, %v8645_v7 }
 0x3a0   : > { %v1790_v6 = vadd.f32 %v5812_v58, %v1789_v62  ;;  %v1619_v19 = vsel %vm1587_vm12, %v1586_v32, %v5487_v56 }
 0x3a1   : > { %v1652_v20 = vsel %vm1620_vm11, %v1619_v19, %v1357_v17 }
 0x3a2   : > { %v1879_v33 = vmax.f32 %v1790_v6, 0.0  ;;  %3631 = vmatmul.msk.f32.gmra.mxu2 %vm1662_vm13, %v1650_v47 }
 0x3a3   : > { %v6035_v9 = vld [vmem:[#allocation2 + $0x30] sm:$0xff] }
 0x3a4   : > { %1911 = vst.msk [vmem:[#allocation2 + $0x39] sm:$0xff] %vm225_vm0, %v1879_v33  ;;  %v2052_v35 = vrot.slane %v6035_v9, 1 }
 0x3a7   : > { %v1792_v13 = vpop.f32.mrf.mxu0 }
 0x3a8   : > { %v1793_v24 = vadd.f32 %v5812_v58, %v1792_v13 }
 0x3aa   : > { %v1880_v25 = vmax.f32 %v1793_v24, 0.0  ;;  %3632 = vmatmul.msk.f32.gmra.mxu2 %vm1662_vm13, %v1651_v36 }
 0x3ab   : > { %v6042_v60 = vld [vmem:[#allocation2 + $0x38] sm:$0xff]  ;;  %v6044_v16 = vld [vmem:[#allocation2 + $0x40] sm:$0x3] }
 0x3ac   : > { %1912 = vst.msk [vmem:[#allocation2 + $0x49] sm:$0xff] %vm225_vm0, %v1880_v25  ;;  %v2053_v4 = vrot.slane %v6042_v60, 1  ;;  %v2055_v54 = vrot.slane %v6044_v16, 1 }
 0x3ae   : > { %v6057_v43 = vsel %vm434_vm2, %v2053_v4, %v2055_v54  ;;  %v6060_v45 = vsel %vm434_vm2, %v2052_v35, %v2053_v4 }
 0x3af   : > { %2238 = vrot.lane.b32.xlu0 %v6057_v43, %s3770_s24  ;;  %2236 = vrot.lane.b32.xlu2 %v6060_v45, %s3770_s24  ;;  %v1795_v42 = vpop.f32.mrf.mxu0 }
 0x3b0   : > { %v1796_v2 = vadd.f32 %v5812_v58, %v1795_v42 }
 0x3b2   : > { %v1881_v31 = vmax.f32 %v1796_v2, 0.0  ;;  %3633 = vmatmul.msk.f32.gmra.mxu2 %vm1662_vm13, %v1652_v20 }
 0x3b3   : > { %v6075_v12 = vld [vmem:[#allocation2 + $0x48] sm:$0xff] }
 0x3b4   : > { %1913 = vst.msk [vmem:[#allocation2 + $0x51] sm:$0xff] %vm225_vm0, %v1881_v31  ;;  %v2057_v0 = vrot.slane %v6075_v12, 1 }
 0x3b7   : > { %v1798_v52 = vpop.f32.mrf.mxu0 }
 0x3b8   : > { %v1799_v62 = vadd.f32 %v5812_v58, %v1798_v52 }
 0x3ba   : > { %v1882_v29 = vmax.f32 %v1799_v62, 0.0 }
 0x3bb   : > { %v6077_v6 = vld [vmem:[#allocation2 + $0x50] sm:$0xff]  ;;  %v6079_v47 = vld [vmem:[#allocation2 + $0x58] sm:$0x3] }
 0x3bc   : > { %1914 = vst.msk [vmem:[#allocation2 + $0x61] sm:$0xff] %vm225_vm0, %v1882_v29  ;;  %v2058_v56 = vrot.slane %v6077_v6, 1  ;;  %v2060_v38 = vrot.slane %v6079_v47, 1 }
 0x3bd   : > { %v1828_v63 = vpop.f32.mrf.mxu2 }
 0x3be   : > { %v1829_v33 = vadd.f32 %v5812_v58, %v1828_v63  ;;  %v6087_v40 = vsel %vm434_vm2, %v2058_v56, %v2060_v38  ;;  %v6090_v3 = vsel %vm434_vm2, %v2057_v0, %v2058_v56 }
 0x3bf   : > { %8646 = vst [vmem:[#allocation100_spill] sm:$0xff] %v6090_v3  ;;  %v1801_v22 = vpop.f32.mrf.mxu0  ;;  %2242 = vrot.lane.b32.xlu2 %v6087_v40, %s3770_s24  ;;  %2240 = vrot.lane.b32.xlu1 %v6090_v3, %s3770_s24  ;;  %v2128_v3 = vrot.slane %v5987_v57, 2 }
 0x3c0   : > { %v1892_v51 = vmax.f32 %v1829_v33, 0.0  ;;  %v1802_v14 = vadd.f32 %v5812_v58, %v1801_v22 }
 0x3c2   : > { %1924 = vst.msk [vmem:[#allocation2 + $0xd9] sm:$0xff] %vm225_vm0, %v1892_v51  ;;  %v1883_v50 = vmax.f32 %v1802_v14, 0.0 }
 0x3c3   : > { %v6101_v13 = vld [vmem:[#allocation2 + $0x60] sm:$0xff] }
 0x3c4   : > { %1915 = vst.msk [vmem:[#allocation2 + $0x69] sm:$0xff] %vm225_vm0, %v1883_v50  ;;  %v2062_v36 = vrot.slane %v6101_v13, 1 }
 0x3c5   : > { %v1831_v8 = vpop.f32.mrf.mxu2 }
 0x3c6   : > { %v1832_v21 = vadd.f32 %v5812_v58, %v1831_v8 }
 0x3c7   : > { %v1804_v49 = vpop.f32.mrf.mxu0 }
 0x3c8   : > { %v1893_v30 = vmax.f32 %v1832_v21, 0.0  ;;  %v1805_v48 = vadd.f32 %v5812_v58, %v1804_v49 }
 0x3ca   : > { %1925 = vst.msk [vmem:[#allocation2 + $0xe1] sm:$0xff] %vm225_vm0, %v1893_v30  ;;  %v1884_v26 = vmax.f32 %v1805_v48, 0.0 }
 0x3cb   : > { %v6104_v15 = vld [vmem:[#allocation2 + $0x68] sm:$0xff]  ;;  %v6106_v24 = vld [vmem:[#allocation2 + $0x70] sm:$0x3] }
 0x3cc   : > { %1916 = vst.msk [vmem:[#allocation2 + $0x79] sm:$0xff] %vm225_vm0, %v1884_v26  ;;  %v2063_v34 = vrot.slane %v6104_v15, 1  ;;  %v2065_v46 = vrot.slane %v6106_v24, 1 }
 0x3cd   : > { %v1834_v53 = vpop.f32.mrf.mxu2 }
 0x3ce   : > { %v1835_v25 = vadd.f32 %v5812_v58, %v1834_v53  ;;  %v6114_v11 = vsel %vm434_vm2, %v2062_v36, %v2063_v34  ;;  %v6117_v37 = vsel %vm434_vm2, %v2063_v34, %v2065_v46 }
 0x3cf   : > { %8647 = vst [vmem:[#allocation67_spill] sm:$0xff] %v6114_v11  ;;  %2244 = vrot.lane.b32.xlu0 %v6114_v11, %s3770_s24  ;;  %2246 = vrot.lane.b32.xlu1 %v6117_v37, %s3770_s24  ;;  %v1807_v23 = vpop.f32.mrf.mxu0 }
 0x3d0   : > { %8648 = vst [vmem:[#allocation101_spill] sm:$0xff] %v6117_v37  ;;  %v1894_v27 = vmax.f32 %v1835_v25, 0.0  ;;  %v1808_v4 = vadd.f32 %v5812_v58, %v1807_v23  ;;  %v2122_v37 = vrot.slane %v5863_v41, 2 }
 0x3d2   : > { %1926 = vst.msk [vmem:[#allocation2 + $0xf1] sm:$0xff] %vm225_vm0, %v1894_v27  ;;  %v1885_v54 = vmax.f32 %v1808_v4, 0.0 }
 0x3d3   : > { %v6128_v17 = vld [vmem:[#allocation2 + $0x78] sm:$0xff] }
 0x3d4   : > { %1917 = vst.msk [vmem:[#allocation2 + $0x81] sm:$0xff] %vm225_vm0, %v1885_v54  ;;  %v2067_v20 = vrot.slane %v6128_v17, 1 }
 0x3d5   : > { %v1837_v35 = vpop.f32.mrf.mxu2 }
 0x3d6   : > { %v1838_v5 = vadd.f32 %v5812_v58, %v1837_v35 }
 0x3d7   : > { %v1810_v39 = vpop.f32.mrf.mxu0 }
 0x3d8   : > { %v1895_v55 = vmax.f32 %v1838_v5, 0.0  ;;  %v1811_v1 = vadd.f32 %v5812_v58, %v1810_v39 }
 0x3da   : > { %1927 = vst.msk [vmem:[#allocation2 + $0xf9] sm:$0xff] %vm225_vm0, %v1895_v55  ;;  %v1886_v7 = vmax.f32 %v1811_v1, 0.0 }
 0x3db   : > { %v6131_v32 = vld [vmem:[#allocation2 + $0x80] sm:$0xff]  ;;  %v6133_v42 = vld [vmem:[#allocation2 + $0x88] sm:$0x3] }
 0x3dc   : > { %1918 = vst.msk [vmem:[#allocation2 + $0x91] sm:$0xff] %vm225_vm0, %v1886_v7  ;;  %v2068_v19 = vrot.slane %v6131_v32, 1  ;;  %v2070_v2 = vrot.slane %v6133_v42, 1 }
 0x3dd   : > { %v1840_v31 = vpop.f32.mrf.mxu2 }
 0x3de   : > { %v1841_v52 = vadd.f32 %v5812_v58, %v1840_v31  ;;  %v6141_v62 = vsel %vm434_vm2, %v2068_v19, %v2070_v2  ;;  %v6144_v29 = vsel %vm434_vm2, %v2067_v20, %v2068_v19 }
 0x3df   : > { %8649 = vst [vmem:[#allocation30_spill] sm:$0xff] %v6141_v62  ;;  %2250 = vrot.lane.b32.xlu0 %v6141_v62, %s3770_s24  ;;  %2248 = vrot.lane.b32.xlu2 %v6144_v29, %s3770_s24  ;;  %v1813_v56 = vpop.f32.mrf.mxu0 }
 0x3e0   : > { %8650 = vst [vmem:[#allocation167_spill] sm:$0xff] %v6144_v29  ;;  %v1896_v38 = vmax.f32 %v1841_v52, 0.0  ;;  %v1814_v0 = vadd.f32 %v5812_v58, %v1813_v56  ;;  %v2123_v29 = vrot.slane %v5865_v18, 2 }
 0x3e2   : > { %1928 = vst.msk [vmem:[#allocation2 + $0x109] sm:$0xff] %vm225_vm0, %v1896_v38  ;;  %v1887_v63 = vmax.f32 %v1814_v0, 0.0 }
 0x3e3   : > { %v6155_v8 = vld [vmem:[#allocation2 + $0x90] sm:$0xff] }
 0x3e4   : > { %1919 = vst.msk [vmem:[#allocation2 + $0x99] sm:$0xff] %vm225_vm0, %v1887_v63  ;;  %v2072_v36 = vrot.slane %v6155_v8, 1 }
 0x3e5   : > { %v1843_v33 = vpop.f32.mrf.mxu2 }
 0x3e6   : > { %v1844_v22 = vadd.f32 %v5812_v58, %v1843_v33 }
 0x3e7   : > { %v1816_v51 = vpop.f32.mrf.mxu0 }
 0x3e8   : > { %v1897_v14 = vmax.f32 %v1844_v22, 0.0  ;;  %v1817_v50 = vadd.f32 %v5812_v58, %v1816_v51  ;;  %v6204_v51 = vld [vmem:[#allocation2 + $0xe0] sm:$0xff] }
 0x3ea   : > { %1929 = vst.msk [vmem:[#allocation2 + $0x111] sm:$0xff] %vm225_vm0, %v1897_v14  ;;  %v1888_v21 = vmax.f32 %v1817_v50, 0.0 }
 0x3eb   : > { %v6158_v49 = vld [vmem:[#allocation2 + $0x98] sm:$0xff]  ;;  %v6160_v30 = vld [vmem:[#allocation2 + $0xa0] sm:$0x3] }
 0x3ec   : > { %1920 = vst.msk [vmem:[#allocation2 + $0xa9] sm:$0xff] %vm225_vm0, %v1888_v21  ;;  %v2073_v48 = vrot.slane %v6158_v49, 1  ;;  %v2075_v26 = vrot.slane %v6160_v30, 1  ;;  %v6207_v21 = vld [vmem:[#allocation2 + $0xd8] sm:$0xff] }
 0x3ed   : > { %v1846_v34 = vpop.f32.mrf.mxu2 }
 0x3ee   : > { %v1847_v46 = vadd.f32 %v5812_v58, %v1846_v34  ;;  %v6168_v53 = vsel %vm434_vm2, %v2073_v48, %v2075_v26  ;;  %v6171_v25 = vsel %vm434_vm2, %v2072_v36, %v2073_v48  ;;  %v2088_v26 = vrot.slane %v6204_v51, 1 }
 0x3ef   : > { %8651 = vst [vmem:[#allocation73_spill] sm:$0xff] %v6168_v53  ;;  %v1819_v23 = vpop.f32.mrf.mxu0  ;;  %2254 = vrot.lane.b32.xlu2 %v6168_v53, %s3770_s24  ;;  %2252 = vrot.lane.b32.xlu1 %v6171_v25, %s3770_s24  ;;  %v2087_v36 = vrot.slane %v6207_v21, 1 }
 0x3f0   : > { %8652 = vst [vmem:[#allocation115_spill] sm:$0xff] %v6171_v25  ;;  %v1898_v27 = vmax.f32 %v1847_v46, 0.0  ;;  %v1820_v4 = vadd.f32 %v5812_v58, %v1819_v23 }
 0x3f1   : > { %v6215_v23 = vsel %vm434_vm2, %v2087_v36, %v2088_v26 }
 0x3f2   : > { %1930 = vst.msk [vmem:[#allocation2 + $0x121] sm:$0xff] %vm225_vm0, %v1898_v27  ;;  %v1889_v54 = vmax.f32 %v1820_v4, 0.0  ;;  %v6219_v4 = vld [vmem:[#allocation2 + $0xf8] sm:$0xff] }
 0x3f3   : > { %v6182_v7 = vld [vmem:[#allocation2 + $0xa8] sm:$0xff]  ;;  %8655 = vst [vmem:[#allocation72_spill] sm:$0xff] %v6215_v23 }
 0x3f4   : > { %1921 = vst.msk [vmem:[#allocation2 + $0xb1] sm:$0xff] %vm225_vm0, %v1889_v54  ;;  %v2077_v31 = vrot.slane %v6182_v7, 1  ;;  %v6221_v54 = vld [vmem:[#allocation2 + $0x100] sm:$0x3] }
 0x3f5   : > { %v1849_v35 = vpop.f32.mrf.mxu2 }
 0x3f6   : > { %v1850_v5 = vadd.f32 %v5812_v58, %v1849_v35 }
 0x3f7   : > { %v1822_v39 = vpop.f32.mrf.mxu0 }
 0x3f8   : > { %v1899_v55 = vmax.f32 %v1850_v5, 0.0  ;;  %v1823_v1 = vadd.f32 %v5812_v58, %v1822_v39 }
 0x3fa   : > { %1931 = vst.msk [vmem:[#allocation2 + $0x129] sm:$0xff] %vm225_vm0, %v1899_v55  ;;  %v1890_v19 = vmax.f32 %v1823_v1, 0.0  ;;  %v2093_v55 = vrot.slane %v6219_v4, 1  ;;  %v2095_v1 = vrot.slane %v6221_v54, 1 }
 0x3fb   : > { %v6185_v2 = vld [vmem:[#allocation2 + $0xb0] sm:$0xff]  ;;  %v6187_v20 = vld [vmem:[#allocation2 + $0xb8] sm:$0x3] }
 0x3fc   : > { %1922 = vst.msk [vmem:[#allocation2 + $0xc1] sm:$0xff] %vm225_vm0, %v1890_v19  ;;  %v2078_v52 = vrot.slane %v6185_v2, 1  ;;  %v2080_v56 = vrot.slane %v6187_v20, 1 }
 0x3fd   : > { %v1852_v38 = vpop.f32.mrf.mxu2 }
 0x3fe   : > { %v1853_v0 = vadd.f32 %v5812_v58, %v1852_v38  ;;  %v6195_v63 = vsel %vm434_vm2, %v2077_v31, %v2078_v52  ;;  %v6198_v33 = vsel %vm434_vm2, %v2078_v52, %v2080_v56 }
 0x3ff   : > { %8653 = vst [vmem:[#allocation136_spill] sm:$0xff] %v6195_v63  ;;  %2256 = vrot.lane.b32.xlu0 %v6195_v63, %s3770_s24  ;;  %2258 = vrot.lane.b32.xlu1 %v6198_v33, %s3770_s24  ;;  %v1825_v22 = vpop.f32.mrf.mxu0 }
 0x400   : > { %8654 = vst [vmem:[#allocation168_spill] sm:$0xff] %v6198_v33  ;;  %v1900_v14 = vmax.f32 %v1853_v0, 0.0  ;;  %v1826_v50 = vadd.f32 %v5812_v58, %v1825_v22 }
 0x401   : > { %v6253_v36 = vld [vmem:[#allocation2 + $0x128] sm:$0xff]  ;;  %v6310_v25 = vld [vmem:[#allocation2 + $0x130] sm:$0x3] }
 0x402   : > { %1932 = vst.msk [vmem:[#allocation2 + $0x139] sm:$0xff] %vm225_vm0, %v1900_v14  ;;  %v1891_v48 = vmax.f32 %v1826_v50, 0.0  ;;  %v6247_v14 = vsel %vm434_vm2, %v2093_v55, %v2095_v1  ;;  %v6249_v50 = vld [vmem:[#allocation2 + $0xe8] sm:$0x3] }
 0x403   : > { %v6223_v35 = vld [vmem:[#allocation2 + $0xc0] sm:$0xff]  ;;  %8658 = vst [vmem:[#allocation161_spill] sm:$0xff] %v6247_v14 }
 0x404   : > { %1923 = vst.msk [vmem:[#allocation2 + $0xc9] sm:$0xff] %vm225_vm0, %v1891_v48  ;;  %v2082_v52 = vrot.slane %v6223_v35, 1 }
 0x405   : > { %v1855_v34 = vpop.f32.mrf.mxu2 }
 0x406   : > { %v1856_v46 = vadd.f32 %v5812_v58, %v1855_v34  ;;  %v6255_v34 = vld [vmem:[#allocation2 + $0xf0] sm:$0xff] }
 0x407   : > { %2264 = vrot.lane.b32.xlu1 %v6215_v23, %s3770_s24  ;;  %v2092_v1 = vrot.slane %v6255_v34, 1  ;;  %v6278_v23 = vld [vmem:[#allocation2 + $0x110] sm:$0xff] }
 0x408   : > { %v1901_v27 = vmax.f32 %v1856_v46, 0.0  ;;  %v2090_v46 = vrot.slane %v6249_v50, 1 }
 0x40a   : > { %1933 = vst.msk [vmem:[#allocation2 + $0x141] sm:$0xff] %vm225_vm0, %v1901_v27  ;;  %v6259_v27 = vld [vmem:[#allocation2 + $0x120] sm:$0xff] }
 0x40b   : > { %v6226_v5 = vld [vmem:[#allocation2 + $0xc8] sm:$0xff]  ;;  %v6228_v39 = vld [vmem:[#allocation2 + $0xd0] sm:$0x3] }
 0x40c   : > { %v2083_v19 = vrot.slane %v6226_v5, 1  ;;  %v2085_v31 = vrot.slane %v6228_v39, 1 }
 0x40d   : > { %v1858_v56 = vpop.f32.mrf.mxu2 }
 0x40e   : > { %v1859_v38 = vadd.f32 %v5812_v58, %v1858_v56  ;;  %v6237_v0 = vsel %vm434_vm2, %v2083_v19, %v2085_v31  ;;  %v6240_v22 = vsel %vm434_vm2, %v2082_v52, %v2083_v19  ;;  %v2103_v19 = vrot.slane %v6253_v36, 1 }
 0x40f   : > { %8656 = vst [vmem:[#allocation117_spill] sm:$0xff] %v6237_v0  ;;  %2262 = vrot.lane.b32.xlu0 %v6237_v0, %s3770_s24  ;;  %2260 = vrot.lane.b32.xlu2 %v6240_v22, %s3770_s24  ;;  %v2102_v52 = vrot.slane %v6259_v27, 1  ;;  %v6280_v0 = vld [vmem:[#allocation2 + $0x118] sm:$0x3] }
 0x410   : > { %8657 = vst [vmem:[#allocation144_spill] sm:$0xff] %v6240_v22  ;;  %v1902_v48 = vmax.f32 %v1859_v38, 0.0  ;;  %2270 = vrot.lane.b32.xlu1 %v6247_v14, %s3770_s24  ;;  %v6266_v38 = vsel %vm434_vm2, %v2092_v1, %v2093_v55  ;;  %v6269_v14 = vsel %vm434_vm2, %v2088_v26, %v2090_v46  ;;  %v6288_v46 = vld [vmem:[#allocation2 + $0x108] sm:$0xff]  ;;  %v2098_v1 = vrot.slane %v6278_v23, 1 }
 0x411   : > { %8659 = vst [vmem:[#allocation77_spill] sm:$0xff] %v6266_v38  ;;  %v6284_v55 = vld [vmem:[#allocation2 + $0x140] sm:$0xff]  ;;  %v6286_v26 = vld [vmem:[#allocation2 + $0x148] sm:$0x3] }
 0x412   : > { %1934 = vst.msk [vmem:[#allocation2 + $0x151] sm:$0xff] %vm225_vm0, %v1902_v48  ;;  %v6276_v48 = vsel %vm434_vm2, %v2102_v52, %v2103_v19  ;;  %v2100_v52 = vrot.slane %v6280_v0, 1 }
 0x413   : > { %8660 = vst [vmem:[#allocation104_spill] sm:$0xff] %v6269_v14 }
 0x414   : > { %8661 = vst [vmem:[#allocation145_spill] sm:$0xff] %v6276_v48  ;;  %v6298_v22 = vsel %vm434_vm2, %v2098_v1, %v2100_v52 }
 0x415   : > { %v1861_v31 = vpop.f32.mrf.mxu2  ;;  %8662 = vst [vmem:[#allocation169_spill] sm:$0xff] %v6298_v22 }
 0x416   : > { %v1862_v56 = vadd.f32 %v5812_v58, %v1861_v31 }
 0x417   : > { %2268 = vrot.lane.b32.xlu0 %v6266_v38, %s3770_s24  ;;  %2266 = vrot.lane.b32.xlu2 %v6269_v14, %s3770_s24  ;;  %v2108_v38 = vrot.slane %v6284_v55, 1  ;;  %v2110_v14 = vrot.slane %v6286_v26, 1 }
 0x418   : > { %v1903_v31 = vmax.f32 %v1862_v56, 0.0  ;;  %2276 = vrot.lane.b32.xlu1 %v6276_v48, %s3770_s24  ;;  %v2097_v56 = vrot.slane %v6288_v46, 1 }
 0x419   : > { %v6334_v62 = vld [vmem:[#allocation2 + $0x150] sm:$0xff] }
 0x41a   : > { %1935 = vst.msk [vmem:[#allocation2 + $0x159] sm:$0xff] %vm225_vm0, %v1903_v31  ;;  %v6301_v63 = vsel %vm434_vm2, %v2097_v56, %v2098_v1  ;;  %v6308_v31 = vsel %vm434_vm2, %v2108_v38, %v2110_v14  ;;  %v2105_v1 = vrot.slane %v6310_v25, 1 }
 0x41b   : > { %8663 = vst [vmem:[#allocation186_spill] sm:$0xff] %v6301_v63 }
 0x41c   : > { %8664 = vst [vmem:[#allocation56_spill] sm:$0xff] %v6308_v31 }
 0x41d   : > { %v1864_v33 = vpop.f32.mrf.mxu2 }
 0x41e   : > { %v1865_v48 = vadd.f32 %v5812_v58, %v1864_v33  ;;  %v6314_v33 = vld [vmem:[#allocation2 + $0x138] sm:$0xff] }
 0x41f   : > { %2274 = vrot.lane.b32.xlu0 %v6298_v22, %s3770_s24  ;;  %2272 = vrot.lane.b32.xlu2 %v6301_v63, %s3770_s24  ;;  %v2107_v52 = vrot.slane %v6314_v33, 1  ;;  %v6324_v63 = vsel %vm434_vm2, %v2103_v19, %v2105_v1  ;;  %v2112_v1 = vrot.slane %v6334_v62, 1 }
 0x420   : > { %v1904_v53 = vmax.f32 %v1865_v48, 0.0  ;;  %2282 = vrot.lane.b32.xlu1 %v6308_v31, %s3770_s24  ;;  %8666 = vst [vmem:[#allocation118_spill] sm:$0xff] %v6324_v63 }
 0x421   : > { %v6321_v14 = vsel %vm434_vm2, %v2107_v52, %v2108_v38  ;;  %v6332_v48 = vld [vmem:[#allocation2 + $0x160] sm:$0x3] }
 0x422   : > { %1936 = vst.msk [vmem:[#allocation2 + $0x169] sm:$0xff] %vm225_vm0, %v1904_v53  ;;  %v6330_v53 = vld [vmem:[#allocation2 + $0x158] sm:$0xff]  ;;  %v2115_v19 = vrot.slane %v6332_v48, 1 }
 0x423   : > { %8665 = vst [vmem:[#allocation185_spill] sm:$0xff] %v6321_v14  ;;  %v2113_v38 = vrot.slane %v6330_v53, 1 }
 0x425   : > { %v1867_v56 = vpop.f32.mrf.mxu2 }
 0x426   : > { %v1868_v22 = vadd.f32 %v5812_v58, %v1867_v56 }
 0x427   : > { %2280 = vrot.lane.b32.xlu0 %v6321_v14, %s3770_s24  ;;  %2278 = vrot.lane.b32.xlu2 %v6324_v63, %s3770_s24  ;;  %v6342_v14 = vsel %vm434_vm2, %v2113_v38, %v2115_v19  ;;  %v6345_v63 = vsel %vm434_vm2, %v2112_v1, %v2113_v38 }
 0x428   : > { %v1905_v31 = vmax.f32 %v1868_v22, 0.0  ;;  %8667 = vst [vmem:[#allocation139_spill] sm:$0xff] %v6342_v14 }
 0x429   : > { %8668 = vst [vmem:[#allocation74_spill] sm:$0xff] %v6345_v63  ;;  %v6351_v22 = vld [vmem:[#allocation2 + $0x168] sm:$0xff] }
 0x42a   : > { %1937 = vst.msk [vmem:[#allocation2 + $0x171] sm:$0xff] %vm225_vm0, %v1905_v31  ;;  %v2117_v38 = vrot.slane %v6351_v22, 1 }
 0x42d   : > { %v1870_v52 = vpop.f32.mrf.mxu2 }
 0x42e   : > { %v1871_v56 = vadd.f32 %v5812_v58, %v1870_v52 }
 0x42f   : > { %2286 = vrot.lane.b32.xlu0 %v6342_v14, %s3770_s24  ;;  %2284 = vrot.lane.b32.xlu2 %v6345_v63, %s3770_s24 }
 0x430   : > { %v1906_v31 = vmax.f32 %v1871_v56, 0.0  ;;  %v2124_v56 = vsel %vm515_vm4, %v2122_v37, %v2123_v29 }
 0x431   : > { %v6355_v52 = vld [vmem:[#allocation2 + $0x170] sm:$0xff]  ;;  %v6357_v19 = vld [vmem:[#allocation2 + $0x178] sm:$0x3] }
 0x432   : > { %1938 = vst.msk [vmem:[#allocation2 + $0x181] sm:$0xff] %vm225_vm0, %v1906_v31  ;;  %v2118_v1 = vrot.slane %v6355_v52, 1  ;;  %v2120_v14 = vrot.slane %v6357_v19, 1  ;;  %v2125_v31 = vrot.slane %v5931_v28, 2 }
 0x434   : > { %v6364_v63 = vsel %vm434_vm2, %v2117_v38, %v2118_v1  ;;  %v6371_v11 = vsel %vm434_vm2, %v2118_v1, %v2120_v14  ;;  %v2126_v37 = vsel %vm515_vm4, %v2123_v29, %v2125_v31  ;;  %v6389_v1 = vpop.permute.xlu2 %2230  ;;  %v2132_v29 = vrot.slane %v6035_v9, 2 }
 0x435   : > { %8669 = vst [vmem:[#allocation59_spill] sm:$0xff] %v6364_v63  ;;  %v1873_v41 = vpop.f32.mrf.mxu2  ;;  %2288 = vrot.lane.b32.xlu1 %v6364_v63, %s3770_s24  ;;  %v2130_v63 = vrot.slane %v5989_v44, 2  ;;  %v2133_v44 = vrot.slane %v6042_v60, 2 }
 0x436   : > { %v1874_v18 = vadd.f32 %v5812_v58, %v1873_v41  ;;  %8670 = vst [vmem:[#allocation181_spill] sm:$0xff] %v6371_v11  ;;  %v2127_v58 = vrot.slane %v5980_v10, 2 }
 0x437   : > { %2324 = vrot.lane.b32.xlu0 %v2124_v56, %s3771_s25  ;;  %2290 = vrot.lane.b32.xlu2 %v6371_v11, %s3770_s24  ;;  %v6384_v28 = vsel %vm515_vm4, %v2128_v3, %v2130_v63  ;;  %8671 = vst [vmem:[#allocation122_spill] sm:$0xff] %v6389_v1  ;;  %v2138_v56 = vrot.slane %v6077_v6, 2  ;;  %v2135_v63 = vrot.slane %v6044_v16, 2  ;;  %v6400_v41 = vsel %vm515_vm4, %v2132_v29, %v2133_v44  ;;  %v6420_v29 = vpop.permute.xlu1 %2228 }
 0x438   : > { %v1907_v38 = vmax.f32 %v1874_v18, 0.0  ;;  %v6387_v14 = vsel %vm515_vm4, %v2127_v58, %v2128_v3  ;;  %v2137_v3 = vrot.slane %v6075_v12, 2  ;;  %v2140_v16 = vrot.slane %v6079_v47, 2  ;;  %8673 = vst [vmem:[#allocation163_spill] sm:$0xff] %v6420_v29 }
 0x439   : > { %v6409_v31 = vsel %vm515_vm4, %v2133_v44, %v2135_v63  ;;  %v2145_v58 = vrot.slane %v6106_v24, 2  ;;  %v2142_v44 = vrot.slane %v6101_v13, 2  ;;  %v2148_v24 = vrot.slane %v6131_v32, 2 }
 0x43a   : > { %1939 = vst.msk [vmem:[#allocation2 + $0x189] sm:$0xff] %vm225_vm0, %v1907_v38  ;;  %v6406_v18 = vsel %vm515_vm4, %v2137_v3, %v2138_v56  ;;  %v6423_v3 = vsel %vm515_vm4, %v2138_v56, %v2140_v16  ;;  %v2147_v16 = vrot.slane %v6128_v17, 2 }
 0x43c   : > { %v6416_v38 = vpop.permute.xlu2 %2236  ;;  %v6445_v1 = vsel %vm515_vm4, %v2147_v16, %v2148_v24  ;;  %v6463_v16 = vpop.permute.xlu0 %2232 }
 0x43d   : > { %2326 = vrot.lane.b32.xlu1 %v2126_v37, %s3771_s25  ;;  %8672 = vst [vmem:[#allocation146_spill] sm:$0xff] %v6416_v38  ;;  %v2143_v37 = vrot.slane %v6104_v15, 2  ;;  %v2153_v38 = vrot.slane %v6158_v49, 2 }
 0x43e   : > { %8676 = vst [vmem:[#allocation98_spill] sm:$0xff] %v6445_v1 }
 0x43f   : > { %2330 = vrot.lane.b32.xlu0 %v6384_v28, %s3771_s25  ;;  %2328 = vrot.lane.b32.xlu2 %v6387_v14, %s3771_s25  ;;  %v6429_v63 = vsel %vm515_vm4, %v2143_v37, %v2145_v58  ;;  %v6432_v47 = vsel %vm515_vm4, %v2142_v44, %v2143_v37  ;;  %v2150_v58 = vrot.slane %v6133_v42, 2  ;;  %v2152_v37 = vrot.slane %v6155_v8, 2  ;;  %v6450_v44 = vpop.permute.xlu1 %2234  ;;  %8680 = vst [vmem:[#allocation147_spill] sm:$0xff] %v6463_v16 }
 0x440   : > { %8674 = vst [vmem:[#allocation78_spill] sm:$0xff] %v6429_v63  ;;  %v2155_v42 = vrot.slane %v6160_v30, 2 }
 0x441   : > { %8677 = vst [vmem:[#allocation107_spill] sm:$0xff] %v6450_v44  ;;  %v6453_v29 = vsel %vm515_vm4, %v2152_v37, %v2153_v38  ;;  %v2158_v44 = vrot.slane %v6185_v2, 2  ;;  %v2160_v37 = vrot.slane %v6187_v20, 2  ;;  %v2163_v20 = vrot.slane %v6226_v5, 2 }
 0x442   : > { %8678 = vst [vmem:[#allocation132_spill] sm:$0xff] %v6453_v29 }
 0x443   : > { %v6478_v30 = vsel %vm515_vm4, %v2158_v44, %v2160_v37  ;;  %v2168_v37 = vrot.slane %v6204_v51, 2 }
 0x444   : > { %v6439_v56 = vpop.permute.xlu2 %2242  ;;  %8684 = vst [vmem:[#allocation83_spill] sm:$0xff] %v6478_v30 }
 0x445   : > { %2332 = vrot.lane.b32.xlu1 %v6400_v41, %s3771_s25  ;;  %8675 = vst [vmem:[#allocation187_spill] sm:$0xff] %v6439_v56  ;;  %v6456_v56 = vsel %vm515_vm4, %v2148_v24, %v2150_v58  ;;  %v2157_v24 = vrot.slane %v6182_v7, 2 }
 0x446   : > { %8679 = vst [vmem:[#allocation38_spill] sm:$0xff] %v6456_v56 }
 0x447   : > { %2336 = vrot.lane.b32.xlu0 %v6406_v18, %s3771_s25  ;;  %2334 = vrot.lane.b32.xlu2 %v6409_v31, %s3771_s25  ;;  %v6475_v58 = vpop.permute.xlu1 %2240  ;;  %v6481_v16 = vsel %vm515_vm4, %v2157_v24, %v2158_v44  ;;  %v2167_v24 = vrot.slane %v6207_v21, 2 }
 0x448   : > { %8683 = vst [vmem:[#allocation76_spill] sm:$0xff] %v6475_v58  ;;  %v2165_v58 = vrot.slane %v6228_v39, 2  ;;  %v2170_v39 = vrot.slane %v6249_v50, 2 }
 0x449   : > { %8685 = vst [vmem:[#allocation190_spill] sm:$0xff] %v6481_v16 }
 0x44d   : > { %2338 = vrot.lane.b32.xlu1 %v6423_v3, %s3771_s25 }
 0x44f   : > { %2342 = vrot.lane.b32.xlu0 %v6429_v63, %s3771_s25  ;;  %2340 = vrot.lane.b32.xlu2 %v6432_v47, %s3771_s25  ;;  %v6465_v63 = vpop.permute.xlu2 %2248 }
 0x450   : > { %8681 = vst [vmem:[#allocation171_spill] sm:$0xff] %v6465_v63  ;;  %v2162_v63 = vrot.slane %v6223_v35, 2 }
 0x452   : > { %v6496_v44 = vsel %vm515_vm4, %v2162_v63, %v2163_v20 }
 0x453   : > { %8688 = vst [vmem:[#allocation142_spill] sm:$0xff] %v6496_v44 }
 0x455   : > { %2344 = vrot.lane.b32.xlu1 %v6445_v1, %s3771_s25  ;;  %v6470_v1 = vsel %vm515_vm4, %v2153_v38, %v2155_v42  ;;  %v6488_v38 = vpop.permute.xlu0 %2238 }
 0x456   : > { %8682 = vst [vmem:[#allocation95_spill] sm:$0xff] %v6470_v1 }
 0x457   : > { %2348 = vrot.lane.b32.xlu0 %v6453_v29, %s3771_s25  ;;  %2346 = vrot.lane.b32.xlu2 %v6456_v56, %s3771_s25  ;;  %8686 = vst [vmem:[#allocation123_spill] sm:$0xff] %v6488_v38  ;;  %v6490_v42 = vpop.permute.xlu2 %2254  ;;  %v6504_v38 = vsel %vm515_vm4, %v2167_v24, %v2168_v37  ;;  %v2175_v24 = vrot.slane %v6221_v54, 2  ;;  %v2178_v54 = vrot.slane %v6278_v23, 2 }
 0x458   : > { %8687 = vst [vmem:[#allocation134_spill] sm:$0xff] %v6490_v42  ;;  %v6507_v42 = vsel %vm515_vm4, %v2163_v20, %v2165_v58  ;;  %v2172_v58 = vrot.slane %v6255_v34, 2 }
 0x459   : > { %8690 = vst [vmem:[#allocation170_spill] sm:$0xff] %v6504_v38 }
 0x45a   : > { %8691 = vst [vmem:[#allocation79_spill] sm:$0xff] %v6507_v42 }
 0x45d   : > { %2350 = vrot.lane.b32.xlu1 %v6470_v1, %s3771_s25  ;;  %v6514_v63 = vpop.permute.xlu0 %2244 }
 0x45e   : > { %8692 = vst [vmem:[#allocation62_spill] sm:$0xff] %v6514_v63 }
 0x45f   : > { %2354 = vrot.lane.b32.xlu0 %v6478_v30, %s3771_s25  ;;  %2352 = vrot.lane.b32.xlu2 %v6481_v16, %s3771_s25  ;;  %v6501_v30 = vpop.permute.xlu1 %2246 }
 0x460   : > { %8689 = vst [vmem:[#allocation156_spill] sm:$0xff] %v6501_v30  ;;  %v2173_v30 = vrot.slane %v6219_v4, 2 }
 0x462   : > { %v6529_v50 = vsel %vm515_vm4, %v2173_v30, %v2175_v24  ;;  %v6532_v63 = vsel %vm515_vm4, %v2172_v58, %v2173_v30  ;;  %v2183_v24 = vrot.slane %v6253_v36, 2  ;;  %v2182_v58 = vrot.slane %v6259_v27, 2 }
 0x463   : > { %8696 = vst [vmem:[#allocation125_spill] sm:$0xff] %v6529_v50 }
 0x465   : > { %2356 = vrot.lane.b32.xlu1 %v6496_v44, %s3771_s25  ;;  %v6521_v44 = vsel %vm515_vm4, %v2168_v37, %v2170_v39  ;;  %v6539_v37 = vpop.permute.xlu0 %2250 }
 0x466   : > { %8694 = vst [vmem:[#allocation99_spill] sm:$0xff] %v6521_v44 }
 0x467   : > { %2360 = vrot.lane.b32.xlu0 %v6504_v38, %s3771_s25  ;;  %2358 = vrot.lane.b32.xlu2 %v6507_v42, %s3771_s25  ;;  %v6526_v20 = vpop.permute.xlu1 %2252  ;;  %8697 = vst [vmem:[#allocation148_spill] sm:$0xff] %v6539_v37  ;;  %v6555_v37 = vsel %vm515_vm4, %v2182_v58, %v2183_v24  ;;  %v2190_v58 = vrot.slane %v6286_v26, 2 }
 0x468   : > { %8695 = vst [vmem:[#allocation121_spill] sm:$0xff] %v6526_v20  ;;  %v2177_v20 = vrot.slane %v6288_v46, 2 }
 0x469   : > { %v6516_v1 = vpop.permute.xlu2 %2260 }
 0x46a   : > { %8693 = vst [vmem:[#allocation184_spill] sm:$0xff] %v6516_v1  ;;  %v2180_v1 = vrot.slane %v6280_v0, 2  ;;  %v6547_v30 = vsel %vm515_vm4, %v2177_v20, %v2178_v54  ;;  %v2185_v0 = vrot.slane %v6310_v25, 2 }
 0x46b   : > { %8699 = vst [vmem:[#allocation61_spill] sm:$0xff] %v6547_v30 }
 0x46d   : > { %2362 = vrot.lane.b32.xlu1 %v6521_v44, %s3771_s25 }
 0x46f   : > { %2366 = vrot.lane.b32.xlu0 %v6529_v50, %s3771_s25  ;;  %2364 = vrot.lane.b32.xlu2 %v6532_v63, %s3771_s25 }
 0x471   : > { %v6541_v39 = vpop.permute.xlu2 %2266  ;;  %v6552_v50 = vpop.permute.xlu1 %2258 }
 0x472   : > { %8698 = vst [vmem:[#allocation159_spill] sm:$0xff] %v6541_v39  ;;  %v6558_v39 = vsel %vm515_vm4, %v2178_v54, %v2180_v1  ;;  %v6565_v20 = vpop.permute.xlu0 %2256  ;;  %v2187_v1 = vrot.slane %v6314_v33, 2 }
 0x473   : > { %8700 = vst [vmem:[#allocation180_spill] sm:$0xff] %v6552_v50  ;;  %v2188_v50 = vrot.slane %v6284_v55, 2 }
 0x474   : > { %8701 = vst [vmem:[#allocation84_spill] sm:$0xff] %v6565_v20  ;;  %v2198_v20 = vrot.slane %v6355_v52, 2 }
 0x475   : > { %2368 = vrot.lane.b32.xlu1 %v6547_v30, %s3771_s25  ;;  %v6572_v30 = vsel %vm515_vm4, %v2183_v24, %v2185_v0  ;;  %v6578_v54 = vsel %vm515_vm4, %v2188_v50, %v2190_v58  ;;  %v6581_v25 = vsel %vm515_vm4, %v2187_v1, %v2188_v50  ;;  %v2193_v24 = vrot.slane %v6330_v53, 2 }
 0x476   : > { %8703 = vst [vmem:[#allocation110_spill] sm:$0xff] %v6572_v30  ;;  %v2192_v58 = vrot.slane %v6334_v62, 2  ;;  %v2195_v50 = vrot.slane %v6332_v48, 2  ;;  %v2200_v48 = vrot.slane %v6357_v19, 2 }
 0x477   : > { %2372 = vrot.lane.b32.xlu0 %v6555_v37, %s3771_s25  ;;  %2370 = vrot.lane.b32.xlu2 %v6558_v39, %s3771_s25  ;;  %8704 = vst [vmem:[#allocation135_spill] sm:$0xff] %v6578_v54 }
 0x478   : > { %v6598_v1 = vsel %vm515_vm4, %v2192_v58, %v2193_v24 }
 0x479   : > { %v6567_v44 = vpop.permute.xlu2 %2272  ;;  %v6587_v26 = vpop.permute.xlu1 %2264  ;;  %8708 = vst [vmem:[#allocation182_spill] sm:$0xff] %v6598_v1 }
 0x47a   : > { %8702 = vst [vmem:[#allocation102_spill] sm:$0xff] %v6567_v44 }
 0x47b   : > { %8705 = vst [vmem:[#allocation43_spill] sm:$0xff] %v6587_v26 }
 0x47d   : > { %2374 = vrot.lane.b32.xlu1 %v6572_v30, %s3771_s25 }
 0x47f   : > { %2378 = vrot.lane.b32.xlu0 %v6578_v54, %s3771_s25  ;;  %2376 = vrot.lane.b32.xlu2 %v6581_v25, %s3771_s25  ;;  %v2197_v54 = vrot.slane %v6351_v22, 2 }
 0x481   : > { %v6590_v0 = vpop.permute.xlu0 %2262  ;;  %v6592_v44 = vpop.permute.xlu2 %2278  ;;  %v6604_v26 = vsel %vm515_vm4, %v2197_v54, %v2198_v20  ;;  %v6621_v54 = vsel %vm515_vm4, %v2198_v20, %v2200_v48 }
 0x482   : > { %8706 = vst [vmem:[#allocation150_spill] sm:$0xff] %v6590_v0  ;;  %v6607_v0 = vsel %vm515_vm4, %v2193_v24, %v2195_v50  ;;  %v6618_v30 = vpop.permute.xlu1 %2270 }
 0x483   : > { %8707 = vst [vmem:[#allocation172_spill] sm:$0xff] %v6592_v44 }
 0x484   : > { %8709 = vst [vmem:[#allocation82_spill] sm:$0xff] %v6604_v26 }
 0x485   : > { %2380 = vrot.lane.b32.xlu1 %v6598_v1, %s3771_s25  ;;  %8710 = vst [vmem:[#allocation88_spill] sm:$0xff] %v6607_v0 }
 0x486   : > { %8712 = vst [vmem:[#allocation137_spill] sm:$0xff] %v6618_v30 }
 0x487   : > { %2384 = vrot.lane.b32.xlu0 %v6604_v26, %s3771_s25  ;;  %2382 = vrot.lane.b32.xlu2 %v6607_v0, %s3771_s25  ;;  %8713 = vst [vmem:[#allocation37_spill] sm:$0xff] %v6621_v54 }
 0x489   : > { %v6614_v58 = vpop.permute.xlu0 %2268  ;;  %v6616_v44 = vpop.permute.xlu2 %2284 }
 0x48a   : > { %8711 = vst [vmem:[#allocation126_spill] sm:$0xff] %v6616_v44  ;;  %v6633_v50 = vpop.permute.xlu1 %2276 }
 0x48b   : > { %8715 = vst [vmem:[#allocation81_spill] sm:$0xff] %v6633_v50  ;;  %v8781_v50 = vld [vmem:[#allocation56_spill] sm:$0xff] }
 0x48d   : > { %2386 = vrot.lane.b32.xlu1 %v6621_v54, %s3771_s25  ;;  %v8746_v54 = vld [vmem:[#allocation67_spill] sm:$0xff] }
 0x48f   : > { %2422 = vrot.lane.b32.xlu0 %v5987_v57, %s3772_s26  ;;  %2420 = vrot.lane.b32.xlu2 %v5980_v10, %s3772_s26 }
 0x491   : > { %v6629_v24 = vpop.permute.xlu0 %2274  ;;  %v6631_v19 = vpop.permute.xlu2 %2290 }
 0x492   : > { %8714 = vst [vmem:[#allocation160_spill] sm:$0xff] %v6631_v19  ;;  %v6647_v10 = vpop.permute.xlu1 %2282 }
 0x493   : > { %8717 = vst [vmem:[#allocation66_spill] sm:$0xff] %v6647_v10 }
 0x495   : > { %2424 = vrot.lane.b32.xlu1 %v6035_v9, %s3772_s26 }
 0x497   : > { %2428 = vrot.lane.b32.xlu0 %v6075_v12, %s3772_s26  ;;  %2426 = vrot.lane.b32.xlu2 %v6042_v60, %s3772_s26 }
 0x499   : > { %v6641_v20 = vpop.permute.xlu0 %2280  ;;  %v6643_v57 = vpop.permute.xlu2 %2328 }
 0x49a   : > { %8716 = vst [vmem:[#allocation174_spill] sm:$0xff] %v6643_v57 }
 0x49d   : > { %2430 = vrot.lane.b32.xlu1 %v6077_v6, %s3772_s26 }
 0x49f   : > { %2434 = vrot.lane.b32.xlu0 %v6104_v15, %s3772_s26  ;;  %2432 = vrot.lane.b32.xlu2 %v6101_v13, %s3772_s26 }
 0x4a1   : > { %v6653_v9 = vpop.permute.xlu0 %2286  ;;  %v6655_v12 = vpop.permute.xlu2 %2334 }
 0x4a2   : > { %8718 = vst [vmem:[#allocation103_spill] sm:$0xff] %v6653_v9 }
 0x4a3   : > { %8719 = vst [vmem:[#allocation124_spill] sm:$0xff] %v6655_v12 }
 0x4a5   : > { %2436 = vrot.lane.b32.xlu1 %v6128_v17, %s3772_s26 }
 0x4a7   : > { %2440 = vrot.lane.b32.xlu0 %v6155_v8, %s3772_s26  ;;  %2438 = vrot.lane.b32.xlu2 %v6131_v32, %s3772_s26  ;;  %v6663_v60 = vpop.permute.xlu1 %2288 }
 0x4a8   : > { %8720 = vst [vmem:[#allocation128_spill] sm:$0xff] %v6663_v60 }
 0x4a9   : > { %v6665_v6 = vpop.permute.xlu0 %2324  ;;  %v6667_v15 = vpop.permute.xlu2 %2340 }
 0x4aa   : > { %8721 = vst [vmem:[#allocation151_spill] sm:$0xff] %v6665_v6  ;;  %v8754_v6 = vld [vmem:[#allocation115_spill] sm:$0xff] }
 0x4ab   : > { %8722 = vst [vmem:[#allocation55_spill] sm:$0xff] %v6667_v15  ;;  %v6745_v15 = vld [vmem:[#allocation2 + $0x180] sm:$0xff] }
 0x4ac   : > { %8735 = vst [vmem:[#allocation203_spill] sm:$0xff] %v6745_v15 }
 0x4ad   : > { %2442 = vrot.lane.b32.xlu1 %v6158_v49, %s3772_s26 }
 0x4af   : > { %2446 = vrot.lane.b32.xlu0 %v6185_v2, %s3772_s26  ;;  %2444 = vrot.lane.b32.xlu2 %v6182_v7, %s3772_s26  ;;  %v6675_v13 = vpop.permute.xlu1 %2326 }
 0x4b0   : > { %8723 = vst [vmem:[#allocation65_spill] sm:$0xff] %v6675_v13 }
 0x4b1   : > { %v6677_v17 = vpop.permute.xlu0 %2330  ;;  %v6679_v32 = vpop.permute.xlu2 %2346 }
 0x4b2   : > { %8724 = vst [vmem:[#allocation183_spill] sm:$0xff] %v6677_v17  ;;  %v8748_v17 = vld [vmem:[#allocation101_spill] sm:$0xff] }
 0x4b3   : > { %8725 = vst [vmem:[#allocation50_spill] sm:$0xff] %v6679_v32 }
 0x4b5   : > { %2448 = vrot.lane.b32.xlu1 %v6223_v35, %s3772_s26 }
 0x4b7   : > { %2452 = vrot.lane.b32.xlu0 %v6207_v21, %s3772_s26  ;;  %2450 = vrot.lane.b32.xlu2 %v6226_v5, %s3772_s26  ;;  %v6687_v8 = vpop.permute.xlu1 %2332 }
 0x4b8   : > { %8726 = vst [vmem:[#allocation89_spill] sm:$0xff] %v6687_v8  ;;  %v8747_v8 = vld [vmem:[#allocation167_spill] sm:$0xff] }
 0x4b9   : > { %v6689_v49 = vpop.permute.xlu0 %2336  ;;  %v6691_v2 = vpop.permute.xlu2 %2352 }
 0x4ba   : > { %8727 = vst [vmem:[#allocation105_spill] sm:$0xff] %v6689_v49 }
 0x4bd   : > { %2454 = vrot.lane.b32.xlu1 %v6204_v51, %s3772_s26 }
 0x4bf   : > { %2458 = vrot.lane.b32.xlu0 %v6219_v4, %s3772_s26  ;;  %2456 = vrot.lane.b32.xlu2 %v6255_v34, %s3772_s26  ;;  %v6699_v35 = vpop.permute.xlu1 %2338 }
 0x4c0   : > { %8728 = vst [vmem:[#allocation113_spill] sm:$0xff] %v6699_v35 }
 0x4c1   : > { %v6701_v21 = vpop.permute.xlu0 %2342  ;;  %v6703_v5 = vpop.permute.xlu2 %2358 }
 0x4c2   : > { %8729 = vst [vmem:[#allocation138_spill] sm:$0xff] %v6701_v21  ;;  %v6743_v21 = vld [vmem:[#allocation2 + $0x188] sm:$0xff] }
 0x4c3   : > { %8730 = vst [vmem:[#allocation149_spill] sm:$0xff] %v6703_v5 }
 0x4c4   : > { %8734 = vst [vmem:[#allocation195_spill] sm:$0xff] %v6743_v21 }
 0x4c5   : > { %2460 = vrot.lane.b32.xlu1 %v6288_v46, %s3772_s26 }
 0x4c7   : > { %2464 = vrot.lane.b32.xlu0 %v6259_v27, %s3772_s26  ;;  %2462 = vrot.lane.b32.xlu2 %v6278_v23, %s3772_s26  ;;  %v6711_v51 = vpop.permute.xlu1 %2344 }
 0x4c8   : > { %8731 = vst [vmem:[#allocation152_spill] sm:$0xff] %v6711_v51 }
 0x4c9   : > { %v6713_v48 = vpop.permute.xlu0 %2348  ;;  %v6715_v19 = vpop.permute.xlu2 %2364 }
 0x4ca   : > { %8732 = vst [vmem:[#allocation175_spill] sm:$0xff] %v6713_v48 }
 0x4cd   : > { %2466 = vrot.lane.b32.xlu1 %v6253_v36, %s3772_s26 }
 0x4cf   : > { %2470 = vrot.lane.b32.xlu0 %v6284_v55, %s3772_s26  ;;  %2468 = vrot.lane.b32.xlu2 %v6314_v33, %s3772_s26  ;;  %v6723_v60 = vpop.permute.xlu1 %2350 }
 0x4d1   : > { %v6725_v9 = vpop.permute.xlu0 %2354  ;;  %v6727_v32 = vpop.permute.xlu2 %2370 }
 0x4d5   : > { %2472 = vrot.lane.b32.xlu1 %v6334_v62, %s3772_s26 }
 0x4d7   : > { %2476 = vrot.lane.b32.xlu0 %v6351_v22, %s3772_s26  ;;  %2474 = vrot.lane.b32.xlu2 %v6330_v53, %s3772_s26  ;;  %v6735_v48 = vpop.permute.xlu1 %2356 }
 0x4d8   : > { %8733 = vst [vmem:[#allocation188_spill] sm:$0xff] %v6735_v48 }
 0x4d9   : > { %v6737_v55 = vpop.permute.xlu0 %2360  ;;  %v6739_v51 = vpop.permute.xlu2 %2376 }
 0x4dd   : > { %2478 = vrot.lane.b32.xlu1 %v6355_v52, %s3772_s26 }
 0x4df   : > { %2482 = vrot.lane.b32.xlu0 %v6743_v21, %s3772_s26  ;;  %2480 = vrot.lane.b32.xlu2 %v6745_v15, %s3772_s26  ;;  %v6751_v62 = vpop.permute.xlu1 %2362 }
 0x4e0   : > { %8736 = vst [vmem:[#allocation42_spill] sm:$0xff] %v6751_v62 }
 0x4e1   : > { %v6753_v53 = vpop.permute.xlu0 %2366  ;;  %v6755_v22 = vpop.permute.xlu2 %2382 }
 0x4e2   : > { %8737 = vst [vmem:[#allocation34_spill] sm:$0xff] %v6753_v53 }
 0x4e3   : > { %8738 = vst [vmem:[#allocation60_spill] sm:$0xff] %v6755_v22 }
 0x4e5   : > { %2516 = vrot.lane.b32.xlu1 %v6005_v59, %s3773_s27  ;;  %v8742_v59 = vld [vmem:[#allocation100_spill] sm:$0xff] }
 0x4e7   : > { %2520 = vrot.lane.b32.xlu0 %v6060_v45, %s3773_s27  ;;  %2518 = vrot.lane.b32.xlu2 %v6002_v61, %s3773_s27  ;;  %v6763_v52 = vpop.permute.xlu1 %2368 }
 0x4e8   : > { %8739 = vst [vmem:[#allocation87_spill] sm:$0xff] %v6763_v52 }
 0x4e9   : > { %v6765_v35 = vpop.permute.xlu0 %2372  ;;  %v6767_v49 = vpop.permute.xlu2 %2420 }
 0x4ea   : > { %8740 = vst [vmem:[#allocation93_spill] sm:$0xff] %v6765_v35 }
 0x4eb   : > { %8741 = vst [vmem:[#allocation129_spill] sm:$0xff] %v6767_v49  ;;  %v8752_v49 = vld [vmem:[#allocation30_spill] sm:$0xff] }
 0x4ed   : > { %2522 = vrot.lane.b32.xlu1 %v6057_v43, %s3773_s27 }
 0x4ef   : > { %2526 = vrot.lane.b32.xlu0 %v6087_v40, %s3773_s27  ;;  %2524 = vrot.lane.b32.xlu2 %v8742_v59, %s3773_s27  ;;  %v6775_v22 = vpop.permute.xlu1 %2374 }
 0x4f0   : > { %8743 = vst [vmem:[#allocation140_spill] sm:$0xff] %v6775_v22 }
 0x4f1   : > { %v6777_v12 = vpop.permute.xlu0 %2378  ;;  %v6779_v61 = vpop.permute.xlu2 %2426 }
 0x4f2   : > { %8744 = vst [vmem:[#allocation33_spill] sm:$0xff] %v6777_v12  ;;  %v8776_v12 = vld [vmem:[#allocation145_spill] sm:$0xff] }
 0x4f3   : > { %8745 = vst [vmem:[#allocation162_spill] sm:$0xff] %v6779_v61  ;;  %v8753_v61 = vld [vmem:[#allocation73_spill] sm:$0xff] }
 0x4f5   : > { %2528 = vrot.lane.b32.xlu1 %v8746_v54, %s3773_s27 }
 0x4f7   : > { %2532 = vrot.lane.b32.xlu0 %v8747_v8, %s3773_s27  ;;  %2530 = vrot.lane.b32.xlu2 %v8748_v17, %s3773_s27  ;;  %v6787_v57 = vpop.permute.xlu1 %2380 }
 0x4f8   : > { %8749 = vst [vmem:[#allocation173_spill] sm:$0xff] %v6787_v57  ;;  %v8758_v57 = vld [vmem:[#allocation136_spill] sm:$0xff] }
 0x4f9   : > { %v6789_v13 = vpop.permute.xlu0 %2384  ;;  %v6791_v5 = vpop.permute.xlu2 %2432 }
 0x4fa   : > { %8750 = vst [vmem:[#allocation177_spill] sm:$0xff] %v6789_v13  ;;  %v8759_v13 = vld [vmem:[#allocation144_spill] sm:$0xff] }
 0x4fb   : > { %8751 = vst [vmem:[#allocation199_spill] sm:$0xff] %v6791_v5  ;;  %v8760_v5 = vld [vmem:[#allocation168_spill] sm:$0xff] }
 0x4fd   : > { %2534 = vrot.lane.b32.xlu1 %v8752_v49, %s3773_s27 }
 0x4ff   : > { %2538 = vrot.lane.b32.xlu0 %v8753_v61, %s3773_s27  ;;  %2536 = vrot.lane.b32.xlu2 %v8754_v6, %s3773_s27  ;;  %v6799_v48 = vpop.permute.xlu1 %2386 }
 0x500   : > { %8755 = vst [vmem:[#allocation204_spill] sm:$0xff] %v6799_v48  ;;  %v8764_v48 = vld [vmem:[#allocation117_spill] sm:$0xff] }
 0x501   : > { %v6801_v44 = vpop.permute.xlu0 %2422  ;;  %v6803_v8 = vpop.permute.xlu2 %2438 }
 0x502   : > { %8756 = vst [vmem:[#allocation210_spill] sm:$0xff] %v6801_v44 }
 0x503   : > { %8757 = vst [vmem:[#allocation44_spill] sm:$0xff] %v6803_v8  ;;  %v8765_v8 = vld [vmem:[#allocation104_spill] sm:$0xff] }
 0x505   : > { %2540 = vrot.lane.b32.xlu1 %v8758_v57, %s3773_s27  ;;  %v8766_v57 = vld [vmem:[#allocation72_spill] sm:$0xff] }
 0x507   : > { %2544 = vrot.lane.b32.xlu0 %v8759_v13, %s3773_s27  ;;  %2542 = vrot.lane.b32.xlu2 %v8760_v5, %s3773_s27  ;;  %v6811_v49 = vpop.permute.xlu1 %2424 }
 0x508   : > { %8761 = vst [vmem:[#allocation64_spill] sm:$0xff] %v6811_v49  ;;  %v8769_v49 = vld [vmem:[#allocation77_spill] sm:$0xff] }
 0x509   : > { %v6813_v61 = vpop.permute.xlu0 %2428  ;;  %v6815_v6 = vpop.permute.xlu2 %2444 }
 0x50a   : > { %8762 = vst [vmem:[#allocation75_spill] sm:$0xff] %v6813_v61 }
 0x50b   : > { %8763 = vst [vmem:[#allocation71_spill] sm:$0xff] %v6815_v6  ;;  %v8770_v6 = vld [vmem:[#allocation186_spill] sm:$0xff] }
 0x50d   : > { %2546 = vrot.lane.b32.xlu1 %v8764_v48, %s3773_s27  ;;  %v8771_v48 = vld [vmem:[#allocation161_spill] sm:$0xff] }
 0x50f   : > { %2550 = vrot.lane.b32.xlu0 %v8765_v8, %s3773_s27  ;;  %2548 = vrot.lane.b32.xlu2 %v8766_v57, %s3773_s27  ;;  %v6823_v44 = vpop.permute.xlu1 %2430 }
 0x510   : > { %8767 = vst [vmem:[#allocation106_spill] sm:$0xff] %v6823_v44  ;;  %v8774_v44 = vld [vmem:[#allocation169_spill] sm:$0xff] }
 0x511   : > { %v6825_v13 = vpop.permute.xlu0 %2434  ;;  %v6827_v5 = vpop.permute.xlu2 %2450 }
 0x512   : > { %8768 = vst [vmem:[#allocation127_spill] sm:$0xff] %v6825_v13  ;;  %v8775_v13 = vld [vmem:[#allocation118_spill] sm:$0xff] }
 0x515   : > { %2552 = vrot.lane.b32.xlu1 %v8769_v49, %s3773_s27 }
 0x517   : > { %2556 = vrot.lane.b32.xlu0 %v8770_v6, %s3773_s27  ;;  %2554 = vrot.lane.b32.xlu2 %v8771_v48, %s3773_s27  ;;  %v6835_v61 = vpop.permute.xlu1 %2436 }
 0x518   : > { %8772 = vst [vmem:[#allocation131_spill] sm:$0xff] %v6835_v61  ;;  %v8779_v61 = vld [vmem:[#allocation185_spill] sm:$0xff] }
 0x519   : > { %v6837_v8 = vpop.permute.xlu0 %2440  ;;  %v6839_v57 = vpop.permute.xlu2 %2456 }
 0x51a   : > { %8773 = vst [vmem:[#allocation153_spill] sm:$0xff] %v6837_v8  ;;  %v8780_v8 = vld [vmem:[#allocation74_spill] sm:$0xff] }
 0x51d   : > { %2558 = vrot.lane.b32.xlu1 %v8774_v44, %s3773_s27 }
 0x51f   : > { %2562 = vrot.lane.b32.xlu0 %v8775_v13, %s3773_s27  ;;  %2560 = vrot.lane.b32.xlu2 %v8776_v12, %s3773_s27  ;;  %v6847_v10 = vpop.permute.xlu1 %2442 }
 0x520   : > { %8777 = vst [vmem:[#allocation58_spill] sm:$0xff] %v6847_v10  ;;  %v8784_v10 = vld [vmem:[#allocation139_spill] sm:$0xff] }
 0x521   : > { %v6849_v22 = vpop.permute.xlu0 %2446  ;;  %v6851_v35 = vpop.permute.xlu2 %2462 }
 0x522   : > { %8778 = vst [vmem:[#allocation70_spill] sm:$0xff] %v6851_v35 }
 0x525   : > { %2564 = vrot.lane.b32.xlu1 %v8779_v61, %s3773_s27  ;;  %v8785_v61 = vld [vmem:[#allocation59_spill] sm:$0xff] }
 0x527   : > { %2568 = vrot.lane.b32.xlu0 %v8780_v8, %s3773_s27  ;;  %2566 = vrot.lane.b32.xlu2 %v8781_v50, %s3773_s27  ;;  %v6859_v52 = vpop.permute.xlu1 %2448  ;;  %v6873_v8 = vld [vmem:[#allocation2 + $0x190] sm:$0x3]  ;;  %v2206_v50 = vrot.slane %v6743_v21, 1 }
 0x528   : > { %8787 = vst [vmem:[#allocation45_spill] sm:$0xff] %v6873_v8 }
 0x529   : > { %v6861_v17 = vpop.permute.xlu0 %2452  ;;  %v6863_v53 = vpop.permute.xlu2 %2468 }
 0x52a   : > { %8782 = vst [vmem:[#allocation189_spill] sm:$0xff] %v6861_v17 }
 0x52b   : > { %8783 = vst [vmem:[#allocation198_spill] sm:$0xff] %v6863_v53  ;;  %v2205_v53 = vrot.slane %v6745_v15, 1 }
 0x52d   : > { %2570 = vrot.lane.b32.xlu1 %v8784_v10, %s3773_s27  ;;  %v2208_v10 = vrot.slane %v6873_v8, 1  ;;  %v6883_v62 = vsel %vm434_vm2, %v2205_v53, %v2206_v50 }
 0x52e   : > { %8789 = vst [vmem:[#allocation157_spill] sm:$0xff] %v6883_v62 }
 0x52f   : > { %2574 = vrot.lane.b32.xlu0 %v6371_v11, %s3773_s27  ;;  %2572 = vrot.lane.b32.xlu2 %v8785_v61, %s3773_s27  ;;  %v6871_v35 = vpop.permute.xlu1 %2454  ;;  %v6888_v11 = vsel %vm434_vm2, %v2206_v50, %v2208_v10 }
 0x530   : > { %8786 = vst [vmem:[#allocation201_spill] sm:$0xff] %v6871_v35 }
 0x531   : > { %v6876_v30 = vpop.permute.xlu0 %2458  ;;  %v6878_v17 = vpop.permute.xlu2 %2474  ;;  %8790 = vst [vmem:[#allocation86_spill] sm:$0xff] %v6888_v11 }
 0x532   : > { %8788 = vst [vmem:[#allocation51_spill] sm:$0xff] %v6878_v17 }
 0x535   : > { %2576 = vrot.lane.b32.xlu1 %v6883_v62, %s3773_s27  ;;  %v8796_v62 = vld [vmem:[#allocation98_spill] sm:$0xff] }
 0x537   : > { %2612 = vrot.lane.b32.xlu0 %v6387_v14, %s3774_s28  ;;  %2578 = vrot.lane.b32.xlu2 %v6888_v11, %s3773_s27  ;;  %v6894_v21 = vpop.permute.xlu1 %2460  ;;  %v8795_v11 = vld [vmem:[#allocation78_spill] sm:$0xff] }
 0x539   : > { %v6896_v15 = vpop.permute.xlu0 %2464  ;;  %v6898_v8 = vpop.permute.xlu2 %2480 }
 0x53a   : > { %8791 = vst [vmem:[#allocation94_spill] sm:$0xff] %v6898_v8 }
 0x53d   : > { %2614 = vrot.lane.b32.xlu1 %v6384_v28, %s3774_s28 }
 0x53f   : > { %2618 = vrot.lane.b32.xlu0 %v6409_v31, %s3774_s28  ;;  %2616 = vrot.lane.b32.xlu2 %v6400_v41, %s3774_s28  ;;  %v6906_v50 = vpop.permute.xlu1 %2466 }
 0x541   : > { %v6908_v14 = vpop.permute.xlu0 %2470  ;;  %v6910_v10 = vpop.permute.xlu2 %2518 }
 0x542   : > { %8792 = vst [vmem:[#allocation108_spill] sm:$0xff] %v6910_v10 }
 0x545   : > { %2620 = vrot.lane.b32.xlu1 %v6406_v18, %s3774_s28 }
 0x547   : > { %2624 = vrot.lane.b32.xlu0 %v6432_v47, %s3774_s28  ;;  %2622 = vrot.lane.b32.xlu2 %v6423_v3, %s3774_s28  ;;  %v6918_v28 = vpop.permute.xlu1 %2472 }
 0x549   : > { %v6920_v53 = vpop.permute.xlu0 %2476  ;;  %v6922_v8 = vpop.permute.xlu2 %2524 }
 0x54a   : > { %8793 = vst [vmem:[#allocation116_spill] sm:$0xff] %v6920_v53 }
 0x54b   : > { %8794 = vst [vmem:[#allocation141_spill] sm:$0xff] %v6922_v8  ;;  %v8800_v8 = vld [vmem:[#allocation95_spill] sm:$0xff] }
 0x54d   : > { %2626 = vrot.lane.b32.xlu1 %v8795_v11, %s3774_s28 }
 0x54f   : > { %2630 = vrot.lane.b32.xlu0 %v6456_v56, %s3774_s28  ;;  %2628 = vrot.lane.b32.xlu2 %v8796_v62, %s3774_s28  ;;  %v6930_v61 = vpop.permute.xlu1 %2478 }
 0x550   : > { %8797 = vst [vmem:[#allocation49_spill] sm:$0xff] %v6930_v61  ;;  %v8804_v61 = vld [vmem:[#allocation83_spill] sm:$0xff] }
 0x551   : > { %v6932_v10 = vpop.permute.xlu0 %2482  ;;  %v6934_v35 = vpop.permute.xlu2 %2530 }
 0x552   : > { %8798 = vst [vmem:[#allocation155_spill] sm:$0xff] %v6932_v10  ;;  %v8805_v10 = vld [vmem:[#allocation142_spill] sm:$0xff] }
 0x553   : > { %8799 = vst [vmem:[#allocation178_spill] sm:$0xff] %v6934_v35 }
 0x555   : > { %2632 = vrot.lane.b32.xlu1 %v6453_v29, %s3774_s28 }
 0x557   : > { %2636 = vrot.lane.b32.xlu0 %v6481_v16, %s3774_s28  ;;  %2634 = vrot.lane.b32.xlu2 %v8800_v8, %s3774_s28  ;;  %v6942_v53 = vpop.permute.xlu1 %2516 }
 0x558   : > { %8801 = vst [vmem:[#allocation191_spill] sm:$0xff] %v6942_v53 }
 0x559   : > { %v6944_v56 = vpop.permute.xlu0 %2520  ;;  %v6946_v62 = vpop.permute.xlu2 %2536 }
 0x55a   : > { %8802 = vst [vmem:[#allocation197_spill] sm:$0xff] %v6944_v56 }
 0x55b   : > { %8803 = vst [vmem:[#allocation205_spill] sm:$0xff] %v6946_v62  ;;  %v8808_v62 = vld [vmem:[#allocation99_spill] sm:$0xff] }
 0x55d   : > { %2638 = vrot.lane.b32.xlu1 %v8804_v61, %s3774_s28 }
 0x55f   : > { %2642 = vrot.lane.b32.xlu0 %v6507_v42, %s3774_s28  ;;  %2640 = vrot.lane.b32.xlu2 %v8805_v10, %s3774_s28  ;;  %v6954_v35 = vpop.permute.xlu1 %2522 }
 0x560   : > { %8806 = vst [vmem:[#allocation46_spill] sm:$0xff] %v6954_v35  ;;  %v8812_v35 = vld [vmem:[#allocation125_spill] sm:$0xff] }
 0x561   : > { %v6956_v16 = vpop.permute.xlu0 %2526  ;;  %v6958_v8 = vpop.permute.xlu2 %2542 }
 0x562   : > { %8807 = vst [vmem:[#allocation48_spill] sm:$0xff] %v6956_v16 }
 0x565   : > { %2644 = vrot.lane.b32.xlu1 %v6504_v38, %s3774_s28  ;;  %v8813_v38 = vld [vmem:[#allocation61_spill] sm:$0xff] }
 0x567   : > { %2648 = vrot.lane.b32.xlu0 %v6532_v63, %s3774_s28  ;;  %2646 = vrot.lane.b32.xlu2 %v8808_v62, %s3774_s28  ;;  %v6966_v61 = vpop.permute.xlu1 %2528 }
 0x568   : > { %8809 = vst [vmem:[#allocation68_spill] sm:$0xff] %v6966_v61 }
 0x569   : > { %v6968_v42 = vpop.permute.xlu0 %2532  ;;  %v6970_v10 = vpop.permute.xlu2 %2548 }
 0x56a   : > { %8810 = vst [vmem:[#allocation91_spill] sm:$0xff] %v6968_v42  ;;  %v8816_v42 = vld [vmem:[#allocation110_spill] sm:$0xff] }
 0x56b   : > { %8811 = vst [vmem:[#allocation92_spill] sm:$0xff] %v6970_v10 }
 0x56d   : > { %2650 = vrot.lane.b32.xlu1 %v8812_v35, %s3774_s28 }
 0x56f   : > { %2654 = vrot.lane.b32.xlu0 %v6558_v39, %s3774_s28  ;;  %2652 = vrot.lane.b32.xlu2 %v8813_v38, %s3774_s28  ;;  %v6978_v16 = vpop.permute.xlu1 %2534 }
 0x570   : > { %8814 = vst [vmem:[#allocation22_spill] sm:$0xff] %v6978_v16  ;;  %v8818_v16 = vld [vmem:[#allocation135_spill] sm:$0xff] }
 0x571   : > { %v6980_v56 = vpop.permute.xlu0 %2538  ;;  %v6982_v62 = vpop.permute.xlu2 %2554 }
 0x572   : > { %8815 = vst [vmem:[#allocation164_spill] sm:$0xff] %v6980_v56 }
 0x575   : > { %2656 = vrot.lane.b32.xlu1 %v6555_v37, %s3774_s28 }
 0x577   : > { %2660 = vrot.lane.b32.xlu0 %v6581_v25, %s3774_s28  ;;  %2658 = vrot.lane.b32.xlu2 %v8816_v42, %s3774_s28  ;;  %v6990_v61 = vpop.permute.xlu1 %2540 }
 0x578   : > { %8817 = vst [vmem:[#allocation176_spill] sm:$0xff] %v6990_v61 }
 0x579   : > { %v2545_v29 = vpop.permute.xlu0 %2544  ;;  %v6992_v53 = vpop.permute.xlu2 %2560 }
 0x57d   : > { %2662 = vrot.lane.b32.xlu1 %v8818_v16, %s3774_s28 }
 0x57f   : > { %2666 = vrot.lane.b32.xlu0 %v6607_v0, %s3774_s28  ;;  %2664 = vrot.lane.b32.xlu2 %v6598_v1, %s3774_s28  ;;  %v7000_v56 = vpop.permute.xlu1 %2546  ;;  %v7020_v1 = vld [vmem:[#allocation2 + $0x30] sm:$0xff] }
 0x580   : > { %8820 = vst [vmem:[#allocation54_spill] sm:$0xff] %v7020_v1 }
 0x581   : > { %v7002_v10 = vpop.permute.xlu0 %2550  ;;  %v7004_v17 = vpop.permute.xlu2 %2566 }
 0x582   : > { %8819 = vst [vmem:[#allocation206_spill] sm:$0xff] %v7002_v10 }
 0x585   : > { %2668 = vrot.lane.b32.xlu1 %v6604_v26, %s3774_s28 }
 0x587   : > { %2836 = vrot.lane.b32.xlu0 %v8769_v49, %s3776_s30  ;;  %2740 = vrot.lane.b32.xlu2 %v6255_v34, %s3775_s29  ;;  %v7012_v61 = vpop.permute.xlu1 %2552 }
 0x589   : > { %v2557_v0 = vpop.permute.xlu0 %2556  ;;  %v7014_v16 = vpop.permute.xlu2 %2572 }
 0x58d   : > { %2932 = vrot.lane.b32.xlu1 %v6532_v63, %s3777_s6 }
 0x58f   : > { %2804 = vrot.lane.b32.xlu0 %v6060_v45, %s3776_s30  ;;  %2708 = vrot.lane.b32.xlu2 %v7020_v1, %s3775_s29  ;;  %v7024_v49 = vpop.permute.xlu1 %2558 }
 0x591   : > { %v7026_v26 = vpop.permute.xlu0 %2562  ;;  %v7028_v10 = vpop.permute.xlu2 %2578 }
 0x592   : > { %8821 = vst [vmem:[#allocation69_spill] sm:$0xff] %v7028_v10  ;;  %v7046_v10 = vld [vmem:[#allocation2 + $0x38] sm:$0xff] }
 0x593   : > { %8822 = vst [vmem:[#allocation109_spill] sm:$0xff] %v7046_v10 }
 0x595   : > { %2742 = vrot.lane.b32.xlu1 %v6219_v4, %s3775_s29 }
 0x597   : > { %2838 = vrot.lane.b32.xlu0 %v8771_v48, %s3776_s30  ;;  %2900 = vrot.lane.b32.xlu2 %v6400_v41, %s3777_s6  ;;  %v7036_v45 = vpop.permute.xlu1 %2564 }
 0x599   : > { %v7038_v63 = vpop.permute.xlu0 %2568  ;;  %v7040_v1 = vpop.permute.xlu2 %2616 }
 0x59d   : > { %2934 = vrot.lane.b32.xlu1 %v8812_v35, %s3777_s6 }
 0x59f   : > { %2806 = vrot.lane.b32.xlu0 %v6057_v43, %s3776_s30  ;;  %2710 = vrot.lane.b32.xlu2 %v7046_v10, %s3775_s29  ;;  %v7050_v4 = vpop.permute.xlu1 %2570 }
 0x5a1   : > { %v7052_v41 = vpop.permute.xlu0 %2574  ;;  %v7054_v48 = vpop.permute.xlu2 %2622 }
 0x5a2   : > { %8823 = vst [vmem:[#allocation130_spill] sm:$0xff] %v7052_v41  ;;  %v7072_v41 = vld [vmem:[#allocation2 + $0x48] sm:$0xff] }
 0x5a3   : > { %8824 = vst [vmem:[#allocation165_spill] sm:$0xff] %v7054_v48 }
 0x5a4   : > { %8827 = vst [vmem:[#allocation47_spill] sm:$0xff] %v7072_v41 }
 0x5a5   : > { %2744 = vrot.lane.b32.xlu1 %v6288_v46, %s3775_s29 }
 0x5a7   : > { %2840 = vrot.lane.b32.xlu0 %v8770_v6, %s3776_s30  ;;  %2902 = vrot.lane.b32.xlu2 %v6409_v31, %s3777_s6  ;;  %v7062_v43 = vpop.permute.xlu1 %2576 }
 0x5a8   : > { %8825 = vst [vmem:[#allocation192_spill] sm:$0xff] %v7062_v43  ;;  %v8830_v43 = vld [vmem:[#allocation84_spill] sm:$0xff] }
 0x5a9   : > { %v7064_v35 = vpop.permute.xlu0 %2612  ;;  %v7066_v10 = vpop.permute.xlu2 %2628 }
 0x5aa   : > { %8826 = vst [vmem:[#allocation200_spill] sm:$0xff] %v7066_v10 }
 0x5ad   : > { %2936 = vrot.lane.b32.xlu1 %v8813_v38, %s3777_s6  ;;  %v3010_v38 = vsel %vm225_vm0, %v6182_v7, %v8830_v43 }
 0x5af   : > { %2808 = vrot.lane.b32.xlu0 %v8742_v59, %s3776_s30  ;;  %2712 = vrot.lane.b32.xlu2 %v7072_v41, %s3775_s29  ;;  %v7076_v46 = vpop.permute.xlu1 %2614  ;;  %v3042_v59 = vsel %vm1422_vm6, %v3010_v38, %v6691_v2  ;;  %v3019_v38 = vsel %vm225_vm0, %v6278_v23, %v6629_v24 }
 0x5b1   : > { %v7078_v31 = vpop.permute.xlu0 %2618  ;;  %v7080_v6 = vpop.permute.xlu2 %2634 }
 0x5b2   : > { %8828 = vst [vmem:[#allocation85_spill] sm:$0xff] %v7078_v31 }
 0x5b3   : > { %8829 = vst [vmem:[#allocation111_spill] sm:$0xff] %v7080_v6  ;;  %v3074_v6 = vsel %vm1455_vm7, %v3042_v59, %v6859_v52 }
 0x5b4   : > { %v3106_v41 = vsel %vm1488_vm9, %v3074_v6, %v2545_v29 }
 0x5b5   : > { %2746 = vrot.lane.b32.xlu1 %v6278_v23, %s3775_s29 }
 0x5b7   : > { %2842 = vrot.lane.b32.xlu0 %v8774_v44, %s3776_s30  ;;  %2904 = vrot.lane.b32.xlu2 %v6406_v18, %s3777_s6  ;;  %v7093_v10 = vpop.permute.xlu1 %2620  ;;  %v7107_v18 = vld [vmem:[#allocation2 + $0x50] sm:$0xff] }
 0x5b9   : > { %v7098_v48 = vpop.permute.xlu0 %2624  ;;  %v2641_v31 = vpop.permute.xlu2 %2640 }
 0x5ba   : > { %v7101_v7 = vsel %vm1521_vm8, %v3106_v41, %v2641_v31 }
 0x5bd   : > { %2938 = vrot.lane.b32.xlu1 %v6558_v39, %s3777_s6  ;;  %v3016_v39 = vsel %vm225_vm0, %v6255_v34, %v6614_v58  ;;  %v7138_v58 = vld [vmem:[#allocation2 + $0x98] sm:$0xff] }
 0x5bf   : > { %2810 = vrot.lane.b32.xlu0 %v6087_v40, %s3776_s30  ;;  %2714 = vrot.lane.b32.xlu2 %v7107_v18, %s3775_s29  ;;  %v7111_v44 = vpop.permute.xlu1 %2626  ;;  %v3048_v40 = vsel %vm1422_vm6, %v3016_v39, %v6715_v19  ;;  %v8831_v19 = vld [vmem:[#allocation134_spill] sm:$0xff] }
 0x5c0   : > { %v3080_v41 = vsel %vm1455_vm7, %v3048_v40, %v6894_v21  ;;  %v7147_v21 = vld [vmem:[#allocation2 + $0xb0] sm:$0xff]  ;;  %v7165_v40 = vld [vmem:[#allocation2 + $0x60] sm:$0xff] }
 0x5c1   : > { %v7113_v29 = vpop.permute.xlu0 %2630  ;;  %v7115_v2 = vpop.permute.xlu2 %2646 }
 0x5c5   : > { %2748 = vrot.lane.b32.xlu1 %v6259_v27, %s3775_s29  ;;  %v3112_v27 = vsel %vm1488_vm9, %v3080_v41, %v2557_v0  ;;  %v8832_v0 = vld [vmem:[#allocation180_spill] sm:$0xff] }
 0x5c6   : > { %v3011_v6 = vsel %vm225_vm0, %v7147_v21, %v8832_v0 }
 0x5c7   : > { %2844 = vrot.lane.b32.xlu0 %v8776_v12, %s3776_s30  ;;  %2906 = vrot.lane.b32.xlu2 %v6423_v3, %s3777_s6  ;;  %v7128_v52 = vpop.permute.xlu1 %2632  ;;  %v3009_v12 = vsel %vm225_vm0, %v7138_v58, %v8831_v19  ;;  %v3043_v39 = vsel %vm1422_vm6, %v3011_v6, %v6725_v9  ;;  %v3255_v6 = vld [vmem:[%s7947_s3 + $0x18] sm:$0xff] }
 0x5c8   : > { %v3041_v3 = vsel %vm1422_vm6, %v3009_v12, %v6723_v60  ;;  %v3051_v60 = vsel %vm1422_vm6, %v3019_v38, %v6727_v32  ;;  %v3075_v24 = vsel %vm1455_vm7, %v3043_v39, %v6827_v5  ;;  %v7188_v5 = vld [vmem:[#allocation2 + $0xd8] sm:$0xff]  ;;  %v8834_v38 = vld [vmem:[#allocation159_spill] sm:$0xff]  ;;  %v8835_v39 = vld [vmem:[#allocation42_spill] sm:$0xff] }
 0x5c9   : > { %v7133_v43 = vpop.permute.xlu0 %2636  ;;  %v2653_v31 = vpop.permute.xlu2 %2652  ;;  %v3073_v59 = vsel %vm1455_vm7, %v3041_v3, %v6849_v22  ;;  %v3083_v9 = vsel %vm1455_vm7, %v3051_v60, %v6906_v50  ;;  %v8833_v50 = vld [vmem:[#allocation43_spill] sm:$0xff] }
 0x5ca   : > { %v7136_v34 = vsel %vm1521_vm8, %v3112_v27, %v2653_v31 }
 0x5cd   : > { %2940 = vrot.lane.b32.xlu1 %v6555_v37, %s3777_s6  ;;  %v3105_v37 = vsel %vm1488_vm9, %v3073_v59, %v6958_v8  ;;  %v3107_v8 = vsel %vm1488_vm9, %v3075_v24, %v7000_v56  ;;  %v3014_v56 = vsel %vm225_vm0, %v7188_v5, %v8833_v50  ;;  %v8836_v24 = vld [vmem:[#allocation137_spill] sm:$0xff]  ;;  %v7253_v50 = vld [vmem:[#allocation2 + $0x68] sm:$0xff] }
 0x5ce   : > { %v3046_v19 = vsel %vm1422_vm6, %v3014_v56, %v6737_v55  ;;  %v3256_v55 = vld [vmem:[%s7947_s3 + $0x20] sm:$0xf] }
 0x5cf   : > { %2812 = vrot.lane.b32.xlu0 %v8746_v54, %s3776_s30  ;;  %2716 = vrot.lane.b32.xlu2 %v7165_v40, %s3775_s29  ;;  %v2639_v23 = vpop.permute.xlu1 %2638  ;;  %v3115_v54 = vsel %vm1488_vm9, %v3083_v9, %v7026_v26  ;;  %v3022_v26 = vsel %vm225_vm0, %v6314_v33, %v6641_v20  ;;  %v3078_v3 = vsel %vm1455_vm7, %v3046_v19, %v6839_v57 }
 0x5d0   : > { %v7174_v32 = vsel %vm1521_vm8, %v3105_v37, %v2639_v23  ;;  %v3054_v12 = vsel %vm1422_vm6, %v3022_v26, %v6739_v51  ;;  %v3110_v51 = vsel %vm1488_vm9, %v3078_v3, %v7012_v61  ;;  %3676 = vmatpush.msk.msra.mxu3 %vm1759_vm5, %v3256_v55  ;;  %3634 = vmatpush.msk.msra.mxu1 %vm1759_vm5, %v3256_v55  ;;  %v3254_v61 = vld [vmem:[%s7947_s3 + $0x10] sm:$0xff]  ;;  %v3253_v37 = vld [vmem:[%s7947_s3 + $0x8] sm:$0xff]  ;;  %v3741_v23 = vld [vmem:[#allocation2 + $0xf8] sm:$0xff] }
 0x5d1   : > { %v2643_v22 = vpop.permute.xlu0 %2642  ;;  %v2659_v41 = vpop.permute.xlu2 %2658  ;;  %v3086_v20 = vsel %vm1455_vm7, %v3054_v12, %v6918_v28  ;;  %v3017_v9 = vsel %vm225_vm0, %v3741_v23, %v8836_v24  ;;  %v8839_v26 = vld [vmem:[#allocation70_spill] sm:$0xff]  ;;  %v8844_v23 = vld [vmem:[#allocation185_spill] sm:$0xff] }
 0x5d2   : > { %v7181_v27 = vsel %vm1521_vm8, %v3107_v8, %v2643_v22  ;;  %v7184_v31 = vsel %vm1521_vm8, %v3115_v54, %v2659_v41  ;;  %3677 = vmatpush.msra.mxu3 %v3255_v6  ;;  %3372 = vmatpush.msra.mxu1 %v3255_v6  ;;  %v8837_v54 = vld [vmem:[#allocation34_spill] sm:$0xff] }
 0x5d3   : > { %v3049_v22 = vsel %vm1422_vm6, %v3017_v9, %v8837_v54  ;;  %v8845_v24 = vld [vmem:[#allocation198_spill] sm:$0xff] }
 0x5d4   : > { %3678 = vmatpush.msra.mxu3 %v3254_v61  ;;  %3373 = vmatpush.msra.mxu1 %v3254_v61  ;;  %v3081_v19 = vsel %vm1455_vm7, %v3049_v22, %v8839_v26  ;;  %v3744_v61 = vld [vmem:[#allocation2 + $0x120] sm:$0xff] }
 0x5d5   : > { %2750 = vrot.lane.b32.xlu1 %v6253_v36, %s3775_s29  ;;  %v3746_v26 = vld [vmem:[#allocation2 + $0x140] sm:$0xff] }
 0x5d6   : > { %3679 = vmatpush.msra.mxu3 %v3253_v37  ;;  %3374 = vmatpush.msra.mxu1 %v3253_v37 }
 0x5d7   : > { %2846 = vrot.lane.b32.xlu0 %v8775_v13, %s3776_s30  ;;  %2908 = vrot.lane.b32.xlu2 %v6432_v47, %s3777_s6  ;;  %v7204_v36 = vpop.permute.xlu1 %2644  ;;  %v3118_v13 = vsel %vm1488_vm9, %v3086_v20, %v7038_v63  ;;  %v7231_v63 = vld [vmem:[#allocation2 + $0xe0] sm:$0xff] }
 0x5d8   : > { %v3015_v59 = vsel %vm225_vm0, %v7231_v63, %v8834_v38 }
 0x5d9   : > { %v2649_v0 = vpop.permute.xlu0 %2648  ;;  %v2665_v47 = vpop.permute.xlu2 %2664  ;;  %v3047_v60 = vsel %vm1422_vm6, %v3015_v59, %v8835_v39  ;;  %v8843_v39 = vld [vmem:[#allocation93_spill] sm:$0xff] }
 0x5da   : > { %v7220_v57 = vsel %vm1521_vm8, %v3110_v51, %v2649_v0  ;;  %v7223_v28 = vsel %vm1521_vm8, %v3118_v13, %v2665_v47  ;;  %v3079_v8 = vsel %vm1455_vm7, %v3047_v60, %v6876_v30  ;;  %v3252_v30 = vld [vmem:[%s7947_s3] sm:$0xff]  ;;  %v3743_v51 = vld [vmem:[#allocation2 + $0x108] sm:$0xff]  ;;  %v8841_v47 = vld [vmem:[#allocation87_spill] sm:$0xff] }
 0x5db   : > { %v3111_v41 = vsel %vm1488_vm9, %v3079_v8, %v6982_v62  ;;  %v3113_v62 = vsel %vm1488_vm9, %v3081_v19, %v7024_v49  ;;  %3680 = vmatpush.msra.mxu3 %v3252_v30  ;;  %3375 = vmatpush.msra.mxu1 %v3252_v30  ;;  %v8840_v13 = vld [vmem:[#allocation102_spill] sm:$0xff]  ;;  %v8842_v49 = vld [vmem:[#allocation81_spill] sm:$0xff] }
 0x5dc   : > { %v3018_v0 = vsel %vm225_vm0, %v3743_v51, %v8840_v13  ;;  %v3020_v38 = vsel %vm225_vm0, %v3744_v61, %v8842_v49  ;;  %v8848_v19 = vld [vmem:[#allocation66_spill] sm:$0xff] }
 0x5dd   : > { %2942 = vrot.lane.b32.xlu1 %v8816_v42, %s3777_s6  ;;  %v8838_v42 = vld [vmem:[#allocation101_spill] sm:$0xff]  ;;  %v3050_v6 = vsel %vm1422_vm6, %v3018_v0, %v8841_v47  ;;  %v3052_v60 = vsel %vm1422_vm6, %v3020_v38, %v8843_v39  ;;  %v8850_v0 = vld [vmem:[#allocation167_spill] sm:$0xff]  ;;  %v7316_v47 = vld [vmem:[#allocation2 + $0x78] sm:$0xff] }
 0x5de   : > { %v3082_v59 = vsel %vm1455_vm7, %v3050_v6, %v6896_v15  ;;  %v3084_v9 = vsel %vm1455_vm7, %v3052_v60, %v8845_v24  ;;  %v8851_v6 = vld [vmem:[#allocation51_spill] sm:$0xff]  ;;  %v8852_v60 = vld [vmem:[#allocation126_spill] sm:$0xff]  ;;  %v8854_v24 = vld [vmem:[#allocation116_spill] sm:$0xff] }
 0x5df   : > { %2814 = vrot.lane.b32.xlu0 %v8838_v42, %s3776_s30  ;;  %2718 = vrot.lane.b32.xlu2 %v7253_v50, %s3775_s29  ;;  %v2651_v56 = vpop.permute.xlu1 %2650  ;;  %v3114_v37 = vsel %vm1488_vm9, %v3082_v59, %v6992_v53  ;;  %v3116_v15 = vsel %vm1488_vm9, %v3084_v9, %v7036_v45  ;;  %v8846_v42 = vld [vmem:[#allocation172_spill] sm:$0xff]  ;;  %v3748_v39 = vld [vmem:[#allocation2 + $0x150] sm:$0xff] }
 0x5e0   : > { %v7263_v12 = vsel %vm1521_vm8, %v3111_v41, %v2651_v56  ;;  %v3745_v41 = vld [vmem:[#allocation2 + $0x128] sm:$0xff] }
 0x5e1   : > { %v2655_v3 = vpop.permute.xlu0 %2654  ;;  %v7267_v20 = vpop.permute.xlu2 %2740  ;;  %v3021_v56 = vsel %vm225_vm0, %v3745_v41, %v8846_v42 }
 0x5e2   : > { %v7270_v55 = vsel %vm1521_vm8, %v3113_v62, %v2655_v3  ;;  %v3023_v62 = vsel %vm225_vm0, %v3746_v26, %v8848_v19  ;;  %v8849_v3 = vld [vmem:[#allocation33_spill] sm:$0xff] }
 0x5e3   : > { %v3055_v51 = vsel %vm1422_vm6, %v3023_v62, %v8849_v3  ;;  %v8858_v62 = vld [vmem:[#allocation188_spill] sm:$0xff] }
 0x5e4   : > { %v3087_v61 = vsel %vm1455_vm7, %v3055_v51, %v8851_v6  ;;  %v3750_v51 = vld [vmem:[#allocation2] sm:$0xff] }
 0x5e5   : > { %2752 = vrot.lane.b32.xlu1 %v6314_v33, %s3775_s29  ;;  %v3119_v49 = vsel %vm1488_vm9, %v3087_v61, %v7050_v4  ;;  %v8862_v61 = vld [vmem:[#allocation151_spill] sm:$0xff] }
 0x5e7   : > { %2848 = vrot.lane.b32.xlu0 %v8844_v23, %s3776_s30  ;;  %2910 = vrot.lane.b32.xlu2 %v8795_v11, %s3777_s6  ;;  %v2657_v33 = vpop.permute.xlu1 %2656  ;;  %v8847_v11 = vld [vmem:[#allocation140_spill] sm:$0xff]  ;;  %v8853_v23 = vld [vmem:[#allocation173_spill] sm:$0xff] }
 0x5e8   : > { %v7293_v8 = vsel %vm1521_vm8, %v3114_v37, %v2657_v33  ;;  %v3053_v30 = vsel %vm1422_vm6, %v3021_v56, %v8847_v11  ;;  %v3024_v37 = vsel %vm225_vm0, %v3748_v39, %v8852_v60  ;;  %v7346_v56 = vld [vmem:[#allocation2 + $0xc0] sm:$0xff]  ;;  %v8857_v11 = vld [vmem:[#allocation184_spill] sm:$0xff]  ;;  %v8863_v60 = vld [vmem:[#allocation135_spill] sm:$0xff] }
 0x5e9   : > { %v2661_v54 = vpop.permute.xlu0 %2660  ;;  %v2709_v22 = vpop.permute.xlu2 %2708  ;;  %v3085_v45 = vsel %vm1455_vm7, %v3053_v30, %v6908_v14  ;;  %v3056_v33 = vsel %vm1422_vm6, %v3024_v37, %v8853_v23  ;;  %v3012_v30 = vsel %vm225_vm0, %v7346_v56, %v8857_v11  ;;  %v8864_v37 = vld [vmem:[#allocation129_spill] sm:$0xff] }
 0x5ea   : > { %v7298_v53 = vsel %vm1521_vm8, %v3116_v15, %v2661_v54  ;;  %v3117_v13 = vsel %vm1488_vm9, %v3085_v45, %v7004_v17  ;;  %v3088_v9 = vsel %vm1455_vm7, %v3056_v33, %v8854_v24  ;;  %v8855_v15 = vld [vmem:[#allocation56_spill] sm:$0xff]  ;;  %v8856_v54 = vld [vmem:[#allocation98_spill] sm:$0xff]  ;;  %v8859_v45 = vld [vmem:[#allocation189_spill] sm:$0xff] }
 0x5eb   : > { %v3120_v4 = vsel %vm1488_vm9, %v3088_v9, %v7014_v16  ;;  %v3044_v16 = vsel %vm1422_vm6, %v3012_v30, %v8858_v62  ;;  %v8865_v24 = vld [vmem:[#allocation191_spill] sm:$0xff] }
 0x5ec   : > { %v3076_v3 = vsel %vm1455_vm7, %v3044_v16, %v8859_v45  ;;  %v7387_v45 = vld [vmem:[#allocation2 + $0xc8] sm:$0xff] }
 0x5ed   : > { %2944 = vrot.lane.b32.xlu1 %v6581_v25, %s3777_s6 }
 0x5ef   : > { %2816 = vrot.lane.b32.xlu0 %v8850_v0, %s3776_s30  ;;  %2720 = vrot.lane.b32.xlu2 %v7316_v47, %s3775_s29  ;;  %v2663_v25 = vpop.permute.xlu1 %2662 }
 0x5f0   : > { %v7323_v14 = vsel %vm1521_vm8, %v3117_v13, %v2663_v25  ;;  %v8860_v13 = vld [vmem:[#allocation163_spill] sm:$0xff]  ;;  %v8861_v25 = vld [vmem:[#allocation92_spill] sm:$0xff] }
 0x5f1   : > { %v2667_v38 = vpop.permute.xlu0 %2666  ;;  %v2901_v17 = vpop.permute.xlu2 %2900  ;;  %v2996_v0 = vsel %vm225_vm0, %v3750_v51, %v8860_v13  ;;  %v3108_v6 = vsel %vm1488_vm9, %v3076_v3, %v8861_v25  ;;  %v8867_v3 = vld [vmem:[#allocation150_spill] sm:$0xff]  ;;  %v8871_v25 = vld [vmem:[#allocation201_spill] sm:$0xff] }
 0x5f2   : > { %v7328_v59 = vsel %vm1521_vm8, %v3119_v49, %v2667_v38  ;;  %v3028_v49 = vsel %vm1422_vm6, %v2996_v0, %v8862_v61  ;;  %v3140_v38 = vsel %vm1521_vm8, %v3108_v6, %v7204_v36  ;;  %v8869_v51 = vld [vmem:[#allocation38_spill] sm:$0xff]  ;;  %v8870_v0 = vld [vmem:[#allocation149_spill] sm:$0xff] }
 0x5f3   : > { %v3060_v23 = vsel %vm1455_vm7, %v3028_v49, %v8864_v37  ;;  %v3172_v33 = vsel %vm1554_vm10, %v3140_v38, %v7267_v20  ;;  %v8872_v49 = vld [vmem:[#allocation206_spill] sm:$0xff] }
 0x5f4   : > { %v3092_v9 = vsel %vm1488_vm9, %v3060_v23, %v8865_v24  ;;  %v3753_v37 = vld [vmem:[#allocation2 + $0x8] sm:$0xff] }
 0x5f5   : > { %2754 = vrot.lane.b32.xlu1 %v3746_v26, %s3775_s29  ;;  %v8873_v23 = vld [vmem:[#allocation122_spill] sm:$0xff] }
 0x5f7   : > { %2850 = vrot.lane.b32.xlu0 %v8855_v15, %s3776_s30  ;;  %2912 = vrot.lane.b32.xlu2 %v8856_v54, %s3777_s6  ;;  %v2669_v41 = vpop.permute.xlu1 %2668  ;;  %v8866_v15 = vld [vmem:[#allocation30_spill] sm:$0xff]  ;;  %v7374_v54 = vld [vmem:[#allocation2 + $0x80] sm:$0xff] }
 0x5f8   : > { %v7344_v42 = vsel %vm1521_vm8, %v3120_v4, %v2669_v41  ;;  %v3124_v41 = vsel %vm1521_vm8, %v3092_v9, %v7064_v35  ;;  %v3013_v35 = vsel %vm225_vm0, %v7387_v45, %v8867_v3  ;;  %v8874_v9 = vld [vmem:[#allocation65_spill] sm:$0xff] }
 0x5f9   : > { %v2837_v26 = vpop.permute.xlu0 %2836  ;;  %v2711_v19 = vpop.permute.xlu2 %2710  ;;  %v3156_v20 = vsel %vm1554_vm10, %v3124_v41, %v2709_v22  ;;  %v8868_v22 = vld [vmem:[#allocation74_spill] sm:$0xff] }
 0x5fa   : > { %v3204_v4 = vsel %vm1587_vm12, %v3172_v33, %v2837_v26  ;;  %v2997_v33 = vsel %vm225_vm0, %v3753_v37, %v8873_v23  ;;  %v8882_v23 = vld [vmem:[#allocation174_spill] sm:$0xff] }
 0x5fd   : > { %2946 = vrot.lane.b32.xlu1 %v8863_v60, %s3777_s6 }
 0x5ff   : > { %2818 = vrot.lane.b32.xlu0 %v8866_v15, %s3776_s30  ;;  %2722 = vrot.lane.b32.xlu2 %v7374_v54, %s3775_s29  ;;  %v2933_v36 = vpop.permute.xlu1 %2932  ;;  %v8875_v15 = vld [vmem:[#allocation182_spill] sm:$0xff] }
 0x600   : > { %v3236_v11 = vsel %vm1620_vm11, %v3204_v4, %v2933_v36  ;;  %v3029_v4 = vsel %vm1422_vm6, %v2997_v33, %v8874_v9  ;;  %v8876_v36 = vld [vmem:[#allocation210_spill] sm:$0xff]  ;;  %v8884_v9 = vld [vmem:[#allocation64_spill] sm:$0xff] }
 0x601   : > { %v2805_v30 = vpop.permute.xlu0 %2804  ;;  %v2903_v62 = vpop.permute.xlu2 %2902  ;;  %3651 = vmatmul.msk.f32.vlgmr.msra.gmra.mxu3 %vm1662_vm13, %v3236_v11  ;;  %v3061_v41 = vsel %vm1455_vm7, %v3029_v4, %v8876_v36  ;;  %v8877_v11 = vld [vmem:[#allocation108_spill] sm:$0xff] }
 0x602   : > { %v3188_v26 = vsel %vm1587_vm12, %v3156_v20, %v2805_v30  ;;  %v3093_v20 = vsel %vm1488_vm9, %v3061_v41, %v8877_v11  ;;  %v8878_v30 = vld [vmem:[#allocation115_spill] sm:$0xff]  ;;  %v8886_v11 = vld [vmem:[#allocation73_spill] sm:$0xff] }
 0x603   : > { %v3220_v16 = vsel %vm1620_vm11, %v3188_v26, %v2901_v17  ;;  %v3045_v17 = vsel %vm1422_vm6, %v3013_v35, %v8870_v0  ;;  %v7418_v26 = vld [vmem:[#allocation2 + $0x90] sm:$0xff]  ;;  %v3125_v3 = vsel %vm1521_vm8, %v3093_v20, %v7076_v46 }
 0x604   : > { %3635 = vmatmul.msk.f32.vlgmr.msra.gmra.mxu1 %vm1662_vm13, %v3220_v16  ;;  %v3077_v6 = vsel %vm1455_vm7, %v3045_v17, %v8871_v25  ;;  %v7430_v25 = vld [vmem:[#allocation2 + $0x158] sm:$0xff]  ;;  %v8879_v46 = vld [vmem:[#allocation139_spill] sm:$0xff] }
 0x605   : > { %2756 = vrot.lane.b32.xlu1 %v3748_v39, %s3775_s29  ;;  %v3109_v38 = vsel %vm1488_vm9, %v3077_v6, %v8872_v49 }
 0x606   : > { %v3141_v60 = vsel %vm1521_vm8, %v3109_v38, %v7115_v2  ;;  %v3756_v38 = vld [vmem:[#allocation2 + $0x18] sm:$0xff] }
 0x607   : > { %2852 = vrot.lane.b32.xlu0 %v8868_v22, %s3776_s30  ;;  %2914 = vrot.lane.b32.xlu2 %v8869_v51, %s3777_s6  ;;  %v2743_v13 = vpop.permute.xlu1 %2742  ;;  %v3157_v22 = vsel %vm1554_vm10, %v3125_v3, %v2711_v19  ;;  %v8880_v19 = vld [vmem:[#allocation132_spill] sm:$0xff] }
 0x608   : > { %v3173_v24 = vsel %vm1554_vm10, %v3141_v60, %v2743_v13  ;;  %v8881_v60 = vld [vmem:[#allocation147_spill] sm:$0xff] }
 0x609   : > { %v2839_v39 = vpop.permute.xlu0 %2838  ;;  %v2713_v61 = vpop.permute.xlu2 %2712 }
 0x60a   : > { %v3205_v2 = vsel %vm1587_vm12, %v3173_v24, %v2839_v39  ;;  %v8883_v24 = vld [vmem:[#allocation88_spill] sm:$0xff] }
 0x60d   : > { %2948 = vrot.lane.b32.xlu1 %v8875_v15, %s3777_s6  ;;  %v8885_v15 = vld [vmem:[#allocation197_spill] sm:$0xff] }
 0x60f   : > { %2820 = vrot.lane.b32.xlu0 %v8878_v30, %s3776_s30  ;;  %2724 = vrot.lane.b32.xlu2 %v7418_v26, %s3775_s29  ;;  %v2935_v16 = vpop.permute.xlu1 %2934 }
 0x610   : > { %v3237_v35 = vsel %vm1620_vm11, %v3205_v2, %v2935_v16 }
 0x611   : > { %v2807_v51 = vpop.permute.xlu0 %2806  ;;  %v2905_v13 = vpop.permute.xlu2 %2904  ;;  %3652 = vmatmul.msk.f32.gmra.mxu3 %vm1662_vm13, %v3237_v35 }
 0x612   : > { %v3189_v0 = vsel %vm1587_vm12, %v3157_v22, %v2807_v51  ;;  %v7463_v51 = vld [vmem:[#allocation2 + $0x168] sm:$0xff] }
 0x613   : > { %v3221_v17 = vsel %vm1620_vm11, %v3189_v0, %v2903_v62  ;;  %v2998_v62 = vsel %vm225_vm0, %v3756_v38, %v8881_v60  ;;  %v8891_v60 = vld [vmem:[#allocation82_spill] sm:$0xff] }
 0x614   : > { %3636 = vmatmul.msk.f32.gmra.mxu1 %vm1662_vm13, %v3221_v17  ;;  %v3030_v33 = vsel %vm1422_vm6, %v2998_v62, %v8882_v23  ;;  %v8892_v62 = vld [vmem:[#allocation162_spill] sm:$0xff] }
 0x615   : > { %2758 = vrot.lane.b32.xlu1 %v7430_v25, %s3775_s29  ;;  %v3062_v4 = vsel %vm1455_vm7, %v3030_v33, %v8884_v9  ;;  %v8893_v23 = vld [vmem:[#allocation46_spill] sm:$0xff]  ;;  %v8894_v9 = vld [vmem:[#allocation136_spill] sm:$0xff] }
 0x616   : > { %v3094_v36 = vsel %vm1488_vm9, %v3062_v4, %v8885_v15  ;;  %v3759_v4 = vld [vmem:[#allocation2 + $0xa8] sm:$0xff]  ;;  %v8895_v15 = vld [vmem:[#allocation85_spill] sm:$0xff] }
 0x617   : > { %2854 = vrot.lane.b32.xlu0 %v8879_v46, %s3776_s30  ;;  %2916 = vrot.lane.b32.xlu2 %v8880_v19, %s3777_s6  ;;  %v2745_v6 = vpop.permute.xlu1 %2744  ;;  %v3126_v20 = vsel %vm1521_vm8, %v3094_v36, %v7040_v1  ;;  %v8887_v1 = vld [vmem:[#allocation59_spill] sm:$0xff]  ;;  %v3758_v46 = vld [vmem:[#allocation2 + $0x20] sm:$0xff] }
 0x618   : > { %v3174_v37 = vsel %vm1554_vm10, %v7220_v57, %v2745_v6  ;;  %v3158_v30 = vsel %vm1554_vm10, %v3126_v20, %v2713_v61  ;;  %v8889_v19 = vld [vmem:[#allocation107_spill] sm:$0xff] }
 0x619   : > { %v2841_v39 = vpop.permute.xlu0 %2840  ;;  %v2715_v49 = vpop.permute.xlu2 %2714 }
 0x61a   : > { %v3206_v41 = vsel %vm1587_vm12, %v3174_v37, %v2841_v39  ;;  %v8890_v39 = vld [vmem:[#allocation183_spill] sm:$0xff] }
 0x61d   : > { %2950 = vrot.lane.b32.xlu1 %v8883_v24, %s3777_s6 }
 0x61f   : > { %2822 = vrot.lane.b32.xlu0 %v8886_v11, %s3776_s30  ;;  %2726 = vrot.lane.b32.xlu2 %v7138_v58, %s3775_s29  ;;  %v2937_v57 = vpop.permute.xlu1 %2936  ;;  %v8888_v58 = vld [vmem:[#allocation95_spill] sm:$0xff] }
 0x620   : > { %v3238_v2 = vsel %vm1620_vm11, %v3206_v41, %v2937_v57 }
 0x621   : > { %v2809_v16 = vpop.permute.xlu0 %2808  ;;  %v2907_v3 = vpop.permute.xlu2 %2906  ;;  %3653 = vmatmul.msk.f32.gmra.mxu3 %vm1662_vm13, %v3238_v2 }
 0x622   : > { %v3190_v35 = vsel %vm1587_vm12, %v3158_v30, %v2809_v16  ;;  %v7495_v16 = vld [vmem:[#allocation2 + $0x170] sm:$0xff] }
 0x623   : > { %v3222_v22 = vsel %vm1620_vm11, %v3190_v35, %v2905_v13  ;;  %v2999_v13 = vsel %vm225_vm0, %v3758_v46, %v8889_v19  ;;  %v8896_v35 = vld [vmem:[#allocation181_spill] sm:$0xff] }
 0x624   : > { %3637 = vmatmul.msk.f32.gmra.mxu1 %vm1662_vm13, %v3222_v22  ;;  %v3031_v38 = vsel %vm1422_vm6, %v2999_v13, %v8890_v39  ;;  %v8900_v19 = vld [vmem:[#allocation89_spill] sm:$0xff]  ;;  %v8902_v39 = vld [vmem:[#allocation75_spill] sm:$0xff] }
 0x625   : > { %2760 = vrot.lane.b32.xlu1 %v7463_v51, %s3775_s29  ;;  %v3063_v37 = vsel %vm1455_vm7, %v3031_v38, %v8892_v62 }
 0x626   : > { %v3095_v33 = vsel %vm1488_vm9, %v3063_v37, %v8893_v23  ;;  %v8904_v23 = vld [vmem:[#allocation168_spill] sm:$0xff] }
 0x627   : > { %2856 = vrot.lane.b32.xlu0 %v8887_v1, %s3776_s30  ;;  %2918 = vrot.lane.b32.xlu2 %v8888_v58, %s3777_s6  ;;  %v2747_v61 = vpop.permute.xlu1 %2746  ;;  %v3127_v36 = vsel %vm1521_vm8, %v3095_v33, %v8895_v15 }
 0x628   : > { %v3175_v6 = vsel %vm1554_vm10, %v7263_v12, %v2747_v61  ;;  %v3159_v11 = vsel %vm1554_vm10, %v3127_v36, %v2715_v49  ;;  %v8897_v49 = vld [vmem:[#allocation190_spill] sm:$0xff] }
 0x629   : > { %v2843_v0 = vpop.permute.xlu0 %2842  ;;  %v2717_v17 = vpop.permute.xlu2 %2716  ;;  %v8898_v61 = vld [vmem:[#allocation146_spill] sm:$0xff] }
 0x62a   : > { %v3207_v24 = vsel %vm1587_vm12, %v3175_v6, %v2843_v0  ;;  %v8899_v0 = vld [vmem:[#allocation54_spill] sm:$0xff]  ;;  %v8901_v6 = vld [vmem:[#allocation37_spill] sm:$0xff] }
 0x62d   : > { %2952 = vrot.lane.b32.xlu1 %v8891_v60, %s3777_s6  ;;  %v8903_v60 = vld [vmem:[#allocation141_spill] sm:$0xff] }
 0x62f   : > { %2824 = vrot.lane.b32.xlu0 %v8894_v9, %s3776_s30  ;;  %2728 = vrot.lane.b32.xlu2 %v3759_v4, %s3775_s29  ;;  %v2939_v12 = vpop.permute.xlu1 %2938 }
 0x630   : > { %v3239_v41 = vsel %vm1620_vm11, %v3207_v24, %v2939_v12 }
 0x631   : > { %v2811_v57 = vpop.permute.xlu0 %2810  ;;  %v2909_v20 = vpop.permute.xlu2 %2908  ;;  %3654 = vmatmul.msk.f32.gmra.mxu3 %vm1662_vm13, %v3239_v41  ;;  %v8906_v41 = vld [vmem:[#allocation157_spill] sm:$0xff] }
 0x632   : > { %v3191_v2 = vsel %vm1587_vm12, %v3159_v11, %v2811_v57  ;;  %v8908_v11 = vld [vmem:[#allocation195_spill] sm:$0xff] }
 0x633   : > { %v3223_v30 = vsel %vm1620_vm11, %v3191_v2, %v2907_v3  ;;  %v3000_v3 = vsel %vm225_vm0, %v8899_v0, %v8898_v61  ;;  %v2211_v57 = vrot.slane %v8908_v11, 2  ;;  %v8911_v0 = vld [vmem:[#allocation124_spill] sm:$0xff] }
 0x634   : > { %3638 = vmatmul.msk.f32.gmra.mxu1 %vm1662_vm13, %v3223_v30  ;;  %v3032_v13 = vsel %vm1422_vm6, %v3000_v3, %v8900_v19 }
 0x635   : > { %2762 = vrot.lane.b32.xlu1 %v7495_v16, %s3775_s29  ;;  %v3064_v38 = vsel %vm1455_vm7, %v3032_v13, %v8902_v39  ;;  %v8913_v13 = vld [vmem:[#allocation48_spill] sm:$0xff] }
 0x636   : > { %v3096_v62 = vsel %vm1488_vm9, %v3064_v38, %v8903_v60  ;;  %v8914_v60 = vld [vmem:[#allocation165_spill] sm:$0xff] }
 0x637   : > { %2858 = vrot.lane.b32.xlu0 %v8896_v35, %s3776_s30  ;;  %2920 = vrot.lane.b32.xlu2 %v8897_v49, %s3777_s6  ;;  %v2749_v22 = vpop.permute.xlu1 %2748  ;;  %v3128_v33 = vsel %vm1521_vm8, %v3096_v62, %v7093_v10  ;;  %v8907_v10 = vld [vmem:[#allocation83_spill] sm:$0xff] }
 0x638   : > { %v3176_v46 = vsel %vm1554_vm10, %v7136_v34, %v2749_v22  ;;  %v3160_v9 = vsel %vm1554_vm10, %v3128_v33, %v2717_v17  ;;  %v8909_v49 = vld [vmem:[#allocation123_spill] sm:$0xff] }
 0x639   : > { %v2845_v1 = vpop.permute.xlu0 %2844  ;;  %v2719_v58 = vpop.permute.xlu2 %2718 }
 0x63a   : > { %v3208_v37 = vsel %vm1587_vm12, %v3176_v46, %v2845_v1  ;;  %v8912_v46 = vld [vmem:[#allocation106_spill] sm:$0xff] }
 0x63d   : > { %2954 = vrot.lane.b32.xlu1 %v8901_v6, %s3777_s6 }
 0x63f   : > { %2826 = vrot.lane.b32.xlu0 %v8904_v23, %s3776_s30  ;;  %2730 = vrot.lane.b32.xlu2 %v7147_v21, %s3775_s29  ;;  %v2941_v34 = vpop.permute.xlu1 %2940  ;;  %v8905_v21 = vld [vmem:[#allocation203_spill] sm:$0xff] }
 0x640   : > { %v3240_v24 = vsel %vm1620_vm11, %v3208_v37, %v2941_v34  ;;  %v2210_v35 = vrot.slane %v8905_v21, 2 }
 0x641   : > { %v2813_v4 = vpop.permute.xlu0 %2812  ;;  %v2911_v12 = vpop.permute.xlu2 %2910  ;;  %3655 = vmatmul.msk.f32.gmra.mxu3 %vm1662_vm13, %v3240_v24 }
 0x642   : > { %v3192_v15 = vsel %vm1587_vm12, %v3160_v9, %v2813_v4  ;;  %v2212_v61 = vsel %vm515_vm4, %v2210_v35, %v2211_v57 }
 0x643   : > { %v3224_v36 = vsel %vm1620_vm11, %v3192_v15, %v2909_v20  ;;  %v8910_v20 = vld [vmem:[#allocation109_spill] sm:$0xff] }
 0x644   : > { %3639 = vmatmul.msk.f32.gmra.mxu1 %vm1662_vm13, %v3224_v36  ;;  %v3001_v22 = vsel %vm225_vm0, %v8910_v20, %v8909_v49  ;;  %v8917_v36 = vld [vmem:[#allocation45_spill] sm:$0xff]  ;;  %v8921_v49 = vld [vmem:[#allocation86_spill] sm:$0xff]  ;;  %v8922_v20 = vld [vmem:[#allocation199_spill] sm:$0xff] }
 0x645   : > { %2764 = vrot.lane.b32.xlu1 %v8905_v21, %s3775_s29  ;;  %v3033_v3 = vsel %vm1422_vm6, %v3001_v22, %v8911_v0  ;;  %v2213_v21 = vrot.slane %v8917_v36, 2 }
 0x646   : > { %v3065_v19 = vsel %vm1455_vm7, %v3033_v3, %v8912_v46 }
 0x647   : > { %2860 = vrot.lane.b32.xlu0 %v8906_v41, %s3776_s30  ;;  %2922 = vrot.lane.b32.xlu2 %v8907_v10, %s3777_s6  ;;  %v2751_v17 = vpop.permute.xlu1 %2750  ;;  %v3097_v39 = vsel %vm1488_vm9, %v3065_v19, %v8913_v13  ;;  %v8918_v41 = vld [vmem:[#allocation76_spill] sm:$0xff]  ;;  %v8919_v10 = vld [vmem:[#allocation47_spill] sm:$0xff]  ;;  %v2214_v22 = vsel %vm515_vm4, %v2211_v57, %v2213_v21 }
 0x648   : > { %v3177_v1 = vsel %vm1554_vm10, %v7270_v55, %v2751_v17  ;;  %v3129_v62 = vsel %vm1521_vm8, %v3097_v39, %v8914_v60  ;;  %v1992_v60 = vld [vmem:[#allocation2 + $0x1a0] sm:$0xff]  ;;  %v8927_v21 = vld [vmem:[#allocation79_spill] sm:$0xff] }
 0x649   : > { %v2847_v2 = vpop.permute.xlu0 %2846  ;;  %v2721_v30 = vpop.permute.xlu2 %2720  ;;  %v3161_v23 = vsel %vm1554_vm10, %v3129_v62, %v2719_v58 }
 0x64a   : > { %v3209_v38 = vsel %vm1587_vm12, %v3177_v1, %v2847_v2  ;;  %v8920_v2 = vld [vmem:[#allocation105_spill] sm:$0xff]  ;;  %v8923_v1 = vld [vmem:[#allocation68_spill] sm:$0xff] }
 0x64d   : > { %2956 = vrot.lane.b32.xlu1 %v2212_v61, %s3777_s6 }
 0x64f   : > { %2670 = vrot.lane.b32.xlu0 %v8901_v6, %s3774_s28  ;;  %2732 = vrot.lane.b32.xlu2 %v7346_v56, %s3775_s29  ;;  %v2943_v55 = vpop.permute.xlu1 %2942  ;;  %v8915_v56 = vld [vmem:[#allocation144_spill] sm:$0xff]  ;;  %v8916_v6 = vld [vmem:[#allocation142_spill] sm:$0xff] }
 0x650   : > { %v3241_v37 = vsel %vm1620_vm11, %v3209_v38, %v2943_v55 }
 0x651   : > { %v2815_v34 = vpop.permute.xlu0 %2814  ;;  %v2913_v33 = vpop.permute.xlu2 %2912  ;;  %3656 = vmatmul.msk.f32.gmra.mxu3 %vm1662_vm13, %v3241_v37 }
 0x652   : > { %v3193_v24 = vsel %vm1587_vm12, %v3161_v23, %v2815_v34  ;;  %v2224_v23 = vrot.slane %v1992_v60, 2  ;;  %v2219_v34 = vrot.slane %v1992_v60, 1 }
 0x653   : > { %v3225_v9 = vsel %vm1620_vm11, %v3193_v24, %v2911_v12  ;;  %v3002_v12 = vsel %vm225_vm0, %v8919_v10, %v8918_v41  ;;  %v8928_v41 = vld [vmem:[#allocation127_spill] sm:$0xff] }
 0x654   : > { %3640 = vmatmul.msk.f32.gmra.mxu1 %vm1662_vm13, %v3225_v9  ;;  %v3034_v35 = vsel %vm1422_vm6, %v3002_v12, %v8920_v2  ;;  %v8929_v12 = vld [vmem:[#allocation178_spill] sm:$0xff] }
 0x655   : > { %2828 = vrot.lane.b32.xlu1 %v8915_v56, %s3776_s30  ;;  %v8925_v56 = vld [vmem:[#allocation187_spill] sm:$0xff] }
 0x657   : > { %2924 = vrot.lane.b32.xlu0 %v8916_v6, %s3777_s6  ;;  %2766 = vrot.lane.b32.xlu2 %v8908_v11, %s3775_s29  ;;  %v2753_v58 = vpop.permute.xlu1 %2752  ;;  %v3066_v11 = vsel %vm1455_vm7, %v3034_v35, %v8922_v20 }
 0x658   : > { %v3178_v17 = vsel %vm1554_vm10, %v7293_v8, %v2753_v58  ;;  %v3098_v0 = vsel %vm1488_vm9, %v3066_v11, %v8923_v1 }
 0x659   : > { %v2849_v4 = vpop.permute.xlu0 %2848  ;;  %v2723_v15 = vpop.permute.xlu2 %2722  ;;  %v3130_v46 = vsel %vm1521_vm8, %v3098_v0, %v7098_v48  ;;  %v8924_v48 = vld [vmem:[#allocation117_spill] sm:$0xff] }
 0x65a   : > { %v3210_v3 = vsel %vm1587_vm12, %v3178_v17, %v2849_v4  ;;  %v3162_v13 = vsel %vm1554_vm10, %v3130_v46, %v2721_v30  ;;  %v8926_v4 = vld [vmem:[#allocation113_spill] sm:$0xff] }
 0x65d   : > { %2862 = vrot.lane.b32.xlu1 %v8921_v49, %s3776_s30 }
 0x65f   : > { %2734 = vrot.lane.b32.xlu0 %v7387_v45, %s3775_s29  ;;  %2958 = vrot.lane.b32.xlu2 %v2214_v22, %s3777_s6  ;;  %v2945_v8 = vpop.permute.xlu1 %2944  ;;  %v1991_v45 = vld [vmem:[#allocation2 + $0x198] sm:$0xff] }
 0x660   : > { %v3242_v19 = vsel %vm1620_vm11, %v3210_v3, %v2945_v8  ;;  %v2218_v62 = vrot.slane %v1991_v45, 1  ;;  %v2223_v37 = vrot.slane %v1991_v45, 2  ;;  %v1993_v3 = vld [vmem:[#allocation2 + $0x1a8] sm:$0x3] }
 0x661   : > { %v2817_v39 = vpop.permute.xlu0 %2816  ;;  %v2915_v57 = vpop.permute.xlu2 %2914  ;;  %3657 = vmatmul.msk.f32.gmra.mxu3 %vm1662_vm13, %v3242_v19  ;;  %v2221_v8 = vrot.slane %v1993_v3, 1 }
 0x662   : > { %v3194_v38 = vsel %vm1587_vm12, %v3162_v13, %v2817_v39  ;;  %v2225_v6 = vsel %vm515_vm4, %v2223_v37, %v2224_v23  ;;  %v2220_v58 = vsel %vm434_vm2, %v2218_v62, %v2219_v34  ;;  %v8931_v13 = vld [vmem:[#allocation62_spill] sm:$0xff] }
 0x663   : > { %v3226_v55 = vsel %vm1620_vm11, %v3194_v38, %v2913_v33  ;;  %v3003_v33 = vsel %vm225_vm0, %v7107_v18, %v8925_v56  ;;  %v3004_v39 = vsel %vm225_vm0, %v7165_v40, %v8931_v13  ;;  %v2222_v38 = vsel %vm434_vm2, %v2219_v34, %v2221_v8  ;;  %v8935_v40 = vld [vmem:[#allocation170_spill] sm:$0xff]  ;;  %v8936_v34 = vld [vmem:[#allocation200_spill] sm:$0xff] }
 0x664   : > { %3641 = vmatmul.msk.f32.gmra.mxu1 %vm1662_vm13, %v3226_v55  ;;  %v3035_v36 = vsel %vm1422_vm6, %v3003_v33, %v8926_v4  ;;  %v8944_v8 = vld [vmem:[#allocation22_spill] sm:$0xff] }
 0x665   : > { %2672 = vrot.lane.b32.xlu1 %v2212_v61, %s3774_s28  ;;  %v3067_v10 = vsel %vm1455_vm7, %v3035_v36, %v8928_v41 }
 0x666   : > { %v3099_v17 = vsel %vm1488_vm9, %v3067_v10, %v8929_v12  ;;  %v8937_v10 = vld [vmem:[#allocation5_spill] sm:$0xff] }
 0x667   : > { %2768 = vrot.lane.b32.xlu0 %v1991_v45, %s3775_s29  ;;  %2830 = vrot.lane.b32.xlu2 %v8924_v48, %s3776_s30  ;;  %v2755_v30 = vpop.permute.xlu1 %2754  ;;  %v3131_v2 = vsel %vm1521_vm8, %v3099_v17, %v7111_v44  ;;  %v8930_v44 = vld [vmem:[#allocation72_spill] sm:$0xff]  ;;  %v8933_v45 = vld [vmem:[#allocation131_spill] sm:$0xff]  ;;  %v2226_v48 = vrot.slane %v1993_v3, 2 }
 0x668   : > { %v3179_v61 = vsel %vm1554_vm10, %v7184_v31, %v2755_v30  ;;  %v3163_v49 = vsel %vm1554_vm10, %v3131_v2, %v2723_v15  ;;  %v8934_v30 = vld [vmem:[#allocation91_spill] sm:$0xff] }
 0x669   : > { %v2851_v24 = vpop.permute.xlu0 %2850  ;;  %v2725_v9 = vpop.permute.xlu2 %2724  ;;  %v2227_v36 = vsel %vm515_vm4, %v2224_v23, %v2226_v48  ;;  %v8938_v23 = vld [vmem:[#allocation19_spill] sm:$0xff] }
 0x66a   : > { %v3211_v18 = vsel %vm1587_vm12, %v3179_v61, %v2851_v24 }
 0x66d   : > { %2926 = vrot.lane.b32.xlu1 %v8927_v21, %s3777_s6 }
 0x66f   : > { %2960 = vrot.lane.b32.xlu0 %v2225_v6, %s3777_s6  ;;  %2864 = vrot.lane.b32.xlu2 %v2220_v58, %s3776_s30  ;;  %v2947_v31 = vpop.permute.xlu1 %2946 }
 0x670   : > { %v3243_v35 = vsel %vm1620_vm11, %v3211_v18, %v2947_v31  ;;  %v8939_v31 = vld [vmem:[#allocation104_spill] sm:$0xff] }
 0x671   : > { %v2819_v20 = vpop.permute.xlu0 %2818  ;;  %v2917_v11 = vpop.permute.xlu2 %2916  ;;  %3658 = vmatmul.msk.f32.gmra.mxu3 %vm1662_vm13, %v3243_v35 }
 0x672   : > { %v3195_v1 = vsel %vm1587_vm12, %v3163_v49, %v2819_v20  ;;  %v8940_v20 = vld [vmem:[#allocation156_spill] sm:$0xff] }
 0x673   : > { %v3227_v0 = vsel %vm1620_vm11, %v3195_v1, %v2915_v57 }
 0x674   : > { %3642 = vmatmul.msk.f32.gmra.mxu1 %vm1662_vm13, %v3227_v0  ;;  %v8941_v0 = vld [vmem:[#allocation138_spill] sm:$0xff] }
 0x675   : > { %2736 = vrot.lane.b32.xlu1 %v7188_v5, %s3775_s29  ;;  %v8932_v5 = vld [vmem:[#allocation55_spill] sm:$0xff] }
 0x676   : > { %v3036_v55 = vsel %vm1422_vm6, %v3004_v39, %v8932_v5 }
 0x677   : > { %2832 = vrot.lane.b32.xlu0 %v8930_v44, %s3776_s30  ;;  %2674 = vrot.lane.b32.xlu2 %v2214_v22, %s3774_s28  ;;  %v2757_v15 = vpop.permute.xlu1 %2756  ;;  %v3068_v22 = vsel %vm1455_vm7, %v3036_v55, %v8933_v45  ;;  %v8942_v44 = vld [vmem:[#allocation99_spill] sm:$0xff] }
 0x678   : > { %v3180_v57 = vsel %vm1554_vm10, %v7298_v53, %v2757_v15  ;;  %v3100_v62 = vsel %vm1488_vm9, %v3068_v22, %v8934_v30  ;;  %v8943_v15 = vld [vmem:[#allocation44_spill] sm:$0xff] }
 0x679   : > { %v2853_v46 = vpop.permute.xlu0 %2852  ;;  %v2727_v19 = vpop.permute.xlu2 %2726  ;;  %v3132_v24 = vsel %vm1521_vm8, %v3100_v62, %v8936_v34 }
 0x67a   : > { %v3212_v37 = vsel %vm1587_vm12, %v3180_v57, %v2853_v46  ;;  %v3164_v33 = vsel %vm1554_vm10, %v3132_v24, %v2725_v9 }
 0x67d   : > { %2770 = vrot.lane.b32.xlu1 %v1992_v60, %s3775_s29  ;;  %v7651_v60 = vld [vmem:[%s7948_s4] ss:$0 sm:$0xff] }
 0x67f   : > { %2866 = vrot.lane.b32.xlu0 %v2222_v38, %s3776_s30  ;;  %2928 = vrot.lane.b32.xlu2 %v8935_v40, %s3777_s6  ;;  %v2949_v53 = vpop.permute.xlu1 %2948 }
 0x680   : > { %v3244_v56 = vsel %vm1620_vm11, %v3212_v37, %v2949_v53 }
 0x681   : > { %v2821_v61 = vpop.permute.xlu0 %2820  ;;  %v2919_v6 = vpop.permute.xlu2 %2918  ;;  %3659 = vmatmul.msk.f32.gmra.mxu3 %vm1662_vm13, %v3244_v56  ;;  %v8947_v56 = vld [vmem:[#allocation171_spill] sm:$0xff] }
 0x682   : > { %v3196_v58 = vsel %vm1587_vm12, %v3164_v33, %v2821_v61  ;;  %v3377_v4 = vpop.f32.mrf.mxu1  ;;  %v3006_v33 = vsel %vm225_vm0, %v7316_v47, %v8947_v56 }
 0x683   : > { %v3378_v21 = vadd.f32 %v7651_v60, %v3377_v4  ;;  %v3228_v41 = vsel %vm1620_vm11, %v3196_v58, %v2917_v11  ;;  %v3005_v11 = vsel %vm225_vm0, %v7253_v50, %v8940_v20  ;;  %v8949_v4 = vld [vmem:[#allocation153_spill] sm:$0xff] }
 0x684   : > { %3643 = vmatmul.msk.f32.gmra.mxu1 %vm1662_vm13, %v3228_v41  ;;  %v3425_v9 = vpop.f32.mrf.mxu3  ;;  %v3037_v3 = vsel %vm1422_vm6, %v3005_v11, %v8941_v0 }
 0x685   : > { %v3473_v12 = vadd.f32 %v3378_v21, %v8937_v10  ;;  %v3426_v17 = vadd.f32 %v7651_v60, %v3425_v9  ;;  %2962 = vrot.lane.b32.xlu1 %v2227_v36, %s3777_s6  ;;  %v8950_v21 = vld [vmem:[#allocation205_spill] sm:$0xff] }
 0x687   : > { %3505 = vst.msk [vmem:[%s7667_s14] sm:$0xff] %vm225_vm0, %v3473_v12  ;;  %v3489_v18 = vadd.f32 %v3426_v17, %v8938_v23  ;;  %2834 = vrot.lane.b32.xlu0 %v8939_v31, %s3776_s30  ;;  %2738 = vrot.lane.b32.xlu2 %v7231_v63, %s3775_s29  ;;  %v2759_v2 = vpop.permute.xlu1 %2758  ;;  %v3069_v63 = vsel %vm1455_vm7, %v3037_v3, %v8943_v15  ;;  %v8953_v15 = vld [vmem:[#allocation148_spill] sm:$0xff] }
 0x688   : > { %v3181_v1 = vsel %vm1554_vm10, %v7323_v14, %v2759_v2  ;;  %v3101_v46 = vsel %vm1488_vm9, %v3069_v63, %v8944_v8  ;;  %v3007_v63 = vsel %vm225_vm0, %v7374_v54, %v8953_v15 }
 0x689   : > { %3521 = vst.msk [vmem:[%s7667_s14 + $0x80] sm:$0xff] %vm225_vm0, %v3489_v18  ;;  %v2855_v35 = vpop.permute.xlu0 %2854  ;;  %v2729_v49 = vpop.permute.xlu2 %2728  ;;  %v3133_v50 = vsel %vm1521_vm8, %v3101_v46, %v7113_v29  ;;  %v8945_v29 = vld [vmem:[#allocation6_spill] sm:$0xff] }
 0x68a   : > { %v3213_v13 = vsel %vm1587_vm12, %v3181_v1, %v2855_v35  ;;  %v3165_v57 = vsel %vm1554_vm10, %v3133_v50, %v2727_v19  ;;  %v8946_v19 = vld [vmem:[#allocation20_spill] sm:$0xff]  ;;  %v8954_v46 = vld [vmem:[#allocation50_spill] sm:$0xff] }
 0x68d   : > { %2930 = vrot.lane.b32.xlu1 %v8942_v44, %s3777_s6 }
 0x68f   : > { %v2951_v39 = vpop.permute.xlu1 %2950 }
 0x690   : > { %v3245_v14 = vsel %vm1620_vm11, %v3213_v13, %v2951_v39  ;;  %v3039_v13 = vsel %vm1422_vm6, %v3007_v63, %v8954_v46  ;;  %v8955_v39 = vld [vmem:[#allocation58_spill] sm:$0xff] }
 0x691   : > { %v2823_v38 = vpop.permute.xlu0 %2822  ;;  %v2921_v5 = vpop.permute.xlu2 %2920  ;;  %3660 = vmatmul.msk.f32.gmra.mxu3 %vm1662_vm13, %v3245_v14  ;;  %v3071_v50 = vsel %vm1455_vm7, %v3039_v13, %v8955_v39 }
 0x692   : > { %v3197_v55 = vsel %vm1587_vm12, %v3165_v57, %v2823_v38  ;;  %v3380_v45 = vpop.f32.mrf.mxu1  ;;  %v8956_v57 = vld [vmem:[#allocation164_spill] sm:$0xff] }
 0x693   : > { %v3381_v22 = vadd.f32 %v7651_v60, %v3380_v45  ;;  %v3229_v48 = vsel %vm1620_vm11, %v3197_v55, %v2919_v6  ;;  %v8948_v6 = vld [vmem:[#allocation152_spill] sm:$0xff]  ;;  %v3103_v38 = vsel %vm1488_vm9, %v3071_v50, %v8956_v57  ;;  %v8957_v45 = vld [vmem:[#allocation111_spill] sm:$0xff] }
 0x694   : > { %3644 = vmatmul.msk.f32.gmra.mxu1 %vm1662_vm13, %v3229_v48  ;;  %v3428_v30 = vpop.f32.mrf.mxu3  ;;  %v3038_v58 = vsel %vm1422_vm6, %v3006_v33, %v8948_v6  ;;  %v3135_v54 = vsel %vm1521_vm8, %v3103_v38, %v8957_v45 }
 0x695   : > { %v3474_v62 = vadd.f32 %v3381_v22, %v8945_v29  ;;  %v3429_v37 = vadd.f32 %v7651_v60, %v3428_v30  ;;  %v3070_v36 = vsel %vm1455_vm7, %v3038_v58, %v8949_v4 }
 0x696   : > { %v3102_v41 = vsel %vm1488_vm9, %v3070_v36, %v8950_v21 }
 0x697   : > { %3506 = vst.msk [vmem:[%s7667_s14 + $0x8] sm:$0xff] %vm225_vm0, %v3474_v62  ;;  %v3490_v40 = vadd.f32 %v3429_v37, %v8946_v19  ;;  %v2761_v53 = vpop.permute.xlu1 %2760  ;;  %v3134_v12 = vsel %vm1521_vm8, %v3102_v41, %v7128_v52  ;;  %v8951_v52 = vld [vmem:[#allocation3_spill] sm:$0xff] }
 0x698   : > { %v3182_v61 = vsel %vm1554_vm10, %v7223_v28, %v2761_v53  ;;  %v3166_v28 = vsel %vm1554_vm10, %v3134_v12, %v2729_v49  ;;  %v8952_v49 = vld [vmem:[#allocation21_spill] sm:$0xff] }
 0x699   : > { %3522 = vst.msk [vmem:[%s7667_s14 + $0x88] sm:$0xff] %vm225_vm0, %v3490_v40  ;;  %v2857_v34 = vpop.permute.xlu0 %2856  ;;  %v2731_v24 = vpop.permute.xlu2 %2730  ;;  %v8958_v40 = vld [vmem:[#allocation4_spill] sm:$0xff] }
 0x69a   : > { %v3214_v9 = vsel %vm1587_vm12, %v3182_v61, %v2857_v34 }
 0x69f   : > { %v2953_v10 = vpop.permute.xlu1 %2952 }
 0x6a0   : > { %v3246_v47 = vsel %vm1620_vm11, %v3214_v9, %v2953_v10  ;;  %v8960_v9 = vld [vmem:[#allocation121_spill] sm:$0xff] }
 0x6a1   : > { %v2825_v17 = vpop.permute.xlu0 %2824  ;;  %3661 = vmatmul.msk.f32.gmra.mxu3 %vm1662_vm13, %v3246_v47  ;;  %v3383_v18 = vpop.f32.mrf.mxu1  ;;  %v3008_v10 = vsel %vm225_vm0, %v7418_v26, %v8960_v9 }
 0x6a2   : > { %v3198_v23 = vsel %vm1587_vm12, %v3166_v28, %v2825_v17  ;;  %v3384_v31 = vadd.f32 %v7651_v60, %v3383_v18  ;;  %v2923_v35 = vpop.permute.xlu2 %2922  ;;  %v8961_v28 = vld [vmem:[#allocation175_spill] sm:$0xff] }
 0x6a3   : > { %v3230_v2 = vsel %vm1620_vm11, %v3198_v23, %v2921_v5  ;;  %v3040_v17 = vsel %vm1422_vm6, %v3008_v10, %v8961_v28  ;;  %v8962_v23 = vld [vmem:[#allocation71_spill] sm:$0xff] }
 0x6a4   : > { %3645 = vmatmul.msk.f32.gmra.mxu1 %vm1662_vm13, %v3230_v2  ;;  %v3431_v20 = vpop.f32.mrf.mxu3  ;;  %v3475_v11 = vadd.f32 %v3384_v31, %v8951_v52  ;;  %v3072_v18 = vsel %vm1455_vm7, %v3040_v17, %v8962_v23  ;;  %v8963_v2 = vld [vmem:[#allocation176_spill] sm:$0xff] }
 0x6a5   : > { %v3432_v1 = vadd.f32 %v7651_v60, %v3431_v20  ;;  %v8964_v20 = vld [vmem:[#allocation7_spill] sm:$0xff] }
 0x6a6   : > { %3507 = vst.msk [vmem:[%s7667_s14 + $0x10] sm:$0xff] %vm225_vm0, %v3475_v11 }
 0x6a7   : > { %v3491_v0 = vadd.f32 %v3432_v1, %v8952_v49  ;;  %v2763_v3 = vpop.permute.xlu1 %2762  ;;  %v8965_v49 = vld [vmem:[#allocation25_spill] sm:$0xff] }
 0x6a8   : > { %v3183_v8 = vsel %vm1554_vm10, %v7328_v59, %v2763_v3  ;;  %v3167_v59 = vsel %vm1554_vm10, %v3135_v54, %v2731_v24  ;;  %v8959_v24 = vld [vmem:[#allocation23_spill] sm:$0xff] }
 0x6a9   : > { %3523 = vst.msk [vmem:[%s7667_s14 + $0x90] sm:$0xff] %vm225_vm0, %v3491_v0  ;;  %v2859_v44 = vpop.permute.xlu0 %2858 }
 0x6aa   : > { %v2733_v14 = vpop.permute.xlu2 %2732  ;;  %v3215_v5 = vsel %vm1587_vm12, %v3183_v8, %v2859_v44  ;;  %v8966_v44 = vld [vmem:[#allocation103_spill] sm:$0xff]  ;;  %v8967_v8 = vld [vmem:[#allocation60_spill] sm:$0xff] }
 0x6ab   : > { %v3025_v15 = vsel %vm225_vm0, %v7430_v25, %v8966_v44 }
 0x6ac   : > { %v3057_v46 = vsel %vm1422_vm6, %v3025_v15, %v8967_v8  ;;  %v8978_v15 = vld [vmem:[#allocation160_spill] sm:$0xff] }
 0x6af   : > { %v2955_v55 = vpop.permute.xlu1 %2954 }
 0x6b0   : > { %v3247_v22 = vsel %vm1620_vm11, %v3215_v5, %v2955_v55 }
 0x6b1   : > { %v2827_v48 = vpop.permute.xlu0 %2826  ;;  %3662 = vmatmul.msk.f32.gmra.mxu3 %vm1662_vm13, %v3247_v22  ;;  %v3386_v29 = vpop.f32.mrf.mxu1 }
 0x6b2   : > { %v3199_v30 = vsel %vm1587_vm12, %v3167_v59, %v2827_v48  ;;  %v3387_v62 = vadd.f32 %v7651_v60, %v3386_v29  ;;  %v2767_v61 = vpop.permute.xlu2 %2766  ;;  %v8970_v29 = vld [vmem:[#allocation8_spill] sm:$0xff] }
 0x6b3   : > { %v3231_v37 = vsel %vm1620_vm11, %v3199_v30, %v2923_v35  ;;  %v3104_v35 = vsel %vm1488_vm9, %v3072_v18, %v8963_v2  ;;  %v8976_v2 = vld [vmem:[#allocation9_spill] sm:$0xff] }
 0x6b4   : > { %3646 = vmatmul.msk.f32.gmra.mxu1 %vm1662_vm13, %v3231_v37  ;;  %v3434_v19 = vpop.f32.mrf.mxu3  ;;  %v3476_v53 = vadd.f32 %v3387_v62, %v8958_v40  ;;  %v3136_v26 = vsel %vm1521_vm8, %v3104_v35, %v7133_v43  ;;  %v8968_v43 = vld [vmem:[#allocation49_spill] sm:$0xff]  ;;  %v8971_v40 = vld [vmem:[#allocation128_spill] sm:$0xff] }
 0x6b5   : > { %v3435_v34 = vadd.f32 %v7651_v60, %v3434_v19  ;;  %v3168_v1 = vsel %vm1554_vm10, %v3136_v26, %v2733_v14  ;;  %v3089_v39 = vsel %vm1455_vm7, %v3057_v46, %v8968_v43  ;;  %v8969_v14 = vld [vmem:[#allocation130_spill] sm:$0xff]  ;;  %v8979_v46 = vld [vmem:[#allocation204_spill] sm:$0xff] }
 0x6b6   : > { %3508 = vst.msk [vmem:[%s7667_s14 + $0x18] sm:$0xff] %vm225_vm0, %v3476_v53  ;;  %v3121_v57 = vsel %vm1488_vm9, %v3089_v39, %v8969_v14  ;;  %v3026_v53 = vsel %vm225_vm0, %v7463_v51, %v8971_v40 }
 0x6b7   : > { %v3492_v56 = vadd.f32 %v3435_v34, %v8959_v24  ;;  %v2765_v33 = vpop.permute.xlu1 %2764  ;;  %v8972_v34 = vld [vmem:[#allocation26_spill] sm:$0xff] }
 0x6b8   : > { %v3184_v58 = vsel %vm1554_vm10, %v7344_v42, %v2765_v33  ;;  %v8973_v33 = vld [vmem:[#allocation177_spill] sm:$0xff] }
 0x6b9   : > { %3524 = vst.msk [vmem:[%s7667_s14 + $0x98] sm:$0xff] %vm225_vm0, %v3492_v56  ;;  %v2861_v6 = vpop.permute.xlu0 %2860 }
 0x6ba   : > { %v3216_v4 = vsel %vm1587_vm12, %v3184_v58, %v2861_v6  ;;  %v2959_v12 = vpop.permute.xlu2 %2958  ;;  %v8974_v6 = vld [vmem:[#allocation94_spill] sm:$0xff] }
 0x6bf   : > { %v2957_v36 = vpop.permute.xlu1 %2956 }
 0x6c0   : > { %v3248_v21 = vsel %vm1620_vm11, %v3216_v4, %v2957_v36  ;;  %v8975_v36 = vld [vmem:[#allocation192_spill] sm:$0xff] }
 0x6c1   : > { %v2671_v41 = vpop.permute.xlu0 %2670  ;;  %3663 = vmatmul.msk.f32.gmra.mxu3 %vm1662_vm13, %v3248_v21  ;;  %v3389_v47 = vpop.f32.mrf.mxu1 }
 0x6c2   : > { %v3390_v42 = vadd.f32 %v7651_v60, %v3389_v47  ;;  %v3153_v25 = vsel %vm1521_vm8, %v3121_v57, %v2671_v41  ;;  %v2831_v38 = vpop.permute.xlu2 %2830 }
 0x6c3   : > { %v3185_v5 = vsel %vm1554_vm10, %v3153_v25, %v2767_v61  ;;  %v3058_v61 = vsel %vm1422_vm6, %v3026_v53, %v8973_v33  ;;  %v8984_v33 = vld [vmem:[#allocation11_spill] sm:$0xff] }
 0x6c4   : > { %v3437_v31 = vpop.f32.mrf.mxu3  ;;  %v3477_v52 = vadd.f32 %v3390_v42, %v8964_v20  ;;  %v3090_v58 = vsel %vm1455_vm7, %v3058_v61, %v8974_v6 }
 0x6c5   : > { %v3438_v11 = vadd.f32 %v7651_v60, %v3437_v31  ;;  %v3122_v21 = vsel %vm1488_vm9, %v3090_v58, %v8975_v36 }
 0x6c6   : > { %3509 = vst.msk [vmem:[%s7667_s14 + $0x20] sm:$0xff] %vm225_vm0, %v3477_v52  ;;  %v8977_v52 = vld [vmem:[#allocation28_spill] sm:$0xff] }
 0x6c7   : > { %v3493_v0 = vadd.f32 %v3438_v11, %v8965_v49  ;;  %v2829_v3 = vpop.permute.xlu1 %2828 }
 0x6c8   : > { %v3200_v63 = vsel %vm1587_vm12, %v3168_v1, %v2829_v3 }
 0x6c9   : > { %3525 = vst.msk [vmem:[%s7667_s14 + $0xa0] sm:$0xff] %vm225_vm0, %v3493_v0  ;;  %v2925_v13 = vpop.permute.xlu0 %2924 }
 0x6ca   : > { %v3232_v50 = vsel %vm1620_vm11, %v3200_v63, %v2925_v13  ;;  %v2865_v19 = vpop.permute.xlu2 %2864  ;;  %v3027_v63 = vsel %vm225_vm0, %v7495_v16, %v8978_v15  ;;  %v8982_v16 = vld [vmem:[#allocation10_spill] sm:$0xff]  ;;  %v8992_v15 = vld [vmem:[#allocation39_spill] sm:$0xff] }
 0x6cb   : > { %3647 = vmatmul.msk.f32.gmra.mxu1 %vm1662_vm13, %v3232_v50  ;;  %v3059_v13 = vsel %vm1422_vm6, %v3027_v63, %v8979_v46  ;;  %v8981_v50 = vld [vmem:[#allocation69_spill] sm:$0xff] }
 0x6cf   : > { %v2863_v55 = vpop.permute.xlu1 %2862 }
 0x6d0   : > { %v3217_v45 = vsel %vm1587_vm12, %v3185_v5, %v2863_v55 }
 0x6d1   : > { %v2735_v54 = vpop.permute.xlu0 %2734  ;;  %v3249_v22 = vsel %vm1620_vm11, %v3217_v45, %v2959_v12  ;;  %v3392_v59 = vpop.f32.mrf.mxu1 }
 0x6d2   : > { %3664 = vmatmul.msk.f32.gmra.mxu3 %vm1662_vm13, %v3249_v22  ;;  %v3393_v48 = vadd.f32 %v7651_v60, %v3392_v59  ;;  %v3169_v51 = vsel %vm1554_vm10, %v7174_v32, %v2735_v54  ;;  %v2675_v47 = vpop.permute.xlu2 %2674  ;;  %v8983_v59 = vld [vmem:[#allocation29_spill] sm:$0xff] }
 0x6d3   : > { %v3201_v12 = vsel %vm1587_vm12, %v3169_v51, %v2831_v38 }
 0x6d4   : > { %v3440_v30 = vpop.f32.mrf.mxu3  ;;  %v3478_v62 = vadd.f32 %v3393_v48, %v8970_v29 }
 0x6d5   : > { %v3441_v37 = vadd.f32 %v7651_v60, %v3440_v30 }
 0x6d6   : > { %3510 = vst.msk [vmem:[%s7667_s14 + $0x28] sm:$0xff] %vm225_vm0, %v3478_v62 }
 0x6d7   : > { %v3494_v24 = vadd.f32 %v3441_v37, %v8972_v34  ;;  %v2673_v56 = vpop.permute.xlu1 %2672 }
 0x6d8   : > { %v3154_v41 = vsel %vm1521_vm8, %v3122_v21, %v2673_v56 }
 0x6d9   : > { %3526 = vst.msk [vmem:[%s7667_s14 + $0xa8] sm:$0xff] %vm225_vm0, %v3494_v24  ;;  %v2769_v4 = vpop.permute.xlu0 %2768 }
 0x6da   : > { %v3186_v9 = vsel %vm1554_vm10, %v3154_v41, %v2769_v4  ;;  %v2929_v0 = vpop.permute.xlu2 %2928  ;;  %v8986_v41 = vld [vmem:[#allocation12_spill] sm:$0xff] }
 0x6db   : > { %v3218_v42 = vsel %vm1587_vm12, %v3186_v9, %v2865_v19 }
 0x6df   : > { %v2927_v10 = vpop.permute.xlu1 %2926 }
 0x6e0   : > { %v3233_v28 = vsel %vm1620_vm11, %v3201_v12, %v2927_v10  ;;  %v8987_v12 = vld [vmem:[#allocation32_spill] sm:$0xff] }
 0x6e1   : > { %v2961_v17 = vpop.permute.xlu0 %2960  ;;  %3648 = vmatmul.msk.f32.gmra.mxu1 %vm1662_vm13, %v3233_v28  ;;  %v3395_v23 = vpop.f32.mrf.mxu1 }
 0x6e2   : > { %v3250_v18 = vsel %vm1620_vm11, %v3218_v42, %v2961_v17  ;;  %v3396_v32 = vadd.f32 %v7651_v60, %v3395_v23  ;;  %v2739_v62 = vpop.permute.xlu2 %2738  ;;  %v8988_v42 = vld [vmem:[#allocation13_spill] sm:$0xff] }
 0x6e3   : > { %3665 = vmatmul.msk.f32.gmra.mxu3 %vm1662_vm13, %v3250_v18  ;;  %v3171_v19 = vsel %vm1554_vm10, %v7181_v27, %v2739_v62  ;;  %v8985_v27 = vld [vmem:[#allocation31_spill] sm:$0xff] }
 0x6e4   : > { %v3443_v31 = vpop.f32.mrf.mxu3  ;;  %v3479_v35 = vadd.f32 %v3396_v32, %v8976_v2 }
 0x6e5   : > { %v3444_v20 = vadd.f32 %v7651_v60, %v3443_v31  ;;  %v8989_v31 = vld [vmem:[#allocation35_spill] sm:$0xff] }
 0x6e6   : > { %3511 = vst.msk [vmem:[%s7667_s14 + $0x30] sm:$0xff] %vm225_vm0, %v3479_v35 }
 0x6e7   : > { %v3495_v11 = vadd.f32 %v3444_v20, %v8977_v52  ;;  %v2737_v26 = vpop.permute.xlu1 %2736  ;;  %v8990_v52 = vld [vmem:[#allocation14_spill] sm:$0xff] }
 0x6e8   : > { %v3170_v1 = vsel %vm1554_vm10, %v7101_v7, %v2737_v26  ;;  %v8980_v7 = vld [vmem:[#allocation155_spill] sm:$0xff] }
 0x6e9   : > { %3527 = vst.msk [vmem:[%s7667_s14 + $0xb0] sm:$0xff] %vm225_vm0, %v3495_v11  ;;  %v2833_v49 = vpop.permute.xlu0 %2832  ;;  %v3091_v43 = vsel %vm1455_vm7, %v3059_v13, %v8980_v7  ;;  %v8993_v13 = vld [vmem:[#allocation15_spill] sm:$0xff] }
 0x6ea   : > { %v3202_v3 = vsel %vm1587_vm12, %v3170_v1, %v2833_v49  ;;  %v3123_v14 = vsel %vm1488_vm9, %v3091_v43, %v8981_v50  ;;  %v8991_v49 = vld [vmem:[#allocation36_spill] sm:$0xff] }
 0x6eb   : > { %v3234_v44 = vsel %vm1620_vm11, %v3202_v3, %v2929_v0  ;;  %v3155_v38 = vsel %vm1521_vm8, %v3123_v14, %v2675_v47  ;;  %v8994_v50 = vld [vmem:[#allocation40_spill] sm:$0xff] }
 0x6ec   : > { %3649 = vmatmul.msk.f32.gmra.mxu1 %vm1662_vm13, %v3234_v44 }
 0x6ef   : > { %v2771_v8 = vpop.permute.xlu1 %2770 }
 0x6f0   : > { %v3187_v5 = vsel %vm1554_vm10, %v3155_v38, %v2771_v8  ;;  %v8995_v38 = vld [vmem:[#allocation16_spill] sm:$0xff] }
 0x6f1   : > { %v3398_v39 = vpop.f32.mrf.mxu1  ;;  %v2867_v57 = vpop.permute.xlu0 %2866 }
 0x6f2   : > { %v3399_v25 = vadd.f32 %v7651_v60, %v3398_v39  ;;  %v3219_v22 = vsel %vm1587_vm12, %v3187_v5, %v2867_v57 }
 0x6f4   : > { %v3480_v55 = vadd.f32 %v3399_v25, %v8982_v16  ;;  %v3446_v45 = vpop.f32.mrf.mxu3 }
 0x6f5   : > { %v3447_v54 = vadd.f32 %v7651_v60, %v3446_v45  ;;  %v8996_v45 = vld [vmem:[#allocation119_spill] sm:$0xff] }
 0x6f6   : > { %3512 = vst.msk [vmem:[%s7667_s14 + $0x38] sm:$0xff] %vm225_vm0, %v3480_v55 }
 0x6f7   : > { %v3496_v48 = vadd.f32 %v3447_v54, %v8983_v59  ;;  %v2963_v30 = vpop.permute.xlu1 %2962 }
 0x6f8   : > { %v3251_v29 = vsel %vm1620_vm11, %v3219_v22, %v2963_v30 }
 0x6f9   : > { %3528 = vst.msk [vmem:[%s7667_s14 + $0xb8] sm:$0xff] %vm225_vm0, %v3496_v48  ;;  %3666 = vmatmul.msk.f32.gmra.mxu3 %vm1662_vm13, %v3251_v29  ;;  %v2835_v37 = vpop.permute.xlu0 %2834  ;;  %v8997_v48 = vld [vmem:[#allocation17_spill] sm:$0xff] }
 0x6fa   : > { %v3203_v40 = vsel %vm1587_vm12, %v3171_v19, %v2835_v37  ;;  %v8998_v19 = vld [vmem:[#allocation120_spill] sm:$0xff] }
 0x6ff   : > { %v2931_v53 = vpop.permute.xlu1 %2930 }
 0x700   : > { %v3235_v34 = vsel %vm1620_vm11, %v3203_v40, %v2931_v53 }
 0x701   : > { %v3401_v24 = vpop.f32.mrf.mxu1  ;;  %3650 = vmatmul.msk.f32.gmra.mxu1 %vm1662_vm13, %v3235_v34  ;;  %v8999_v34 = vld [vmem:[#allocation18_spill] sm:$0xff] }
 0x702   : > { %v3402_v56 = vadd.f32 %v7651_v60, %v3401_v24 }
 0x704   : > { %v3481_v61 = vadd.f32 %v3402_v56, %v8984_v33  ;;  %v3449_v6 = vpop.f32.mrf.mxu3 }
 0x705   : > { %v3450_v58 = vadd.f32 %v7651_v60, %v3449_v6 }
 0x706   : > { %3513 = vst.msk [vmem:[%s7667_s14 + $0x40] sm:$0xff] %vm225_vm0, %v3481_v61 }
 0x707   : > { %v3497_v4 = vadd.f32 %v3450_v58, %v8985_v27 }
 0x709   : > { %3529 = vst.msk [vmem:[%s7667_s14 + $0xc0] sm:$0xff] %vm225_vm0, %v3497_v4 }
 0x711   : > { %v3404_v36 = vpop.f32.mrf.mxu1 }
 0x712   : > { %v3405_v21 = vadd.f32 %v7651_v60, %v3404_v36 }
 0x714   : > { %v3482_v51 = vadd.f32 %v3405_v21, %v8986_v41  ;;  %v3452_v9 = vpop.f32.mrf.mxu3 }
 0x715   : > { %v3453_v10 = vadd.f32 %v7651_v60, %v3452_v9 }
 0x716   : > { %3514 = vst.msk [vmem:[%s7667_s14 + $0x48] sm:$0xff] %vm225_vm0, %v3482_v51 }
 0x717   : > { %v3498_v47 = vadd.f32 %v3453_v10, %v8987_v12 }
 0x719   : > { %3530 = vst.msk [vmem:[%s7667_s14 + $0xc8] sm:$0xff] %vm225_vm0, %v3498_v47 }
 0x721   : > { %v3407_v28 = vpop.f32.mrf.mxu1 }
 0x722   : > { %v3408_v17 = vadd.f32 %v7651_v60, %v3407_v28 }
 0x724   : > { %v3483_v23 = vadd.f32 %v3408_v17, %v8988_v42  ;;  %v3455_v18 = vpop.f32.mrf.mxu3 }
 0x725   : > { %v3456_v32 = vadd.f32 %v7651_v60, %v3455_v18 }
 0x726   : > { %3515 = vst.msk [vmem:[%s7667_s14 + $0x50] sm:$0xff] %vm225_vm0, %v3483_v23 }
 0x727   : > { %v3499_v2 = vadd.f32 %v3456_v32, %v8989_v31 }
 0x729   : > { %3531 = vst.msk [vmem:[%s7667_s14 + $0xd0] sm:$0xff] %vm225_vm0, %v3499_v2 }
 0x731   : > { %v3410_v35 = vpop.f32.mrf.mxu1 }
 0x732   : > { %v3411_v20 = vadd.f32 %v7651_v60, %v3410_v35 }
 0x734   : > { %v3484_v11 = vadd.f32 %v3411_v20, %v8990_v52  ;;  %v3458_v26 = vpop.f32.mrf.mxu3 }
 0x735   : > { %v3459_v1 = vadd.f32 %v7651_v60, %v3458_v26 }
 0x736   : > { %3516 = vst.msk [vmem:[%s7667_s14 + $0x58] sm:$0xff] %vm225_vm0, %v3484_v11 }
 0x737   : > { %v3500_v0 = vadd.f32 %v3459_v1, %v8991_v49 }
 0x739   : > { %3532 = vst.msk [vmem:[%s7667_s14 + $0xd8] sm:$0xff] %vm225_vm0, %v3500_v0 }
 0x744   : > { %v3461_v3 = vpop.f32.mrf.mxu3 }
 0x745   : > { %v3462_v44 = vadd.f32 %v7651_v60, %v3461_v3 }
 0x747   : > { %v3501_v63 = vadd.f32 %v3462_v44, %v8992_v15 }
 0x748   : > { %v3413_v8 = vpop.f32.mrf.mxu1 }
 0x749   : > { %3533 = vst.msk [vmem:[%s7667_s14 + $0xe0] sm:$0xff] %vm225_vm0, %v3501_v63  ;;  %v3414_v46 = vadd.f32 %v7651_v60, %v3413_v8 }
 0x74b   : > { %v3485_v7 = vadd.f32 %v3414_v46, %v8993_v13 }
 0x74d   : > { %3517 = vst.msk [vmem:[%s7667_s14 + $0x60] sm:$0xff] %vm225_vm0, %v3485_v7 }
 0x755   : > { %v3464_v43 = vpop.f32.mrf.mxu3 }
 0x756   : > { %v3465_v39 = vadd.f32 %v7651_v60, %v3464_v43 }
 0x758   : > { %v3502_v14 = vadd.f32 %v3465_v39, %v8994_v50 }
 0x75a   : > { %3534 = vst.msk [vmem:[%s7667_s14 + $0xe8] sm:$0xff] %vm225_vm0, %v3502_v14 }
 0x75e   : > { %v3416_v57 = vpop.f32.mrf.mxu1 }
 0x75f   : > { %v3417_v25 = vadd.f32 %v7651_v60, %v3416_v57 }
 0x761   : > { %v3486_v5 = vadd.f32 %v3417_v25, %v8995_v38 }
 0x763   : > { %3518 = vst.msk [vmem:[%s7667_s14 + $0x68] sm:$0xff] %vm225_vm0, %v3486_v5 }
 0x766   : > { %v3467_v16 = vpop.f32.mrf.mxu3 }
 0x767   : > { %v3468_v55 = vadd.f32 %v7651_v60, %v3467_v16 }
 0x769   : > { %v3503_v54 = vadd.f32 %v3468_v55, %v8996_v45  ;;  %v3419_v22 = vpop.f32.mrf.mxu1 }
 0x76a   : > { %v3420_v59 = vadd.f32 %v7651_v60, %v3419_v22 }
 0x76b   : > { %3535 = vst.msk [vmem:[%s7667_s14 + $0xf0] sm:$0xff] %vm225_vm0, %v3503_v54 }
 0x76c   : > { %v3487_v30 = vadd.f32 %v3420_v59, %v8997_v48 }
 0x76e   : > { %3519 = vst.msk [vmem:[%s7667_s14 + $0x70] sm:$0xff] %vm225_vm0, %v3487_v30 }
 0x77c   : > { %v3470_v29 = vpop.f32.mrf.mxu3 }
 0x77d   : > { %v3471_v62 = vadd.f32 %v7651_v60, %v3470_v29 }
 0x77e   : > { %v3422_v37 = vpop.f32.mrf.mxu1 }
 0x77f   : > { %v3504_v40 = vadd.f32 %v3471_v62, %v8998_v19  ;;  %v3423_v53 = vadd.f32 %v7651_v60, %v3422_v37 }
 0x781   : > { %3536 = vst.msk [vmem:[%s7667_s14 + $0xf8] sm:$0xff] %vm225_vm0, %v3504_v40  ;;  %v3488_v24 = vadd.f32 %v3423_v53, %v8999_v34 }
 0x783   : > { %3520 = vst.msk [vmem:[%s7667_s14 + $0x78] sm:$0xff] %vm225_vm0, %v3488_v24 }
 0x784 PF: > { %s15_s18 = sadd.s32 1, %s3767_s18  }
 0x785   : > { %p12_p4 = scmp.ge.s32.totalorder %s15_s18, 4  }
 0x787   :  { %14 = sbr.rel (!%p12_p4) target bundleno = 1 (0x1), region = 72 }

</bundles_post_ra>
